<compile_context>
chip_gen: v6e
topology: v6e:2x2x1
jax: 0.10.0
libtpu: 0.0.40
codegen_flags: <defaults>
</compile_context>

<pallas_src>
import functools

import numpy as np
import jax
import jax.numpy as jnp
from jax import lax
from jax.experimental import pallas as pl
from jax.experimental.pallas import tpu as pltpu

KSIZE = 10          # conv kernel size
PAD = 5             # conv padding
NCH = 10            # logical conv channels
CPAD = 16           # channels padded to 16 (sublane / bf16-tile friendly)
NEG_SLOPE = 0.01    # LeakyReLU slope
BN_EPS = 1e-5
LANE = 128
LEFT = 128          # left margin (lane-tile aligned) inside the padded activation buffer


def _round_up(x, m):
    return ((x + m - 1) // m) * m


def dcnn_kernel(x_ref, pos_ref, w_ref, bnp_ref, gflat_ref, dmask_ref, r2_ref,
                bfc_ref, out_ref, pad_ref, patch_ref, *, n_batch, seg_w, l0):
    """Whole DCNN forward, fully resident in VMEM, one grid step."""
    nw = n_batch * seg_w

    # One aligned full copy initializes the padded activation buffer
    # (zero halos/margins + x already placed in channel 0 at segment coords [PAD, PAD+L0)).
    pad_ref[...] = x_ref[...]

    pos = pos_ref[...]                                   # (1, nw) within-segment coordinate

    lout = l0
    for layer in range(5):
        lout = lout + 1                                  # L + 2*pad - k + 1, pad=5 k=10

        # ---- im2col: K lane-shifted copies of the padded activations (aligned stores) ----
        for k in range(KSIZE):
            off = LEFT + k - PAD
            patch_ref[k * CPAD:(k + 1) * CPAD, :] = pad_ref[:, off:off + nw]

        # ---- whole-layer conv as ONE MXU matmul: (16,160)bf16 @ (160,N*W)bf16 -> f32 ----
        y = jnp.dot(w_ref[layer], patch_ref[...],
                    preferred_element_type=jnp.float32)  # (16, nw) f32

        prm = bnp_ref[layer]                             # (16, 3): bias / gamma / beta
        y = y + prm[:, 0:1]                              # conv bias

        # ---- BatchNorm1d, training mode: stats over exactly N*Lout valid positions ----
        valid = jnp.logical_and(pos >= float(PAD), pos < float(PAD + lout))
        inv_cnt = 1.0 / float(n_batch * lout)
        ym = jnp.where(valid, y, 0.0)
        mean = jnp.sum(ym, axis=1, keepdims=True) * inv_cnt             # (16, 1)
        var = jnp.sum(ym * ym, axis=1, keepdims=True) * inv_cnt - mean * mean
        scale = lax.rsqrt(var + BN_EPS) * prm[:, 1:2]                   # inv-std * gamma
        yn = (y - mean) * scale + prm[:, 2:3]

        # ---- LeakyReLU ----
        act = jnp.maximum(yn, NEG_SLOPE * yn)

        # ---- stage next conv's padded input: one aligned full-width store, zeros outside ----
        pad_ref[:, LEFT:LEFT + nw] = jnp.where(valid, act, 0.0).astype(pad_ref.dtype)

    # ---- MaxPool1d(2): max of adjacent positions; even-pos selection folded into gflat ----
    a0 = pad_ref[:, LEFT:LEFT + nw]
    a1 = pad_ref[:, LEFT + 1:LEFT + 1 + nw]
    pm = jnp.maximum(a0, a1)                                            # (16, nw) bf16

    gflat = gflat_ref[...]                                              # (W, 16*J) bf16
    dmask = dmask_ref[...]                                              # (16, 16*J) f32
    r2 = r2_ref[...]                                                    # (16*J, J) f32

    rows = []
    for n in range(n_batch):
        a_n = pm[:, n * seg_w:(n + 1) * seg_w]                          # (16, W), lane aligned
        t = jnp.dot(a_n, gflat, preferred_element_type=jnp.float32)     # (16, 16*J)
        u = jnp.sum(t * dmask, axis=0, keepdims=True)                   # (1, 16*J)
        rows.append(jnp.dot(u, r2, preferred_element_type=jnp.float32))  # (1, J)

    out_ref[...] = jnp.concatenate(rows, axis=0) + bfc_ref[...]         # single (N, J) store


def _full_block(a):
    nd = a.ndim
    return pl.BlockSpec(a.shape, lambda i, nd=nd: (0,) * nd)


def dcnn_forward_pallas(x, conv_w, conv_b, bn_g, bn_b, fc_w, fc_b):
    """x: (N, 1, L0) float32. Returns (N, num_classes) float32."""
    x = jnp.asarray(x, jnp.float32)
    N, _, L0 = x.shape
    L5 = L0 + 5
    P = L5 // 2
    J = int(fc_b.shape[0])
    W = _round_up(L0 + 14, LANE)          # per-sample lane-dense segment width
    NW = N * W
    PADW = LEFT + NW + LANE               # total lanes of the padded activation buffer

    # ---- initial padded-activation image: zeros + x in channel 0 at coords [PAD, PAD+L0) ----
    xseg = jnp.zeros((N, W), jnp.float32).at[:, PAD:PAD + L0].set(x[:, 0, :])
    xinit = (jnp.zeros((CPAD, PADW), jnp.float32)
             .at[0:1, LEFT:LEFT + NW].set(xseg.reshape(1, NW))
             .astype(jnp.bfloat16))

    # ---- within-segment coordinate row (drives BN / staging masks) ----
    posf = jnp.tile(jnp.arange(W, dtype=jnp.float32), (1, N))           # (1, NW)

    # ---- conv weights packed for im2col: (5, 16, K*16), channels zero-padded, bf16 ----
    wall = np.zeros((5, CPAD, KSIZE * CPAD), np.float32)
    for l in range(5):
        w = np.asarray(conv_w[l], np.float32)                           # (Cout, Cin, K)
        cout, cin, _ = w.shape
        for k in range(KSIZE):
            wall[l, :cout, k * CPAD:k * CPAD + cin] = w[:, :, k]
    wconv = jnp.asarray(wall, jnp.bfloat16)

    # ---- per-layer bias / gamma / beta packed into one (5, 16, 3) f32 slab ----
    bnp = np.zeros((5, CPAD, 3), np.float32)
    for l in range(5):
        bnp[l, :NCH, 0] = np.asarray(conv_b[l], np.float32)
        bnp[l, :NCH, 1] = np.asarray(bn_g[l], np.float32)
        bnp[l, :NCH, 2] = np.asarray(bn_b[l], np.float32)
    bnp = jnp.asarray(bnp)

    # ---- MaxPool(2) even-position selection + flatten + FC folded into (W, 16*J) ----
    fw = np.asarray(fc_w, np.float32)                                   # (J, 10*P)
    g = np.zeros((W, CPAD * J), np.float32)
    for c in range(NCH):
        for p in range(P):
            g[PAD + 2 * p, c * J:(c + 1) * J] = fw[:, c * P + p]
    gflat = jnp.asarray(g, jnp.bfloat16)

    dmask = jnp.asarray(np.repeat(np.eye(CPAD, dtype=np.float32), J, axis=1))   # (16, 16*J)
    r2 = jnp.asarray(np.tile(np.eye(J, dtype=np.float32), (CPAD, 1)))           # (16*J, J)
    bfc = jnp.asarray(fc_b, jnp.float32).reshape(1, J)

    inputs = [xinit, posf, wconv, bnp, gflat, dmask, r2, bfc]
    in_specs = [_full_block(a) for a in inputs]

    kernel = functools.partial(dcnn_kernel, n_batch=N, seg_w=W, l0=L0)
    grid_spec = pltpu.PrefetchScalarGridSpec(
        num_scalar_prefetch=0,
        grid=(1,),
        in_specs=in_specs,
        out_specs=pl.BlockSpec((N, J), lambda i: (0, 0)),
        scratch_shapes=[
            pltpu.VMEM((CPAD, PADW), jnp.bfloat16),          # padded activations (all layers)
            pltpu.VMEM((KSIZE * CPAD, NW), jnp.bfloat16),    # im2col patch matrix
        ],
    )
    return pl.pallas_call(
        kernel,
        out_shape=jax.ShapeDtypeStruct((N, J), jnp.float32),
        grid_spec=grid_spec,
        compiler_params=pltpu.CompilerParams(dimension_semantics=("arbitrary",)),
    )(*inputs)


def reference_forward_np(x, conv_w, conv_b, bn_g, bn_b, fc_w, fc_b):
    """Pure numpy (float64) reference of the PyTorch forward (training-mode BN)."""
    h = np.asarray(x, np.float64)
    for w, b, g, t in zip(conv_w, conv_b, bn_g, bn_b):
        w = np.asarray(w, np.float64)
        b = np.asarray(b, np.float64)
        g = np.asarray(g, np.float64)
        t = np.asarray(t, np.float64)
        n, cin, l = h.shape
        lout = l + 1
        hp = np.zeros((n, cin, l + 2 * PAD))
        hp[:, :, PAD:PAD + l] = h
        y = np.zeros((n, NCH, lout))
        for k in range(KSIZE):
            y += np.einsum('oc,ncl->nol', w[:, :, k], hp[:, :, k:k + lout])
        y += b[None, :, None]
        mean = y.mean(axis=(0, 2), keepdims=True)
        var = ((y - mean) ** 2).mean(axis=(0, 2), keepdims=True)
        yn = (y - mean) / np.sqrt(var + BN_EPS) * g[None, :, None] + t[None, :, None]
        h = np.where(yn > 0, yn, NEG_SLOPE * yn)
    n, c, l5 = h.shape
    p = l5 // 2
    pooled = h[:, :, :2 * p].reshape(n, c, p, 2).max(axis=-1)
    flat = pooled.reshape(n, c * p)
    return flat @ np.asarray(fc_w, np.float64).T + np.asarray(fc_b, np.float64)


if __name__ == "__main__":
    INPUT_SIZE = 40      # small stand-in for the module's input_size=500
    NUM_CLASSES = 10
    BATCH = 2

    key = jax.random.PRNGKey(0)
    ks = list(jax.random.split(key, 32))

    def u(k, shape, bound):
        return jax.random.uniform(k, shape, jnp.float32, -bound, bound)

    conv_w, conv_b, bn_g, bn_b = [], [], [], []
    cin = 1
    idx = 0
    for _ in range(5):
        bound = 1.0 / np.sqrt(cin * KSIZE)
        conv_w.append(u(ks[idx], (NCH, cin, KSIZE), bound)); idx += 1
        conv_b.append(u(ks[idx], (NCH,), bound)); idx += 1
        bn_g.append((1.0 + 0.1 * jax.random.normal(ks[idx], (NCH,))).astype(jnp.float32)); idx += 1
        bn_b.append((0.1 * jax.random.normal(ks[idx], (NCH,))).astype(jnp.float32)); idx += 1
        cin = NCH

    fc_in = NCH * ((INPUT_SIZE + 5) // 2)
    bound = 1.0 / np.sqrt(fc_in)
    fc_w = u(ks[idx], (NUM_CLASSES, fc_in), bound); idx += 1
    fc_b = u(ks[idx], (NUM_CLASSES,), bound); idx += 1
    x = jax.random.normal(ks[idx], (BATCH, 1, INPUT_SIZE), jnp.float32); idx += 1

    out = dcnn_forward_pallas(x, conv_w, conv_b, bn_g, bn_b, fc_w, fc_b)
    out = jax.block_until_ready(out)

    ref = reference_forward_np(np.asarray(x), conv_w, conv_b, bn_g, bn_b, fc_w, fc_b)
    np.testing.assert_allclose(np.asarray(out), ref, rtol=5e-2, atol=5e-2)
    print("KERNEL_OK")
</pallas_src>

<mosaic_0001>
module attributes {stable_mosaic.version = 11 : i64} {
  func.func @dcnn_kernel(%arg0: i32, %arg1: memref<16x512xbf16, #tpu.memory_space<vmem>>, %arg2: memref<1x256xf32, #tpu.memory_space<vmem>>, %arg3: memref<5x16x160xbf16, #tpu.memory_space<vmem>>, %arg4: memref<5x16x3xf32, #tpu.memory_space<vmem>>, %arg5: memref<128x160xbf16, #tpu.memory_space<vmem>>, %arg6: memref<16x160xf32, #tpu.memory_space<vmem>>, %arg7: memref<160x10xf32, #tpu.memory_space<vmem>>, %arg8: memref<1x10xf32, #tpu.memory_space<vmem>>, %arg9: memref<2x10xf32, #tpu.memory_space<vmem>>, %arg10: memref<16x512xbf16, #tpu.memory_space<vmem>>, %arg11: memref<160x256xbf16, #tpu.memory_space<vmem>>) attributes {dimension_semantics = [#tpu.dimension_semantics<arbitrary>], iteration_bounds = array<i64: 1>, scalar_prefetch = 0 : i64, scratch_operands = 2 : i64, tpu.core_type = #tpu.core_type<tc>, window_params = [{pipeline_mode = #tpu.pipeline_mode<synchronous>, transform_indices = @transform_0, window_bounds = array<i64: 16, 512>}, {pipeline_mode = #tpu.pipeline_mode<synchronous>, transform_indices = @transform_1, window_bounds = array<i64: 1, 256>}, {pipeline_mode = #tpu.pipeline_mode<synchronous>, transform_indices = @transform_2, window_bounds = array<i64: 5, 16, 160>}, {pipeline_mode = #tpu.pipeline_mode<synchronous>, transform_indices = @transform_3, window_bounds = array<i64: 5, 16, 3>}, {pipeline_mode = #tpu.pipeline_mode<synchronous>, transform_indices = @transform_4, window_bounds = array<i64: 128, 160>}, {pipeline_mode = #tpu.pipeline_mode<synchronous>, transform_indices = @transform_5, window_bounds = array<i64: 16, 160>}, {pipeline_mode = #tpu.pipeline_mode<synchronous>, transform_indices = @transform_6, window_bounds = array<i64: 160, 10>}, {pipeline_mode = #tpu.pipeline_mode<synchronous>, transform_indices = @transform_7, window_bounds = array<i64: 1, 10>}, {pipeline_mode = #tpu.pipeline_mode<synchronous>, transform_indices = @transform_8, window_bounds = array<i64: 2, 10>}]} {
    %c0 = arith.constant 0 : index
    %c0_0 = arith.constant 0 : index
    %0 = vector.load %arg1[%c0, %c0_0] : memref<16x512xbf16, #tpu.memory_space<vmem>>, vector<16x512xbf16>
    %c0_1 = arith.constant 0 : index
    %c0_2 = arith.constant 0 : index
    %1 = vector.load %arg10[%c0_1, %c0_2] : memref<16x512xbf16, #tpu.memory_space<vmem>>, vector<16x512xbf16>
    tpu.vector_store %arg10[%c0_1, %c0_2], %0 {strides = array<i32>} : memref<16x512xbf16, #tpu.memory_space<vmem>>, vector<16x512xbf16>,
    %c0_3 = arith.constant 0 : index
    %c0_4 = arith.constant 0 : index
    %2 = vector.load %arg2[%c0_3, %c0_4] : memref<1x256xf32, #tpu.memory_space<vmem>>, vector<1x256xf32>
    %c0_5 = arith.constant 0 : index
    %c123 = arith.constant 123 : index
    %3 = vector.load %arg10[%c0_5, %c123] : memref<16x512xbf16, #tpu.memory_space<vmem>>, vector<16x256xbf16>
    %c0_6 = arith.constant 0 : index
    %c0_7 = arith.constant 0 : index
    %4 = vector.load %arg11[%c0_6, %c0_7] : memref<160x256xbf16, #tpu.memory_space<vmem>>, vector<16x256xbf16>
    tpu.vector_store %arg11[%c0_6, %c0_7], %3 {strides = array<i32>} : memref<160x256xbf16, #tpu.memory_space<vmem>>, vector<16x256xbf16>,
    %c0_8 = arith.constant 0 : index
    %c124 = arith.constant 124 : index
    %5 = vector.load %arg10[%c0_8, %c124] : memref<16x512xbf16, #tpu.memory_space<vmem>>, vector<16x256xbf16>
    %c16 = arith.constant 16 : index
    %c0_9 = arith.constant 0 : index
    %6 = vector.load %arg11[%c16, %c0_9] : memref<160x256xbf16, #tpu.memory_space<vmem>>, vector<16x256xbf16>
    tpu.vector_store %arg11[%c16, %c0_9], %5 {strides = array<i32>} : memref<160x256xbf16, #tpu.memory_space<vmem>>, vector<16x256xbf16>,
    %c0_10 = arith.constant 0 : index
    %c125 = arith.constant 125 : index
    %7 = vector.load %arg10[%c0_10, %c125] : memref<16x512xbf16, #tpu.memory_space<vmem>>, vector<16x256xbf16>
    %c32 = arith.constant 32 : index
    %c0_11 = arith.constant 0 : index
    %8 = vector.load %arg11[%c32, %c0_11] : memref<160x256xbf16, #tpu.memory_space<vmem>>, vector<16x256xbf16>
    tpu.vector_store %arg11[%c32, %c0_11], %7 {strides = array<i32>} : memref<160x256xbf16, #tpu.memory_space<vmem>>, vector<16x256xbf16>,
    %c0_12 = arith.constant 0 : index
    %c126 = arith.constant 126 : index
    %9 = vector.load %arg10[%c0_12, %c126] : memref<16x512xbf16, #tpu.memory_space<vmem>>, vector<16x256xbf16>
    %c48 = arith.constant 48 : index
    %c0_13 = arith.constant 0 : index
    %10 = vector.load %arg11[%c48, %c0_13] : memref<160x256xbf16, #tpu.memory_space<vmem>>, vector<16x256xbf16>
    tpu.vector_store %arg11[%c48, %c0_13], %9 {strides = array<i32>} : memref<160x256xbf16, #tpu.memory_space<vmem>>, vector<16x256xbf16>,
    %c0_14 = arith.constant 0 : index
    %c127 = arith.constant 127 : index
    %11 = vector.load %arg10[%c0_14, %c127] : memref<16x512xbf16, #tpu.memory_space<vmem>>, vector<16x256xbf16>
    %c64 = arith.constant 64 : index
    %c0_15 = arith.constant 0 : index
    %12 = vector.load %arg11[%c64, %c0_15] : memref<160x256xbf16, #tpu.memory_space<vmem>>, vector<16x256xbf16>
    tpu.vector_store %arg11[%c64, %c0_15], %11 {strides = array<i32>} : memref<160x256xbf16, #tpu.memory_space<vmem>>, vector<16x256xbf16>,
    %c0_16 = arith.constant 0 : index
    %c128 = arith.constant 128 : index
    %13 = vector.load %arg10[%c0_16, %c128] : memref<16x512xbf16, #tpu.memory_space<vmem>>, vector<16x256xbf16>
    %c80 = arith.constant 80 : index
    %c0_17 = arith.constant 0 : index
    %14 = vector.load %arg11[%c80, %c0_17] : memref<160x256xbf16, #tpu.memory_space<vmem>>, vector<16x256xbf16>
    tpu.vector_store %arg11[%c80, %c0_17], %13 {strides = array<i32>} : memref<160x256xbf16, #tpu.memory_space<vmem>>, vector<16x256xbf16>,
    %c0_18 = arith.constant 0 : index
    %c129 = arith.constant 129 : index
    %15 = vector.load %arg10[%c0_18, %c129] : memref<16x512xbf16, #tpu.memory_space<vmem>>, vector<16x256xbf16>
    %c96 = arith.constant 96 : index
    %c0_19 = arith.constant 0 : index
    %16 = vector.load %arg11[%c96, %c0_19] : memref<160x256xbf16, #tpu.memory_space<vmem>>, vector<16x256xbf16>
    tpu.vector_store %arg11[%c96, %c0_19], %15 {strides = array<i32>} : memref<160x256xbf16, #tpu.memory_space<vmem>>, vector<16x256xbf16>,
    %c0_20 = arith.constant 0 : index
    %c130 = arith.constant 130 : index
    %17 = vector.load %arg10[%c0_20, %c130] : memref<16x512xbf16, #tpu.memory_space<vmem>>, vector<16x256xbf16>
    %c112 = arith.constant 112 : index
    %c0_21 = arith.constant 0 : index
    %18 = vector.load %arg11[%c112, %c0_21] : memref<160x256xbf16, #tpu.memory_space<vmem>>, vector<16x256xbf16>
    tpu.vector_store %arg11[%c112, %c0_21], %17 {strides = array<i32>} : memref<160x256xbf16, #tpu.memory_space<vmem>>, vector<16x256xbf16>,
    %c0_22 = arith.constant 0 : index
    %c131 = arith.constant 131 : index
    %19 = vector.load %arg10[%c0_22, %c131] : memref<16x512xbf16, #tpu.memory_space<vmem>>, vector<16x256xbf16>
    %c128_23 = arith.constant 128 : index
    %c0_24 = arith.constant 0 : index
    %20 = vector.load %arg11[%c128_23, %c0_24] : memref<160x256xbf16, #tpu.memory_space<vmem>>, vector<16x256xbf16>
    tpu.vector_store %arg11[%c128_23, %c0_24], %19 {strides = array<i32>} : memref<160x256xbf16, #tpu.memory_space<vmem>>, vector<16x256xbf16>,
    %c0_25 = arith.constant 0 : index
    %c132 = arith.constant 132 : index
    %21 = vector.load %arg10[%c0_25, %c132] : memref<16x512xbf16, #tpu.memory_space<vmem>>, vector<16x256xbf16>
    %c144 = arith.constant 144 : index
    %c0_26 = arith.constant 0 : index
    %22 = vector.load %arg11[%c144, %c0_26] : memref<160x256xbf16, #tpu.memory_space<vmem>>, vector<16x256xbf16>
    tpu.vector_store %arg11[%c144, %c0_26], %21 {strides = array<i32>} : memref<160x256xbf16, #tpu.memory_space<vmem>>, vector<16x256xbf16>,
    %c0_27 = arith.constant 0 : index
    %c0_28 = arith.constant 0 : index
    %c0_29 = arith.constant 0 : index
    %23 = vector.load %arg3[%c0_27, %c0_28, %c0_29] : memref<5x16x160xbf16, #tpu.memory_space<vmem>>, vector<1x16x160xbf16>
    %24 = vector.shape_cast %23 : vector<1x16x160xbf16> to vector<16x160xbf16>
    %c0_30 = arith.constant 0 : index
    %c0_31 = arith.constant 0 : index
    %25 = vector.load %arg11[%c0_30, %c0_31] : memref<160x256xbf16, #tpu.memory_space<vmem>>, vector<160x256xbf16>
    %cst = arith.constant dense<0.000000e+00> : vector<16x256xf32>
    %26 = tpu.matmul %24, %25, %cst {dimension_numbers = #tpu.dot_dimension_numbers<[1], [0], [0], [1], [0, 0, 1, 1], [], []>} : vector<16x160xbf16>, vector<160x256xbf16>, vector<16x256xf32> -> vector<16x256xf32>
    %c0_32 = arith.constant 0 : index
    %c0_33 = arith.constant 0 : index
    %c0_34 = arith.constant 0 : index
    %27 = vector.load %arg4[%c0_32, %c0_33, %c0_34] : memref<5x16x3xf32, #tpu.memory_space<vmem>>, vector<1x16x3xf32>
    %28 = vector.shape_cast %27 : vector<1x16x3xf32> to vector<16x3xf32>
    %29 = vector.extract_strided_slice %28 {offsets = [0, 0], sizes = [16, 1], strides = [1, 1]} : vector<16x3xf32> to vector<16x1xf32>
    %30 = vector.broadcast %29 : vector<16x1xf32> to vector<16x256xf32>
    %31 = arith.addf %26, %30 : vector<16x256xf32>
    %cst_35 = arith.constant 5.000000e+00 : f32
    %32 = vector.broadcast %cst_35 : f32 to vector<1x256xf32>
    %33 = arith.cmpf oge, %2, %32 : vector<1x256xf32>
    %cst_36 = arith.constant 4.600000e+01 : f32
    %34 = vector.broadcast %cst_36 : f32 to vector<1x256xf32>
    %35 = arith.cmpf olt, %2, %34 : vector<1x256xf32>
    %36 = arith.andi %33, %35 : vector<1x256xi1>
    %cst_37 = arith.constant 0.000000e+00 : f32
    %37 = vector.shape_cast %36 : vector<1x256xi1> to vector<1x256xi1>
    %38 = vector.broadcast %37 : vector<1x256xi1> to vector<16x256xi1>
    %39 = vector.broadcast %cst_37 : f32 to vector<16x256xf32>
    %40 = arith.select %38, %31, %39 : vector<16x256xi1>, vector<16x256xf32>
    %cst_38 = arith.constant dense<0.000000e+00> : vector<16xf32>
    %41 = vector.multi_reduction <add>, %40, %cst_38 [1] : vector<16x256xf32> to vector<16xf32>
    %42 = vector.shape_cast %41 : vector<16xf32> to vector<16x1xf32>
    %cst_39 = arith.constant 0.0121951215 : f32
    %43 = vector.broadcast %cst_39 : f32 to vector<16x1xf32>
    %44 = arith.mulf %42, %43 : vector<16x1xf32>
    %45 = arith.mulf %40, %40 : vector<16x256xf32>
    %cst_40 = arith.constant dense<0.000000e+00> : vector<16xf32>
    %46 = vector.multi_reduction <add>, %45, %cst_40 [1] : vector<16x256xf32> to vector<16xf32>
    %47 = vector.shape_cast %46 : vector<16xf32> to vector<16x1xf32>
    %cst_41 = arith.constant 0.0121951215 : f32
    %48 = vector.broadcast %cst_41 : f32 to vector<16x1xf32>
    %49 = arith.mulf %47, %48 : vector<16x1xf32>
    %50 = arith.mulf %44, %44 : vector<16x1xf32>
    %51 = arith.subf %49, %50 : vector<16x1xf32>
    %cst_42 = arith.constant 9.99999974E-6 : f32
    %52 = vector.broadcast %cst_42 : f32 to vector<16x1xf32>
    %53 = arith.addf %51, %52 : vector<16x1xf32>
    %54 = math.rsqrt %53 : vector<16x1xf32>
    %55 = vector.extract_strided_slice %28 {offsets = [0, 1], sizes = [16, 1], strides = [1, 1]} : vector<16x3xf32> to vector<16x1xf32>
    %56 = arith.mulf %54, %55 : vector<16x1xf32>
    %57 = vector.broadcast %44 : vector<16x1xf32> to vector<16x256xf32>
    %58 = arith.subf %31, %57 : vector<16x256xf32>
    %59 = vector.broadcast %56 : vector<16x1xf32> to vector<16x256xf32>
    %60 = arith.mulf %58, %59 : vector<16x256xf32>
    %61 = vector.extract_strided_slice %28 {offsets = [0, 2], sizes = [16, 1], strides = [1, 1]} : vector<16x3xf32> to vector<16x1xf32>
    %62 = vector.broadcast %61 : vector<16x1xf32> to vector<16x256xf32>
    %63 = arith.addf %60, %62 : vector<16x256xf32>
    %cst_43 = arith.constant 0.00999999977 : f32
    %64 = vector.broadcast %cst_43 : f32 to vector<16x256xf32>
    %65 = arith.mulf %64, %63 : vector<16x256xf32>
    %66 = arith.maximumf %63, %65 : vector<16x256xf32>
    %cst_44 = arith.constant 0.000000e+00 : f32
    %67 = vector.shape_cast %36 : vector<1x256xi1> to vector<1x256xi1>
    %68 = vector.broadcast %67 : vector<1x256xi1> to vector<16x256xi1>
    %69 = vector.broadcast %cst_44 : f32 to vector<16x256xf32>
    %70 = arith.select %68, %66, %69 : vector<16x256xi1>, vector<16x256xf32>
    %71 = arith.truncf %70 : vector<16x256xf32> to vector<16x256xbf16>
    %c0_45 = arith.constant 0 : index
    %c128_46 = arith.constant 128 : index
    %72 = vector.load %arg10[%c0_45, %c128_46] : memref<16x512xbf16, #tpu.memory_space<vmem>>, vector<16x256xbf16>
    tpu.vector_store %arg10[%c0_45, %c128_46], %71 {strides = array<i32>} : memref<16x512xbf16, #tpu.memory_space<vmem>>, vector<16x256xbf16>,
    %c0_47 = arith.constant 0 : index
    %c123_48 = arith.constant 123 : index
    %73 = vector.load %arg10[%c0_47, %c123_48] : memref<16x512xbf16, #tpu.memory_space<vmem>>, vector<16x256xbf16>
    %c0_49 = arith.constant 0 : index
    %c0_50 = arith.constant 0 : index
    %74 = vector.load %arg11[%c0_49, %c0_50] : memref<160x256xbf16, #tpu.memory_space<vmem>>, vector<16x256xbf16>
    tpu.vector_store %arg11[%c0_49, %c0_50], %73 {strides = array<i32>} : memref<160x256xbf16, #tpu.memory_space<vmem>>, vector<16x256xbf16>,
    %c0_51 = arith.constant 0 : index
    %c124_52 = arith.constant 124 : index
    %75 = vector.load %arg10[%c0_51, %c124_52] : memref<16x512xbf16, #tpu.memory_space<vmem>>, vector<16x256xbf16>
    %c16_53 = arith.constant 16 : index
    %c0_54 = arith.constant 0 : index
    %76 = vector.load %arg11[%c16_53, %c0_54] : memref<160x256xbf16, #tpu.memory_space<vmem>>, vector<16x256xbf16>
    tpu.vector_store %arg11[%c16_53, %c0_54], %75 {strides = array<i32>} : memref<160x256xbf16, #tpu.memory_space<vmem>>, vector<16x256xbf16>,
    %c0_55 = arith.constant 0 : index
    %c125_56 = arith.constant 125 : index
    %77 = vector.load %arg10[%c0_55, %c125_56] : memref<16x512xbf16, #tpu.memory_space<vmem>>, vector<16x256xbf16>
    %c32_57 = arith.constant 32 : index
    %c0_58 = arith.constant 0 : index
    %78 = vector.load %arg11[%c32_57, %c0_58] : memref<160x256xbf16, #tpu.memory_space<vmem>>, vector<16x256xbf16>
    tpu.vector_store %arg11[%c32_57, %c0_58], %77 {strides = array<i32>} : memref<160x256xbf16, #tpu.memory_space<vmem>>, vector<16x256xbf16>,
    %c0_59 = arith.constant 0 : index
    %c126_60 = arith.constant 126 : index
    %79 = vector.load %arg10[%c0_59, %c126_60] : memref<16x512xbf16, #tpu.memory_space<vmem>>, vector<16x256xbf16>
    %c48_61 = arith.constant 48 : index
    %c0_62 = arith.constant 0 : index
    %80 = vector.load %arg11[%c48_61, %c0_62] : memref<160x256xbf16, #tpu.memory_space<vmem>>, vector<16x256xbf16>
    tpu.vector_store %arg11[%c48_61, %c0_62], %79 {strides = array<i32>} : memref<160x256xbf16, #tpu.memory_space<vmem>>, vector<16x256xbf16>,
    %c0_63 = arith.constant 0 : index
    %c127_64 = arith.constant 127 : index
    %81 = vector.load %arg10[%c0_63, %c127_64] : memref<16x512xbf16, #tpu.memory_space<vmem>>, vector<16x256xbf16>
    %c64_65 = arith.constant 64 : index
    %c0_66 = arith.constant 0 : index
    %82 = vector.load %arg11[%c64_65, %c0_66] : memref<160x256xbf16, #tpu.memory_space<vmem>>, vector<16x256xbf16>
    tpu.vector_store %arg11[%c64_65, %c0_66], %81 {strides = array<i32>} : memref<160x256xbf16, #tpu.memory_space<vmem>>, vector<16x256xbf16>,
    %c0_67 = arith.constant 0 : index
    %c128_68 = arith.constant 128 : index
    %83 = vector.load %arg10[%c0_67, %c128_68] : memref<16x512xbf16, #tpu.memory_space<vmem>>, vector<16x256xbf16>
    %c80_69 = arith.constant 80 : index
    %c0_70 = arith.constant 0 : index
    %84 = vector.load %arg11[%c80_69, %c0_70] : memref<160x256xbf16, #tpu.memory_space<vmem>>, vector<16x256xbf16>
    tpu.vector_store %arg11[%c80_69, %c0_70], %83 {strides = array<i32>} : memref<160x256xbf16, #tpu.memory_space<vmem>>, vector<16x256xbf16>,
    %c0_71 = arith.constant 0 : index
    %c129_72 = arith.constant 129 : index
    %85 = vector.load %arg10[%c0_71, %c129_72] : memref<16x512xbf16, #tpu.memory_space<vmem>>, vector<16x256xbf16>
    %c96_73 = arith.constant 96 : index
    %c0_74 = arith.constant 0 : index
    %86 = vector.load %arg11[%c96_73, %c0_74] : memref<160x256xbf16, #tpu.memory_space<vmem>>, vector<16x256xbf16>
    tpu.vector_store %arg11[%c96_73, %c0_74], %85 {strides = array<i32>} : memref<160x256xbf16, #tpu.memory_space<vmem>>, vector<16x256xbf16>,
    %c0_75 = arith.constant 0 : index
    %c130_76 = arith.constant 130 : index
    %87 = vector.load %arg10[%c0_75, %c130_76] : memref<16x512xbf16, #tpu.memory_space<vmem>>, vector<16x256xbf16>
    %c112_77 = arith.constant 112 : index
    %c0_78 = arith.constant 0 : index
    %88 = vector.load %arg11[%c112_77, %c0_78] : memref<160x256xbf16, #tpu.memory_space<vmem>>, vector<16x256xbf16>
    tpu.vector_store %arg11[%c112_77, %c0_78], %87 {strides = array<i32>} : memref<160x256xbf16, #tpu.memory_space<vmem>>, vector<16x256xbf16>,
    %c0_79 = arith.constant 0 : index
    %c131_80 = arith.constant 131 : index
    %89 = vector.load %arg10[%c0_79, %c131_80] : memref<16x512xbf16, #tpu.memory_space<vmem>>, vector<16x256xbf16>
    %c128_81 = arith.constant 128 : index
    %c0_82 = arith.constant 0 : index
    %90 = vector.load %arg11[%c128_81, %c0_82] : memref<160x256xbf16, #tpu.memory_space<vmem>>, vector<16x256xbf16>
    tpu.vector_store %arg11[%c128_81, %c0_82], %89 {strides = array<i32>} : memref<160x256xbf16, #tpu.memory_space<vmem>>, vector<16x256xbf16>,
    %c0_83 = arith.constant 0 : index
    %c132_84 = arith.constant 132 : index
    %91 = vector.load %arg10[%c0_83, %c132_84] : memref<16x512xbf16, #tpu.memory_space<vmem>>, vector<16x256xbf16>
    %c144_85 = arith.constant 144 : index
    %c0_86 = arith.constant 0 : index
    %92 = vector.load %arg11[%c144_85, %c0_86] : memref<160x256xbf16, #tpu.memory_space<vmem>>, vector<16x256xbf16>
    tpu.vector_store %arg11[%c144_85, %c0_86], %91 {strides = array<i32>} : memref<160x256xbf16, #tpu.memory_space<vmem>>, vector<16x256xbf16>,
    %c1 = arith.constant 1 : index
    %c0_87 = arith.constant 0 : index
    %c0_88 = arith.constant 0 : index
    %93 = vector.load %arg3[%c1, %c0_87, %c0_88] : memref<5x16x160xbf16, #tpu.memory_space<vmem>>, vector<1x16x160xbf16>
    %94 = vector.shape_cast %93 : vector<1x16x160xbf16> to vector<16x160xbf16>
    %c0_89 = arith.constant 0 : index
    %c0_90 = arith.constant 0 : index
    %95 = vector.load %arg11[%c0_89, %c0_90] : memref<160x256xbf16, #tpu.memory_space<vmem>>, vector<160x256xbf16>
    %cst_91 = arith.constant dense<0.000000e+00> : vector<16x256xf32>
    %96 = tpu.matmul %94, %95, %cst_91 {dimension_numbers = #tpu.dot_dimension_numbers<[1], [0], [0], [1], [0, 0, 1, 1], [], []>} : vector<16x160xbf16>, vector<160x256xbf16>, vector<16x256xf32> -> vector<16x256xf32>
    %c1_92 = arith.constant 1 : index
    %c0_93 = arith.constant 0 : index
    %c0_94 = arith.constant 0 : index
    %97 = vector.load %arg4[%c1_92, %c0_93, %c0_94] : memref<5x16x3xf32, #tpu.memory_space<vmem>>, vector<1x16x3xf32>
    %98 = vector.shape_cast %97 : vector<1x16x3xf32> to vector<16x3xf32>
    %99 = vector.extract_strided_slice %98 {offsets = [0, 0], sizes = [16, 1], strides = [1, 1]} : vector<16x3xf32> to vector<16x1xf32>
    %100 = vector.broadcast %99 : vector<16x1xf32> to vector<16x256xf32>
    %101 = arith.addf %96, %100 : vector<16x256xf32>
    %cst_95 = arith.constant 5.000000e+00 : f32
    %102 = vector.broadcast %cst_95 : f32 to vector<1x256xf32>
    %103 = arith.cmpf oge, %2, %102 : vector<1x256xf32>
    %cst_96 = arith.constant 4.700000e+01 : f32
    %104 = vector.broadcast %cst_96 : f32 to vector<1x256xf32>
    %105 = arith.cmpf olt, %2, %104 : vector<1x256xf32>
    %106 = arith.andi %103, %105 : vector<1x256xi1>
    %cst_97 = arith.constant 0.000000e+00 : f32
    %107 = vector.shape_cast %106 : vector<1x256xi1> to vector<1x256xi1>
    %108 = vector.broadcast %107 : vector<1x256xi1> to vector<16x256xi1>
    %109 = vector.broadcast %cst_97 : f32 to vector<16x256xf32>
    %110 = arith.select %108, %101, %109 : vector<16x256xi1>, vector<16x256xf32>
    %cst_98 = arith.constant dense<0.000000e+00> : vector<16xf32>
    %111 = vector.multi_reduction <add>, %110, %cst_98 [1] : vector<16x256xf32> to vector<16xf32>
    %112 = vector.shape_cast %111 : vector<16xf32> to vector<16x1xf32>
    %cst_99 = arith.constant 0.0119047621 : f32
    %113 = vector.broadcast %cst_99 : f32 to vector<16x1xf32>
    %114 = arith.mulf %112, %113 : vector<16x1xf32>
    %115 = arith.mulf %110, %110 : vector<16x256xf32>
    %cst_100 = arith.constant dense<0.000000e+00> : vector<16xf32>
    %116 = vector.multi_reduction <add>, %115, %cst_100 [1] : vector<16x256xf32> to vector<16xf32>
    %117 = vector.shape_cast %116 : vector<16xf32> to vector<16x1xf32>
    %cst_101 = arith.constant 0.0119047621 : f32
    %118 = vector.broadcast %cst_101 : f32 to vector<16x1xf32>
    %119 = arith.mulf %117, %118 : vector<16x1xf32>
    %120 = arith.mulf %114, %114 : vector<16x1xf32>
    %121 = arith.subf %119, %120 : vector<16x1xf32>
    %cst_102 = arith.constant 9.99999974E-6 : f32
    %122 = vector.broadcast %cst_102 : f32 to vector<16x1xf32>
    %123 = arith.addf %121, %122 : vector<16x1xf32>
    %124 = math.rsqrt %123 : vector<16x1xf32>
    %125 = vector.extract_strided_slice %98 {offsets = [0, 1], sizes = [16, 1], strides = [1, 1]} : vector<16x3xf32> to vector<16x1xf32>
    %126 = arith.mulf %124, %125 : vector<16x1xf32>
    %127 = vector.broadcast %114 : vector<16x1xf32> to vector<16x256xf32>
    %128 = arith.subf %101, %127 : vector<16x256xf32>
    %129 = vector.broadcast %126 : vector<16x1xf32> to vector<16x256xf32>
    %130 = arith.mulf %128, %129 : vector<16x256xf32>
    %131 = vector.extract_strided_slice %98 {offsets = [0, 2], sizes = [16, 1], strides = [1, 1]} : vector<16x3xf32> to vector<16x1xf32>
    %132 = vector.broadcast %131 : vector<16x1xf32> to vector<16x256xf32>
    %133 = arith.addf %130, %132 : vector<16x256xf32>
    %cst_103 = arith.constant 0.00999999977 : f32
    %134 = vector.broadcast %cst_103 : f32 to vector<16x256xf32>
    %135 = arith.mulf %134, %133 : vector<16x256xf32>
    %136 = arith.maximumf %133, %135 : vector<16x256xf32>
    %cst_104 = arith.constant 0.000000e+00 : f32
    %137 = vector.shape_cast %106 : vector<1x256xi1> to vector<1x256xi1>
    %138 = vector.broadcast %137 : vector<1x256xi1> to vector<16x256xi1>
    %139 = vector.broadcast %cst_104 : f32 to vector<16x256xf32>
    %140 = arith.select %138, %136, %139 : vector<16x256xi1>, vector<16x256xf32>
    %141 = arith.truncf %140 : vector<16x256xf32> to vector<16x256xbf16>
    %c0_105 = arith.constant 0 : index
    %c128_106 = arith.constant 128 : index
    %142 = vector.load %arg10[%c0_105, %c128_106] : memref<16x512xbf16, #tpu.memory_space<vmem>>, vector<16x256xbf16>
    tpu.vector_store %arg10[%c0_105, %c128_106], %141 {strides = array<i32>} : memref<16x512xbf16, #tpu.memory_space<vmem>>, vector<16x256xbf16>,
    %c0_107 = arith.constant 0 : index
    %c123_108 = arith.constant 123 : index
    %143 = vector.load %arg10[%c0_107, %c123_108] : memref<16x512xbf16, #tpu.memory_space<vmem>>, vector<16x256xbf16>
    %c0_109 = arith.constant 0 : index
    %c0_110 = arith.constant 0 : index
    %144 = vector.load %arg11[%c0_109, %c0_110] : memref<160x256xbf16, #tpu.memory_space<vmem>>, vector<16x256xbf16>
    tpu.vector_store %arg11[%c0_109, %c0_110], %143 {strides = array<i32>} : memref<160x256xbf16, #tpu.memory_space<vmem>>, vector<16x256xbf16>,
    %c0_111 = arith.constant 0 : index
    %c124_112 = arith.constant 124 : index
    %145 = vector.load %arg10[%c0_111, %c124_112] : memref<16x512xbf16, #tpu.memory_space<vmem>>, vector<16x256xbf16>
    %c16_113 = arith.constant 16 : index
    %c0_114 = arith.constant 0 : index
    %146 = vector.load %arg11[%c16_113, %c0_114] : memref<160x256xbf16, #tpu.memory_space<vmem>>, vector<16x256xbf16>
    tpu.vector_store %arg11[%c16_113, %c0_114], %145 {strides = array<i32>} : memref<160x256xbf16, #tpu.memory_space<vmem>>, vector<16x256xbf16>,
    %c0_115 = arith.constant 0 : index
    %c125_116 = arith.constant 125 : index
    %147 = vector.load %arg10[%c0_115, %c125_116] : memref<16x512xbf16, #tpu.memory_space<vmem>>, vector<16x256xbf16>
    %c32_117 = arith.constant 32 : index
    %c0_118 = arith.constant 0 : index
    %148 = vector.load %arg11[%c32_117, %c0_118] : memref<160x256xbf16, #tpu.memory_space<vmem>>, vector<16x256xbf16>
    tpu.vector_store %arg11[%c32_117, %c0_118], %147 {strides = array<i32>} : memref<160x256xbf16, #tpu.memory_space<vmem>>, vector<16x256xbf16>,
    %c0_119 = arith.constant 0 : index
    %c126_120 = arith.constant 126 : index
    %149 = vector.load %arg10[%c0_119, %c126_120] : memref<16x512xbf16, #tpu.memory_space<vmem>>, vector<16x256xbf16>
    %c48_121 = arith.constant 48 : index
    %c0_122 = arith.constant 0 : index
    %150 = vector.load %arg11[%c48_121, %c0_122] : memref<160x256xbf16, #tpu.memory_space<vmem>>, vector<16x256xbf16>
    tpu.vector_store %arg11[%c48_121, %c0_122], %149 {strides = array<i32>} : memref<160x256xbf16, #tpu.memory_space<vmem>>, vector<16x256xbf16>,
    %c0_123 = arith.constant 0 : index
    %c127_124 = arith.constant 127 : index
    %151 = vector.load %arg10[%c0_123, %c127_124] : memref<16x512xbf16, #tpu.memory_space<vmem>>, vector<16x256xbf16>
    %c64_125 = arith.constant 64 : index
    %c0_126 = arith.constant 0 : index
    %152 = vector.load %arg11[%c64_125, %c0_126] : memref<160x256xbf16, #tpu.memory_space<vmem>>, vector<16x256xbf16>
    tpu.vector_store %arg11[%c64_125, %c0_126], %151 {strides = array<i32>} : memref<160x256xbf16, #tpu.memory_space<vmem>>, vector<16x256xbf16>,
    %c0_127 = arith.constant 0 : index
    %c128_128 = arith.constant 128 : index
    %153 = vector.load %arg10[%c0_127, %c128_128] : memref<16x512xbf16, #tpu.memory_space<vmem>>, vector<16x256xbf16>
    %c80_129 = arith.constant 80 : index
    %c0_130 = arith.constant 0 : index
    %154 = vector.load %arg11[%c80_129, %c0_130] : memref<160x256xbf16, #tpu.memory_space<vmem>>, vector<16x256xbf16>
    tpu.vector_store %arg11[%c80_129, %c0_130], %153 {strides = array<i32>} : memref<160x256xbf16, #tpu.memory_space<vmem>>, vector<16x256xbf16>,
    %c0_131 = arith.constant 0 : index
    %c129_132 = arith.constant 129 : index
    %155 = vector.load %arg10[%c0_131, %c129_132] : memref<16x512xbf16, #tpu.memory_space<vmem>>, vector<16x256xbf16>
    %c96_133 = arith.constant 96 : index
    %c0_134 = arith.constant 0 : index
    %156 = vector.load %arg11[%c96_133, %c0_134] : memref<160x256xbf16, #tpu.memory_space<vmem>>, vector<16x256xbf16>
    tpu.vector_store %arg11[%c96_133, %c0_134], %155 {strides = array<i32>} : memref<160x256xbf16, #tpu.memory_space<vmem>>, vector<16x256xbf16>,
    %c0_135 = arith.constant 0 : index
    %c130_136 = arith.constant 130 : index
    %157 = vector.load %arg10[%c0_135, %c130_136] : memref<16x512xbf16, #tpu.memory_space<vmem>>, vector<16x256xbf16>
    %c112_137 = arith.constant 112 : index
    %c0_138 = arith.constant 0 : index
    %158 = vector.load %arg11[%c112_137, %c0_138] : memref<160x256xbf16, #tpu.memory_space<vmem>>, vector<16x256xbf16>
    tpu.vector_store %arg11[%c112_137, %c0_138], %157 {strides = array<i32>} : memref<160x256xbf16, #tpu.memory_space<vmem>>, vector<16x256xbf16>,
    %c0_139 = arith.constant 0 : index
    %c131_140 = arith.constant 131 : index
    %159 = vector.load %arg10[%c0_139, %c131_140] : memref<16x512xbf16, #tpu.memory_space<vmem>>, vector<16x256xbf16>
    %c128_141 = arith.constant 128 : index
    %c0_142 = arith.constant 0 : index
    %160 = vector.load %arg11[%c128_141, %c0_142] : memref<160x256xbf16, #tpu.memory_space<vmem>>, vector<16x256xbf16>
    tpu.vector_store %arg11[%c128_141, %c0_142], %159 {strides = array<i32>} : memref<160x256xbf16, #tpu.memory_space<vmem>>, vector<16x256xbf16>,
    %c0_143 = arith.constant 0 : index
    %c132_144 = arith.constant 132 : index
    %161 = vector.load %arg10[%c0_143, %c132_144] : memref<16x512xbf16, #tpu.memory_space<vmem>>, vector<16x256xbf16>
    %c144_145 = arith.constant 144 : index
    %c0_146 = arith.constant 0 : index
    %162 = vector.load %arg11[%c144_145, %c0_146] : memref<160x256xbf16, #tpu.memory_space<vmem>>, vector<16x256xbf16>
    tpu.vector_store %arg11[%c144_145, %c0_146], %161 {strides = array<i32>} : memref<160x256xbf16, #tpu.memory_space<vmem>>, vector<16x256xbf16>,
    %c2 = arith.constant 2 : index
    %c0_147 = arith.constant 0 : index
    %c0_148 = arith.constant 0 : index
    %163 = vector.load %arg3[%c2, %c0_147, %c0_148] : memref<5x16x160xbf16, #tpu.memory_space<vmem>>, vector<1x16x160xbf16>
    %164 = vector.shape_cast %163 : vector<1x16x160xbf16> to vector<16x160xbf16>
    %c0_149 = arith.constant 0 : index
    %c0_150 = arith.constant 0 : index
    %165 = vector.load %arg11[%c0_149, %c0_150] : memref<160x256xbf16, #tpu.memory_space<vmem>>, vector<160x256xbf16>
    %cst_151 = arith.constant dense<0.000000e+00> : vector<16x256xf32>
    %166 = tpu.matmul %164, %165, %cst_151 {dimension_numbers = #tpu.dot_dimension_numbers<[1], [0], [0], [1], [0, 0, 1, 1], [], []>} : vector<16x160xbf16>, vector<160x256xbf16>, vector<16x256xf32> -> vector<16x256xf32>
    %c2_152 = arith.constant 2 : index
    %c0_153 = arith.constant 0 : index
    %c0_154 = arith.constant 0 : index
    %167 = vector.load %arg4[%c2_152, %c0_153, %c0_154] : memref<5x16x3xf32, #tpu.memory_space<vmem>>, vector<1x16x3xf32>
    %168 = vector.shape_cast %167 : vector<1x16x3xf32> to vector<16x3xf32>
    %169 = vector.extract_strided_slice %168 {offsets = [0, 0], sizes = [16, 1], strides = [1, 1]} : vector<16x3xf32> to vector<16x1xf32>
    %170 = vector.broadcast %169 : vector<16x1xf32> to vector<16x256xf32>
    %171 = arith.addf %166, %170 : vector<16x256xf32>
    %cst_155 = arith.constant 5.000000e+00 : f32
    %172 = vector.broadcast %cst_155 : f32 to vector<1x256xf32>
    %173 = arith.cmpf oge, %2, %172 : vector<1x256xf32>
    %cst_156 = arith.constant 4.800000e+01 : f32
    %174 = vector.broadcast %cst_156 : f32 to vector<1x256xf32>
    %175 = arith.cmpf olt, %2, %174 : vector<1x256xf32>
    %176 = arith.andi %173, %175 : vector<1x256xi1>
    %cst_157 = arith.constant 0.000000e+00 : f32
    %177 = vector.shape_cast %176 : vector<1x256xi1> to vector<1x256xi1>
    %178 = vector.broadcast %177 : vector<1x256xi1> to vector<16x256xi1>
    %179 = vector.broadcast %cst_157 : f32 to vector<16x256xf32>
    %180 = arith.select %178, %171, %179 : vector<16x256xi1>, vector<16x256xf32>
    %cst_158 = arith.constant dense<0.000000e+00> : vector<16xf32>
    %181 = vector.multi_reduction <add>, %180, %cst_158 [1] : vector<16x256xf32> to vector<16xf32>
    %182 = vector.shape_cast %181 : vector<16xf32> to vector<16x1xf32>
    %cst_159 = arith.constant 0.0116279069 : f32
    %183 = vector.broadcast %cst_159 : f32 to vector<16x1xf32>
    %184 = arith.mulf %182, %183 : vector<16x1xf32>
    %185 = arith.mulf %180, %180 : vector<16x256xf32>
    %cst_160 = arith.constant dense<0.000000e+00> : vector<16xf32>
    %186 = vector.multi_reduction <add>, %185, %cst_160 [1] : vector<16x256xf32> to vector<16xf32>
    %187 = vector.shape_cast %186 : vector<16xf32> to vector<16x1xf32>
    %cst_161 = arith.constant 0.0116279069 : f32
    %188 = vector.broadcast %cst_161 : f32 to vector<16x1xf32>
    %189 = arith.mulf %187, %188 : vector<16x1xf32>
    %190 = arith.mulf %184, %184 : vector<16x1xf32>
    %191 = arith.subf %189, %190 : vector<16x1xf32>
    %cst_162 = arith.constant 9.99999974E-6 : f32
    %192 = vector.broadcast %cst_162 : f32 to vector<16x1xf32>
    %193 = arith.addf %191, %192 : vector<16x1xf32>
    %194 = math.rsqrt %193 : vector<16x1xf32>
    %195 = vector.extract_strided_slice %168 {offsets = [0, 1], sizes = [16, 1], strides = [1, 1]} : vector<16x3xf32> to vector<16x1xf32>
    %196 = arith.mulf %194, %195 : vector<16x1xf32>
    %197 = vector.broadcast %184 : vector<16x1xf32> to vector<16x256xf32>
    %198 = arith.subf %171, %197 : vector<16x256xf32>
    %199 = vector.broadcast %196 : vector<16x1xf32> to vector<16x256xf32>
    %200 = arith.mulf %198, %199 : vector<16x256xf32>
    %201 = vector.extract_strided_slice %168 {offsets = [0, 2], sizes = [16, 1], strides = [1, 1]} : vector<16x3xf32> to vector<16x1xf32>
    %202 = vector.broadcast %201 : vector<16x1xf32> to vector<16x256xf32>
    %203 = arith.addf %200, %202 : vector<16x256xf32>
    %cst_163 = arith.constant 0.00999999977 : f32
    %204 = vector.broadcast %cst_163 : f32 to vector<16x256xf32>
    %205 = arith.mulf %204, %203 : vector<16x256xf32>
    %206 = arith.maximumf %203, %205 : vector<16x256xf32>
    %cst_164 = arith.constant 0.000000e+00 : f32
    %207 = vector.shape_cast %176 : vector<1x256xi1> to vector<1x256xi1>
    %208 = vector.broadcast %207 : vector<1x256xi1> to vector<16x256xi1>
    %209 = vector.broadcast %cst_164 : f32 to vector<16x256xf32>
    %210 = arith.select %208, %206, %209 : vector<16x256xi1>, vector<16x256xf32>
    %211 = arith.truncf %210 : vector<16x256xf32> to vector<16x256xbf16>
    %c0_165 = arith.constant 0 : index
    %c128_166 = arith.constant 128 : index
    %212 = vector.load %arg10[%c0_165, %c128_166] : memref<16x512xbf16, #tpu.memory_space<vmem>>, vector<16x256xbf16>
    tpu.vector_store %arg10[%c0_165, %c128_166], %211 {strides = array<i32>} : memref<16x512xbf16, #tpu.memory_space<vmem>>, vector<16x256xbf16>,
    %c0_167 = arith.constant 0 : index
    %c123_168 = arith.constant 123 : index
    %213 = vector.load %arg10[%c0_167, %c123_168] : memref<16x512xbf16, #tpu.memory_space<vmem>>, vector<16x256xbf16>
    %c0_169 = arith.constant 0 : index
    %c0_170 = arith.constant 0 : index
    %214 = vector.load %arg11[%c0_169, %c0_170] : memref<160x256xbf16, #tpu.memory_space<vmem>>, vector<16x256xbf16>
    tpu.vector_store %arg11[%c0_169, %c0_170], %213 {strides = array<i32>} : memref<160x256xbf16, #tpu.memory_space<vmem>>, vector<16x256xbf16>,
    %c0_171 = arith.constant 0 : index
    %c124_172 = arith.constant 124 : index
    %215 = vector.load %arg10[%c0_171, %c124_172] : memref<16x512xbf16, #tpu.memory_space<vmem>>, vector<16x256xbf16>
    %c16_173 = arith.constant 16 : index
    %c0_174 = arith.constant 0 : index
    %216 = vector.load %arg11[%c16_173, %c0_174] : memref<160x256xbf16, #tpu.memory_space<vmem>>, vector<16x256xbf16>
    tpu.vector_store %arg11[%c16_173, %c0_174], %215 {strides = array<i32>} : memref<160x256xbf16, #tpu.memory_space<vmem>>, vector<16x256xbf16>,
    %c0_175 = arith.constant 0 : index
    %c125_176 = arith.constant 125 : index
    %217 = vector.load %arg10[%c0_175, %c125_176] : memref<16x512xbf16, #tpu.memory_space<vmem>>, vector<16x256xbf16>
    %c32_177 = arith.constant 32 : index
    %c0_178 = arith.constant 0 : index
    %218 = vector.load %arg11[%c32_177, %c0_178] : memref<160x256xbf16, #tpu.memory_space<vmem>>, vector<16x256xbf16>
    tpu.vector_store %arg11[%c32_177, %c0_178], %217 {strides = array<i32>} : memref<160x256xbf16, #tpu.memory_space<vmem>>, vector<16x256xbf16>,
    %c0_179 = arith.constant 0 : index
    %c126_180 = arith.constant 126 : index
    %219 = vector.load %arg10[%c0_179, %c126_180] : memref<16x512xbf16, #tpu.memory_space<vmem>>, vector<16x256xbf16>
    %c48_181 = arith.constant 48 : index
    %c0_182 = arith.constant 0 : index
    %220 = vector.load %arg11[%c48_181, %c0_182] : memref<160x256xbf16, #tpu.memory_space<vmem>>, vector<16x256xbf16>
    tpu.vector_store %arg11[%c48_181, %c0_182], %219 {strides = array<i32>} : memref<160x256xbf16, #tpu.memory_space<vmem>>, vector<16x256xbf16>,
    %c0_183 = arith.constant 0 : index
    %c127_184 = arith.constant 127 : index
    %221 = vector.load %arg10[%c0_183, %c127_184] : memref<16x512xbf16, #tpu.memory_space<vmem>>, vector<16x256xbf16>
    %c64_185 = arith.constant 64 : index
    %c0_186 = arith.constant 0 : index
    %222 = vector.load %arg11[%c64_185, %c0_186] : memref<160x256xbf16, #tpu.memory_space<vmem>>, vector<16x256xbf16>
    tpu.vector_store %arg11[%c64_185, %c0_186], %221 {strides = array<i32>} : memref<160x256xbf16, #tpu.memory_space<vmem>>, vector<16x256xbf16>,
    %c0_187 = arith.constant 0 : index
    %c128_188 = arith.constant 128 : index
    %223 = vector.load %arg10[%c0_187, %c128_188] : memref<16x512xbf16, #tpu.memory_space<vmem>>, vector<16x256xbf16>
    %c80_189 = arith.constant 80 : index
    %c0_190 = arith.constant 0 : index
    %224 = vector.load %arg11[%c80_189, %c0_190] : memref<160x256xbf16, #tpu.memory_space<vmem>>, vector<16x256xbf16>
    tpu.vector_store %arg11[%c80_189, %c0_190], %223 {strides = array<i32>} : memref<160x256xbf16, #tpu.memory_space<vmem>>, vector<16x256xbf16>,
    %c0_191 = arith.constant 0 : index
    %c129_192 = arith.constant 129 : index
    %225 = vector.load %arg10[%c0_191, %c129_192] : memref<16x512xbf16, #tpu.memory_space<vmem>>, vector<16x256xbf16>
    %c96_193 = arith.constant 96 : index
    %c0_194 = arith.constant 0 : index
    %226 = vector.load %arg11[%c96_193, %c0_194] : memref<160x256xbf16, #tpu.memory_space<vmem>>, vector<16x256xbf16>
    tpu.vector_store %arg11[%c96_193, %c0_194], %225 {strides = array<i32>} : memref<160x256xbf16, #tpu.memory_space<vmem>>, vector<16x256xbf16>,
    %c0_195 = arith.constant 0 : index
    %c130_196 = arith.constant 130 : index
    %227 = vector.load %arg10[%c0_195, %c130_196] : memref<16x512xbf16, #tpu.memory_space<vmem>>, vector<16x256xbf16>
    %c112_197 = arith.constant 112 : index
    %c0_198 = arith.constant 0 : index
    %228 = vector.load %arg11[%c112_197, %c0_198] : memref<160x256xbf16, #tpu.memory_space<vmem>>, vector<16x256xbf16>
    tpu.vector_store %arg11[%c112_197, %c0_198], %227 {strides = array<i32>} : memref<160x256xbf16, #tpu.memory_space<vmem>>, vector<16x256xbf16>,
    %c0_199 = arith.constant 0 : index
    %c131_200 = arith.constant 131 : index
    %229 = vector.load %arg10[%c0_199, %c131_200] : memref<16x512xbf16, #tpu.memory_space<vmem>>, vector<16x256xbf16>
    %c128_201 = arith.constant 128 : index
    %c0_202 = arith.constant 0 : index
    %230 = vector.load %arg11[%c128_201, %c0_202] : memref<160x256xbf16, #tpu.memory_space<vmem>>, vector<16x256xbf16>
    tpu.vector_store %arg11[%c128_201, %c0_202], %229 {strides = array<i32>} : memref<160x256xbf16, #tpu.memory_space<vmem>>, vector<16x256xbf16>,
    %c0_203 = arith.constant 0 : index
    %c132_204 = arith.constant 132 : index
    %231 = vector.load %arg10[%c0_203, %c132_204] : memref<16x512xbf16, #tpu.memory_space<vmem>>, vector<16x256xbf16>
    %c144_205 = arith.constant 144 : index
    %c0_206 = arith.constant 0 : index
    %232 = vector.load %arg11[%c144_205, %c0_206] : memref<160x256xbf16, #tpu.memory_space<vmem>>, vector<16x256xbf16>
    tpu.vector_store %arg11[%c144_205, %c0_206], %231 {strides = array<i32>} : memref<160x256xbf16, #tpu.memory_space<vmem>>, vector<16x256xbf16>,
    %c3 = arith.constant 3 : index
    %c0_207 = arith.constant 0 : index
    %c0_208 = arith.constant 0 : index
    %233 = vector.load %arg3[%c3, %c0_207, %c0_208] : memref<5x16x160xbf16, #tpu.memory_space<vmem>>, vector<1x16x160xbf16>
    %234 = vector.shape_cast %233 : vector<1x16x160xbf16> to vector<16x160xbf16>
    %c0_209 = arith.constant 0 : index
    %c0_210 = arith.constant 0 : index
    %235 = vector.load %arg11[%c0_209, %c0_210] : memref<160x256xbf16, #tpu.memory_space<vmem>>, vector<160x256xbf16>
    %cst_211 = arith.constant dense<0.000000e+00> : vector<16x256xf32>
    %236 = tpu.matmul %234, %235, %cst_211 {dimension_numbers = #tpu.dot_dimension_numbers<[1], [0], [0], [1], [0, 0, 1, 1], [], []>} : vector<16x160xbf16>, vector<160x256xbf16>, vector<16x256xf32> -> vector<16x256xf32>
    %c3_212 = arith.constant 3 : index
    %c0_213 = arith.constant 0 : index
    %c0_214 = arith.constant 0 : index
    %237 = vector.load %arg4[%c3_212, %c0_213, %c0_214] : memref<5x16x3xf32, #tpu.memory_space<vmem>>, vector<1x16x3xf32>
    %238 = vector.shape_cast %237 : vector<1x16x3xf32> to vector<16x3xf32>
    %239 = vector.extract_strided_slice %238 {offsets = [0, 0], sizes = [16, 1], strides = [1, 1]} : vector<16x3xf32> to vector<16x1xf32>
    %240 = vector.broadcast %239 : vector<16x1xf32> to vector<16x256xf32>
    %241 = arith.addf %236, %240 : vector<16x256xf32>
    %cst_215 = arith.constant 5.000000e+00 : f32
    %242 = vector.broadcast %cst_215 : f32 to vector<1x256xf32>
    %243 = arith.cmpf oge, %2, %242 : vector<1x256xf32>
    %cst_216 = arith.constant 4.900000e+01 : f32
    %244 = vector.broadcast %cst_216 : f32 to vector<1x256xf32>
    %245 = arith.cmpf olt, %2, %244 : vector<1x256xf32>
    %246 = arith.andi %243, %245 : vector<1x256xi1>
    %cst_217 = arith.constant 0.000000e+00 : f32
    %247 = vector.shape_cast %246 : vector<1x256xi1> to vector<1x256xi1>
    %248 = vector.broadcast %247 : vector<1x256xi1> to vector<16x256xi1>
    %249 = vector.broadcast %cst_217 : f32 to vector<16x256xf32>
    %250 = arith.select %248, %241, %249 : vector<16x256xi1>, vector<16x256xf32>
    %cst_218 = arith.constant dense<0.000000e+00> : vector<16xf32>
    %251 = vector.multi_reduction <add>, %250, %cst_218 [1] : vector<16x256xf32> to vector<16xf32>
    %252 = vector.shape_cast %251 : vector<16xf32> to vector<16x1xf32>
    %cst_219 = arith.constant 0.0113636367 : f32
    %253 = vector.broadcast %cst_219 : f32 to vector<16x1xf32>
    %254 = arith.mulf %252, %253 : vector<16x1xf32>
    %255 = arith.mulf %250, %250 : vector<16x256xf32>
    %cst_220 = arith.constant dense<0.000000e+00> : vector<16xf32>
    %256 = vector.multi_reduction <add>, %255, %cst_220 [1] : vector<16x256xf32> to vector<16xf32>
    %257 = vector.shape_cast %256 : vector<16xf32> to vector<16x1xf32>
    %cst_221 = arith.constant 0.0113636367 : f32
    %258 = vector.broadcast %cst_221 : f32 to vector<16x1xf32>
    %259 = arith.mulf %257, %258 : vector<16x1xf32>
    %260 = arith.mulf %254, %254 : vector<16x1xf32>
    %261 = arith.subf %259, %260 : vector<16x1xf32>
    %cst_222 = arith.constant 9.99999974E-6 : f32
    %262 = vector.broadcast %cst_222 : f32 to vector<16x1xf32>
    %263 = arith.addf %261, %262 : vector<16x1xf32>
    %264 = math.rsqrt %263 : vector<16x1xf32>
    %265 = vector.extract_strided_slice %238 {offsets = [0, 1], sizes = [16, 1], strides = [1, 1]} : vector<16x3xf32> to vector<16x1xf32>
    %266 = arith.mulf %264, %265 : vector<16x1xf32>
    %267 = vector.broadcast %254 : vector<16x1xf32> to vector<16x256xf32>
    %268 = arith.subf %241, %267 : vector<16x256xf32>
    %269 = vector.broadcast %266 : vector<16x1xf32> to vector<16x256xf32>
    %270 = arith.mulf %268, %269 : vector<16x256xf32>
    %271 = vector.extract_strided_slice %238 {offsets = [0, 2], sizes = [16, 1], strides = [1, 1]} : vector<16x3xf32> to vector<16x1xf32>
    %272 = vector.broadcast %271 : vector<16x1xf32> to vector<16x256xf32>
    %273 = arith.addf %270, %272 : vector<16x256xf32>
    %cst_223 = arith.constant 0.00999999977 : f32
    %274 = vector.broadcast %cst_223 : f32 to vector<16x256xf32>
    %275 = arith.mulf %274, %273 : vector<16x256xf32>
    %276 = arith.maximumf %273, %275 : vector<16x256xf32>
    %cst_224 = arith.constant 0.000000e+00 : f32
    %277 = vector.shape_cast %246 : vector<1x256xi1> to vector<1x256xi1>
    %278 = vector.broadcast %277 : vector<1x256xi1> to vector<16x256xi1>
    %279 = vector.broadcast %cst_224 : f32 to vector<16x256xf32>
    %280 = arith.select %278, %276, %279 : vector<16x256xi1>, vector<16x256xf32>
    %281 = arith.truncf %280 : vector<16x256xf32> to vector<16x256xbf16>
    %c0_225 = arith.constant 0 : index
    %c128_226 = arith.constant 128 : index
    %282 = vector.load %arg10[%c0_225, %c128_226] : memref<16x512xbf16, #tpu.memory_space<vmem>>, vector<16x256xbf16>
    tpu.vector_store %arg10[%c0_225, %c128_226], %281 {strides = array<i32>} : memref<16x512xbf16, #tpu.memory_space<vmem>>, vector<16x256xbf16>,
    %c0_227 = arith.constant 0 : index
    %c123_228 = arith.constant 123 : index
    %283 = vector.load %arg10[%c0_227, %c123_228] : memref<16x512xbf16, #tpu.memory_space<vmem>>, vector<16x256xbf16>
    %c0_229 = arith.constant 0 : index
    %c0_230 = arith.constant 0 : index
    %284 = vector.load %arg11[%c0_229, %c0_230] : memref<160x256xbf16, #tpu.memory_space<vmem>>, vector<16x256xbf16>
    tpu.vector_store %arg11[%c0_229, %c0_230], %283 {strides = array<i32>} : memref<160x256xbf16, #tpu.memory_space<vmem>>, vector<16x256xbf16>,
    %c0_231 = arith.constant 0 : index
    %c124_232 = arith.constant 124 : index
    %285 = vector.load %arg10[%c0_231, %c124_232] : memref<16x512xbf16, #tpu.memory_space<vmem>>, vector<16x256xbf16>
    %c16_233 = arith.constant 16 : index
    %c0_234 = arith.constant 0 : index
    %286 = vector.load %arg11[%c16_233, %c0_234] : memref<160x256xbf16, #tpu.memory_space<vmem>>, vector<16x256xbf16>
    tpu.vector_store %arg11[%c16_233, %c0_234], %285 {strides = array<i32>} : memref<160x256xbf16, #tpu.memory_space<vmem>>, vector<16x256xbf16>,
    %c0_235 = arith.constant 0 : index
    %c125_236 = arith.constant 125 : index
    %287 = vector.load %arg10[%c0_235, %c125_236] : memref<16x512xbf16, #tpu.memory_space<vmem>>, vector<16x256xbf16>
    %c32_237 = arith.constant 32 : index
    %c0_238 = arith.constant 0 : index
    %288 = vector.load %arg11[%c32_237, %c0_238] : memref<160x256xbf16, #tpu.memory_space<vmem>>, vector<16x256xbf16>
    tpu.vector_store %arg11[%c32_237, %c0_238], %287 {strides = array<i32>} : memref<160x256xbf16, #tpu.memory_space<vmem>>, vector<16x256xbf16>,
    %c0_239 = arith.constant 0 : index
    %c126_240 = arith.constant 126 : index
    %289 = vector.load %arg10[%c0_239, %c126_240] : memref<16x512xbf16, #tpu.memory_space<vmem>>, vector<16x256xbf16>
    %c48_241 = arith.constant 48 : index
    %c0_242 = arith.constant 0 : index
    %290 = vector.load %arg11[%c48_241, %c0_242] : memref<160x256xbf16, #tpu.memory_space<vmem>>, vector<16x256xbf16>
    tpu.vector_store %arg11[%c48_241, %c0_242], %289 {strides = array<i32>} : memref<160x256xbf16, #tpu.memory_space<vmem>>, vector<16x256xbf16>,
    %c0_243 = arith.constant 0 : index
    %c127_244 = arith.constant 127 : index
    %291 = vector.load %arg10[%c0_243, %c127_244] : memref<16x512xbf16, #tpu.memory_space<vmem>>, vector<16x256xbf16>
    %c64_245 = arith.constant 64 : index
    %c0_246 = arith.constant 0 : index
    %292 = vector.load %arg11[%c64_245, %c0_246] : memref<160x256xbf16, #tpu.memory_space<vmem>>, vector<16x256xbf16>
    tpu.vector_store %arg11[%c64_245, %c0_246], %291 {strides = array<i32>} : memref<160x256xbf16, #tpu.memory_space<vmem>>, vector<16x256xbf16>,
    %c0_247 = arith.constant 0 : index
    %c128_248 = arith.constant 128 : index
    %293 = vector.load %arg10[%c0_247, %c128_248] : memref<16x512xbf16, #tpu.memory_space<vmem>>, vector<16x256xbf16>
    %c80_249 = arith.constant 80 : index
    %c0_250 = arith.constant 0 : index
    %294 = vector.load %arg11[%c80_249, %c0_250] : memref<160x256xbf16, #tpu.memory_space<vmem>>, vector<16x256xbf16>
    tpu.vector_store %arg11[%c80_249, %c0_250], %293 {strides = array<i32>} : memref<160x256xbf16, #tpu.memory_space<vmem>>, vector<16x256xbf16>,
    %c0_251 = arith.constant 0 : index
    %c129_252 = arith.constant 129 : index
    %295 = vector.load %arg10[%c0_251, %c129_252] : memref<16x512xbf16, #tpu.memory_space<vmem>>, vector<16x256xbf16>
    %c96_253 = arith.constant 96 : index
    %c0_254 = arith.constant 0 : index
    %296 = vector.load %arg11[%c96_253, %c0_254] : memref<160x256xbf16, #tpu.memory_space<vmem>>, vector<16x256xbf16>
    tpu.vector_store %arg11[%c96_253, %c0_254], %295 {strides = array<i32>} : memref<160x256xbf16, #tpu.memory_space<vmem>>, vector<16x256xbf16>,
    %c0_255 = arith.constant 0 : index
    %c130_256 = arith.constant 130 : index
    %297 = vector.load %arg10[%c0_255, %c130_256] : memref<16x512xbf16, #tpu.memory_space<vmem>>, vector<16x256xbf16>
    %c112_257 = arith.constant 112 : index
    %c0_258 = arith.constant 0 : index
    %298 = vector.load %arg11[%c112_257, %c0_258] : memref<160x256xbf16, #tpu.memory_space<vmem>>, vector<16x256xbf16>
    tpu.vector_store %arg11[%c112_257, %c0_258], %297 {strides = array<i32>} : memref<160x256xbf16, #tpu.memory_space<vmem>>, vector<16x256xbf16>,
    %c0_259 = arith.constant 0 : index
    %c131_260 = arith.constant 131 : index
    %299 = vector.load %arg10[%c0_259, %c131_260] : memref<16x512xbf16, #tpu.memory_space<vmem>>, vector<16x256xbf16>
    %c128_261 = arith.constant 128 : index
    %c0_262 = arith.constant 0 : index
    %300 = vector.load %arg11[%c128_261, %c0_262] : memref<160x256xbf16, #tpu.memory_space<vmem>>, vector<16x256xbf16>
    tpu.vector_store %arg11[%c128_261, %c0_262], %299 {strides = array<i32>} : memref<160x256xbf16, #tpu.memory_space<vmem>>, vector<16x256xbf16>,
    %c0_263 = arith.constant 0 : index
    %c132_264 = arith.constant 132 : index
    %301 = vector.load %arg10[%c0_263, %c132_264] : memref<16x512xbf16, #tpu.memory_space<vmem>>, vector<16x256xbf16>
    %c144_265 = arith.constant 144 : index
    %c0_266 = arith.constant 0 : index
    %302 = vector.load %arg11[%c144_265, %c0_266] : memref<160x256xbf16, #tpu.memory_space<vmem>>, vector<16x256xbf16>
    tpu.vector_store %arg11[%c144_265, %c0_266], %301 {strides = array<i32>} : memref<160x256xbf16, #tpu.memory_space<vmem>>, vector<16x256xbf16>,
    %c4 = arith.constant 4 : index
    %c0_267 = arith.constant 0 : index
    %c0_268 = arith.constant 0 : index
    %303 = vector.load %arg3[%c4, %c0_267, %c0_268] : memref<5x16x160xbf16, #tpu.memory_space<vmem>>, vector<1x16x160xbf16>
    %304 = vector.shape_cast %303 : vector<1x16x160xbf16> to vector<16x160xbf16>
    %c0_269 = arith.constant 0 : index
    %c0_270 = arith.constant 0 : index
    %305 = vector.load %arg11[%c0_269, %c0_270] : memref<160x256xbf16, #tpu.memory_space<vmem>>, vector<160x256xbf16>
    %cst_271 = arith.constant dense<0.000000e+00> : vector<16x256xf32>
    %306 = tpu.matmul %304, %305, %cst_271 {dimension_numbers = #tpu.dot_dimension_numbers<[1], [0], [0], [1], [0, 0, 1, 1], [], []>} : vector<16x160xbf16>, vector<160x256xbf16>, vector<16x256xf32> -> vector<16x256xf32>
    %c4_272 = arith.constant 4 : index
    %c0_273 = arith.constant 0 : index
    %c0_274 = arith.constant 0 : index
    %307 = vector.load %arg4[%c4_272, %c0_273, %c0_274] : memref<5x16x3xf32, #tpu.memory_space<vmem>>, vector<1x16x3xf32>
    %308 = vector.shape_cast %307 : vector<1x16x3xf32> to vector<16x3xf32>
    %309 = vector.extract_strided_slice %308 {offsets = [0, 0], sizes = [16, 1], strides = [1, 1]} : vector<16x3xf32> to vector<16x1xf32>
    %310 = vector.broadcast %309 : vector<16x1xf32> to vector<16x256xf32>
    %311 = arith.addf %306, %310 : vector<16x256xf32>
    %cst_275 = arith.constant 5.000000e+00 : f32
    %312 = vector.broadcast %cst_275 : f32 to vector<1x256xf32>
    %313 = arith.cmpf oge, %2, %312 : vector<1x256xf32>
    %cst_276 = arith.constant 5.000000e+01 : f32
    %314 = vector.broadcast %cst_276 : f32 to vector<1x256xf32>
    %315 = arith.cmpf olt, %2, %314 : vector<1x256xf32>
    %316 = arith.andi %313, %315 : vector<1x256xi1>
    %cst_277 = arith.constant 0.000000e+00 : f32
    %317 = vector.shape_cast %316 : vector<1x256xi1> to vector<1x256xi1>
    %318 = vector.broadcast %317 : vector<1x256xi1> to vector<16x256xi1>
    %319 = vector.broadcast %cst_277 : f32 to vector<16x256xf32>
    %320 = arith.select %318, %311, %319 : vector<16x256xi1>, vector<16x256xf32>
    %cst_278 = arith.constant dense<0.000000e+00> : vector<16xf32>
    %321 = vector.multi_reduction <add>, %320, %cst_278 [1] : vector<16x256xf32> to vector<16xf32>
    %322 = vector.shape_cast %321 : vector<16xf32> to vector<16x1xf32>
    %cst_279 = arith.constant 0.0111111114 : f32
    %323 = vector.broadcast %cst_279 : f32 to vector<16x1xf32>
    %324 = arith.mulf %322, %323 : vector<16x1xf32>
    %325 = arith.mulf %320, %320 : vector<16x256xf32>
    %cst_280 = arith.constant dense<0.000000e+00> : vector<16xf32>
    %326 = vector.multi_reduction <add>, %325, %cst_280 [1] : vector<16x256xf32> to vector<16xf32>
    %327 = vector.shape_cast %326 : vector<16xf32> to vector<16x1xf32>
    %cst_281 = arith.constant 0.0111111114 : f32
    %328 = vector.broadcast %cst_281 : f32 to vector<16x1xf32>
    %329 = arith.mulf %327, %328 : vector<16x1xf32>
    %330 = arith.mulf %324, %324 : vector<16x1xf32>
    %331 = arith.subf %329, %330 : vector<16x1xf32>
    %cst_282 = arith.constant 9.99999974E-6 : f32
    %332 = vector.broadcast %cst_282 : f32 to vector<16x1xf32>
    %333 = arith.addf %331, %332 : vector<16x1xf32>
    %334 = math.rsqrt %333 : vector<16x1xf32>
    %335 = vector.extract_strided_slice %308 {offsets = [0, 1], sizes = [16, 1], strides = [1, 1]} : vector<16x3xf32> to vector<16x1xf32>
    %336 = arith.mulf %334, %335 : vector<16x1xf32>
    %337 = vector.broadcast %324 : vector<16x1xf32> to vector<16x256xf32>
    %338 = arith.subf %311, %337 : vector<16x256xf32>
    %339 = vector.broadcast %336 : vector<16x1xf32> to vector<16x256xf32>
    %340 = arith.mulf %338, %339 : vector<16x256xf32>
    %341 = vector.extract_strided_slice %308 {offsets = [0, 2], sizes = [16, 1], strides = [1, 1]} : vector<16x3xf32> to vector<16x1xf32>
    %342 = vector.broadcast %341 : vector<16x1xf32> to vector<16x256xf32>
    %343 = arith.addf %340, %342 : vector<16x256xf32>
    %cst_283 = arith.constant 0.00999999977 : f32
    %344 = vector.broadcast %cst_283 : f32 to vector<16x256xf32>
    %345 = arith.mulf %344, %343 : vector<16x256xf32>
    %346 = arith.maximumf %343, %345 : vector<16x256xf32>
    %cst_284 = arith.constant 0.000000e+00 : f32
    %347 = vector.shape_cast %316 : vector<1x256xi1> to vector<1x256xi1>
    %348 = vector.broadcast %347 : vector<1x256xi1> to vector<16x256xi1>
    %349 = vector.broadcast %cst_284 : f32 to vector<16x256xf32>
    %350 = arith.select %348, %346, %349 : vector<16x256xi1>, vector<16x256xf32>
    %351 = arith.truncf %350 : vector<16x256xf32> to vector<16x256xbf16>
    %c0_285 = arith.constant 0 : index
    %c128_286 = arith.constant 128 : index
    %352 = vector.load %arg10[%c0_285, %c128_286] : memref<16x512xbf16, #tpu.memory_space<vmem>>, vector<16x256xbf16>
    tpu.vector_store %arg10[%c0_285, %c128_286], %351 {strides = array<i32>} : memref<16x512xbf16, #tpu.memory_space<vmem>>, vector<16x256xbf16>,
    %c0_287 = arith.constant 0 : index
    %c128_288 = arith.constant 128 : index
    %353 = vector.load %arg10[%c0_287, %c128_288] : memref<16x512xbf16, #tpu.memory_space<vmem>>, vector<16x256xbf16>
    %c0_289 = arith.constant 0 : index
    %c129_290 = arith.constant 129 : index
    %354 = vector.load %arg10[%c0_289, %c129_290] : memref<16x512xbf16, #tpu.memory_space<vmem>>, vector<16x256xbf16>
    %355 = arith.maximumf %353, %354 : vector<16x256xbf16>
    %c0_291 = arith.constant 0 : index
    %c0_292 = arith.constant 0 : index
    %356 = vector.load %arg5[%c0_291, %c0_292] : memref<128x160xbf16, #tpu.memory_space<vmem>>, vector<128x160xbf16>
    %c0_293 = arith.constant 0 : index
    %c0_294 = arith.constant 0 : index
    %357 = vector.load %arg6[%c0_293, %c0_294] : memref<16x160xf32, #tpu.memory_space<vmem>>, vector<16x160xf32>
    %c0_295 = arith.constant 0 : index
    %c0_296 = arith.constant 0 : index
    %358 = vector.load %arg7[%c0_295, %c0_296] : memref<160x10xf32, #tpu.memory_space<vmem>>, vector<160x10xf32>
    %359 = vector.extract_strided_slice %355 {offsets = [0, 0], sizes = [16, 128], strides = [1, 1]} : vector<16x256xbf16> to vector<16x128xbf16>
    %cst_297 = arith.constant dense<0.000000e+00> : vector<16x160xf32>
    %360 = tpu.matmul %359, %356, %cst_297 {dimension_numbers = #tpu.dot_dimension_numbers<[1], [0], [0], [1], [0, 0, 1, 1], [], []>} : vector<16x128xbf16>, vector<128x160xbf16>, vector<16x160xf32> -> vector<16x160xf32>
    %361 = arith.mulf %360, %357 : vector<16x160xf32>
    %cst_298 = arith.constant dense<0.000000e+00> : vector<160xf32>
    %362 = vector.multi_reduction <add>, %361, %cst_298 [0] : vector<16x160xf32> to vector<160xf32>
    %363 = vector.shape_cast %362 : vector<160xf32> to vector<1x160xf32>
    %cst_299 = arith.constant dense<0.000000e+00> : vector<1x10xf32>
    %364 = tpu.matmul %363, %358, %cst_299 {dimension_numbers = #tpu.dot_dimension_numbers<[1], [0], [0], [1], [0, 0, 1, 1], [], []>} : vector<1x160xf32>, vector<160x10xf32>, vector<1x10xf32> -> vector<1x10xf32>
    %365 = vector.extract_strided_slice %355 {offsets = [0, 128], sizes = [16, 128], strides = [1, 1]} : vector<16x256xbf16> to vector<16x128xbf16>
    %cst_300 = arith.constant dense<0.000000e+00> : vector<16x160xf32>
    %366 = tpu.matmul %365, %356, %cst_300 {dimension_numbers = #tpu.dot_dimension_numbers<[1], [0], [0], [1], [0, 0, 1, 1], [], []>} : vector<16x128xbf16>, vector<128x160xbf16>, vector<16x160xf32> -> vector<16x160xf32>
    %367 = arith.mulf %366, %357 : vector<16x160xf32>
    %cst_301 = arith.constant dense<0.000000e+00> : vector<160xf32>
    %368 = vector.multi_reduction <add>, %367, %cst_301 [0] : vector<16x160xf32> to vector<160xf32>
    %369 = vector.shape_cast %368 : vector<160xf32> to vector<1x160xf32>
    %cst_302 = arith.constant dense<0.000000e+00> : vector<1x10xf32>
    %370 = tpu.matmul %369, %358, %cst_302 {dimension_numbers = #tpu.dot_dimension_numbers<[1], [0], [0], [1], [0, 0, 1, 1], [], []>} : vector<1x160xf32>, vector<160x10xf32>, vector<1x10xf32> -> vector<1x10xf32>
    %371 = tpu.concatenate %364, %370 in 0 : vector<1x10xf32>, vector<1x10xf32> -> vector<2x10xf32>
    %c0_303 = arith.constant 0 : index
    %c0_304 = arith.constant 0 : index
    %372 = vector.load %arg8[%c0_303, %c0_304] : memref<1x10xf32, #tpu.memory_space<vmem>>, vector<1x10xf32>
    %373 = vector.broadcast %372 : vector<1x10xf32> to vector<2x10xf32>
    %374 = arith.addf %371, %373 : vector<2x10xf32>
    %c0_305 = arith.constant 0 : index
    %c0_306 = arith.constant 0 : index
    %375 = vector.load %arg9[%c0_305, %c0_306] : memref<2x10xf32, #tpu.memory_space<vmem>>, vector<2x10xf32>
    tpu.vector_store %arg9[%c0_305, %c0_306], %374 {strides = array<i32>} : memref<2x10xf32, #tpu.memory_space<vmem>>, vector<2x10xf32>,
    return
  }
  func.func @transform_0(%arg0: i32) -> (i32, i32) {
    %c0_i32 = arith.constant 0 : i32
    %c0_i32_0 = arith.constant 0 : i32
    %c0_i32_1 = arith.constant 0 : i32
    return %c0_i32, %c0_i32_0 : i32, i32
  }
  func.func @transform_1(%arg0: i32) -> (i32, i32) {
    %c0_i32 = arith.constant 0 : i32
    %c0_i32_0 = arith.constant 0 : i32
    %c0_i32_1 = arith.constant 0 : i32
    return %c0_i32, %c0_i32_0 : i32, i32
  }
  func.func @transform_2(%arg0: i32) -> (i32, i32, i32) {
    %c0_i32 = arith.constant 0 : i32
    %c0_i32_0 = arith.constant 0 : i32
    %c0_i32_1 = arith.constant 0 : i32
    %c0_i32_2 = arith.constant 0 : i32
    return %c0_i32, %c0_i32_0, %c0_i32_1 : i32, i32, i32
  }
  func.func @transform_3(%arg0: i32) -> (i32, i32, i32) {
    %c0_i32 = arith.constant 0 : i32
    %c0_i32_0 = arith.constant 0 : i32
    %c0_i32_1 = arith.constant 0 : i32
    %c0_i32_2 = arith.constant 0 : i32
    return %c0_i32, %c0_i32_0, %c0_i32_1 : i32, i32, i32
  }
  func.func @transform_4(%arg0: i32) -> (i32, i32) {
    %c0_i32 = arith.constant 0 : i32
    %c0_i32_0 = arith.constant 0 : i32
    %c0_i32_1 = arith.constant 0 : i32
    return %c0_i32, %c0_i32_0 : i32, i32
  }
  func.func @transform_5(%arg0: i32) -> (i32, i32) {
    %c0_i32 = arith.constant 0 : i32
    %c0_i32_0 = arith.constant 0 : i32
    %c0_i32_1 = arith.constant 0 : i32
    return %c0_i32, %c0_i32_0 : i32, i32
  }
  func.func @transform_6(%arg0: i32) -> (i32, i32) {
    %c0_i32 = arith.constant 0 : i32
    %c0_i32_0 = arith.constant 0 : i32
    %c0_i32_1 = arith.constant 0 : i32
    return %c0_i32, %c0_i32_0 : i32, i32
  }
  func.func @transform_7(%arg0: i32) -> (i32, i32) {
    %c0_i32 = arith.constant 0 : i32
    %c0_i32_0 = arith.constant 0 : i32
    %c0_i32_1 = arith.constant 0 : i32
    return %c0_i32, %c0_i32_0 : i32, i32
  }
  func.func @transform_8(%arg0: i32) -> (i32, i32) {
    %c0_i32 = arith.constant 0 : i32
    %c0_i32_0 = arith.constant 0 : i32
    %c0_i32_1 = arith.constant 0 : i32
    return %c0_i32, %c0_i32_0 : i32, i32
  }
}

</mosaic_0001>

<bundles_post_ra>
// kernel: tpu_custom_call.1
= control target key start
LH: loop header
LB: loop body
LE: loop exit
PB: predicated region body
PF: predicated region fallthrough
CT: control target
= control target key end

     0   :  { %s3591_s13 = smov 126   ;;  %s4918_s0 = inlined_call_operand.vmem [shape: bf16[16,512], index: 0, kind: input, shape index: {}]   ;;  %s4919_s1 = inlined_call_operand.vmem [shape: f32[1,256], index: 1, kind: input, shape index: {}]   ;;  %s4920_s2 = inlined_call_operand.vmem [shape: bf16[5,16,160], index: 2, kind: input, shape index: {}]   ;;  %s4921_s3 = inlined_call_operand.vmem [shape: f32[5,16,3], index: 3, kind: input, shape index: {}]   ;;  %s4922_s4 = inlined_call_operand.vmem [shape: bf16[128,160], index: 4, kind: input, shape index: {}]   ;;  %s4923_s5 = inlined_call_operand.vmem [shape: f32[16,160], index: 5, kind: input, shape index: {}]   ;;  %s4924_s6 = inlined_call_operand.vmem [shape: f32[160,10], index: 6, kind: input, shape index: {}]   ;;  %s4925_s7 = inlined_call_operand.vmem [shape: f32[1,10], index: 7, kind: input, shape index: {}]   ;;  %s4926_s8 = inlined_call_operand.hbm [shape: f32[2,10], index: 8, kind: output, shape index: {}]  }
   0x1   :  { %v33_v0 = vld [vmem:[%s4918_s0 + $0x10] sm:$0xff]  ;;  %v34_v1 = vld [vmem:[%s4918_s0 + $0x18] sm:$0xff]  ;;  %v31_v2 = vld [vmem:[%s4918_s0] sm:$0xff] }
   0x2   :  { %37 = vst [vmem:[#allocation2 + $0x10] sm:$0xff] %v33_v0  ;;  %38 = vst [vmem:[#allocation2 + $0x18] sm:$0xff] %v34_v1  ;;  %v32_v3 = vld [vmem:[%s4918_s0 + $0x8] sm:$0xff] }
   0x3   :  { %35 = vst [vmem:[#allocation2] sm:$0xff] %v31_v2  ;;  %36 = vst [vmem:[#allocation2 + $0x8] sm:$0xff] %v32_v3 }
   0x9   :  { %v3662_v4 = vld [vmem:[#allocation2 + $0x14] sm:$0xff]  ;;  %v222_v6 = vld [vmem:[#allocation2 + $0x1c] sm:$0xf] }
   0xa   :  { %231 = vrot.lane.b32.xlu1 %v3662_v4, %s3591_s13  ;;  %v3666_v5 = vld [vmem:[#allocation2 + $0x4] sm:$0xff]  ;;  %v220_v7 = vld [vmem:[#allocation2 + $0xc] sm:$0xf] }
   0xb   :  { %227 = vrot.lane.b32.xlu0 %v3666_v5, %s3591_s13  ;;  %v191_v8 = vld [vmem:[#allocation2 + $0xc] sm:$0xf] }
   0xe   :  { %233 = vrot.lane.b32.xlu1 %v222_v6, %s3591_s13 }
   0xf   :  { %229 = vrot.lane.b32.xlu0 %v220_v7, %s3591_s13 }
  0x10   :  { %13 = vsyncpa [#allocation5], 0  ;;  %s3592_s0 = smov 127   ;;  %v193_v9 = vld [vmem:[#allocation2 + $0x1c] sm:$0xf]  ;;  %s3593_s14 = smov 1   ;;  %v3274_v56 = vcombine.high %v3666_v5, %v3662_v4 }
  0x11   :  { %v158_v10 = vld [vmem:[#allocation2 + $0x8] sm:$0xf]  ;;  %v160_v11 = vld [vmem:[#allocation2 + $0x18] sm:$0xf]  ;;  %s3594_s15 = smov 2   ;;  %s3595_s16 = smov 3  }
  0x12   :  { %200 = vrot.lane.b32.xlu1 %v191_v8, %s3592_s0  ;;  %v129_v12 = vld [vmem:[#allocation2 + $0x8] sm:$0xf]  ;;  %v131_v13 = vld [vmem:[#allocation2 + $0x18] sm:$0xf]  ;;  %s3596_s17 = smov 4   ;;  %s3597_s18 = smov 5  }
  0x13   :  { %198 = vrot.lane.b32.xlu0 %v3666_v5, %s3592_s0  ;;  %v100_v14 = vld [vmem:[#allocation2 + $0x8] sm:$0xf]  ;;  %v102_v15 = vld [vmem:[#allocation2 + $0x18] sm:$0xf]  ;;  %v278_v20 = vld [vmem:[#allocation2 + $0xc] sm:$0xf] }
  0x14   :  { %v71_v16 = vld [vmem:[#allocation2 + $0x8] sm:$0xf]  ;;  %v73_v17 = vld [vmem:[#allocation2 + $0x18] sm:$0xf]  ;;  %s3598_s19 = smov 124   ;;  %vm449_vm0 = vcmask 261120  }
  0x15   :  { %v41_v18 = vld [vmem:[#allocation2 + $0x8] sm:$0xf]  ;;  %v43_v19 = vld [vmem:[#allocation2 + $0x18] sm:$0xf]  ;;  %v280_v21 = vld [vmem:[#allocation2 + $0x1c] sm:$0xf] }
  0x16   :  { %204 = vrot.lane.b32.xlu1 %v193_v9, %s3592_s0  ;;  %v249_v22 = vld [vmem:[#allocation2 + $0xc] sm:$0xf]  ;;  %s3599_s22 = smov 125   ;;  %v251_v24 = vld [vmem:[#allocation2 + $0x1c] sm:$0xf]  ;;  %v3600_v25 = vmov 0  }
  0x17   :  { %202 = vrot.lane.b32.xlu0 %v3662_v4, %s3592_s0  ;;  %v3478_v23 = vld [vmem:[%s4920_s2 + $0x4] ss:$8 sps:$4 sm:$0xff]   ;;  %3448 = vset.pattern.permute.xlu1 %v3600_v25  ;;  %vm60_vm1 = vcmask 1043456   ;;  %vm240_vm2 = vcmask 1031168   ;;  %vm211_vm3 = vcmask 1039360   ;;  %vm178_vm4 = vcmask 7168  }
  0x18   :  { %3283 = vmatprep.mubr.msk.bf16.mxu0 %vm449_vm0, %v3478_v23  ;;  %3447 = vset.pattern.permute.xlu0 %v3600_v25  ;;  %v3719_v26 = vld [vmem:[%s4921_s3 + $0x8] sm:$0xff]  ;;  %v3724_v27 = vld [vmem:[%s4921_s3] sm:$0xff]  ;;  %vm149_vm5 = vcmask 15360   ;;  %vm120_vm6 = vcmask 23552   ;;  %vm91_vm7 = vcmask 31744   ;;  %vm62_vm8 = vcmask 39936  }
  0x19   :  { %vm298_vm9 = vcmask 1014784   ;;  %vm269_vm10 = vcmask 1022976  }
  0x1a   :  { %167 = vrot.lane.b32.xlu1 %v158_v10, %s3593_s14 }
  0x1b   :  { %165 = vrot.lane.b32.xlu0 %v31_v2, %s3593_s14 }
  0x1e   :  { %171 = vrot.lane.b32.xlu1 %v160_v11, %s3593_s14 }
  0x1f   :  { %169 = vrot.lane.b32.xlu0 %v33_v0, %s3593_s14 }
  0x22   :  { %138 = vrot.lane.b32.xlu1 %v129_v12, %s3594_s15 }
  0x23   :  { %136 = vrot.lane.b32.xlu0 %v31_v2, %s3594_s15 }
  0x26   :  { %142 = vrot.lane.b32.xlu1 %v131_v13, %s3594_s15 }
  0x27   :  { %140 = vrot.lane.b32.xlu0 %v33_v0, %s3594_s15 }
  0x2a   :  { %109 = vrot.lane.b32.xlu1 %v100_v14, %s3595_s16 }
  0x2b   :  { %107 = vrot.lane.b32.xlu0 %v31_v2, %s3595_s16 }
  0x2e   :  { %113 = vrot.lane.b32.xlu1 %v102_v15, %s3595_s16 }
  0x2f   :  { %111 = vrot.lane.b32.xlu0 %v33_v0, %s3595_s16 }
  0x32   :  { %80 = vrot.lane.b32.xlu1 %v71_v16, %s3596_s17 }
  0x33   :  { %78 = vrot.lane.b32.xlu0 %v31_v2, %s3596_s17 }
  0x36   :  { %84 = vrot.lane.b32.xlu1 %v73_v17, %s3596_s17 }
  0x37   :  { %82 = vrot.lane.b32.xlu0 %v33_v0, %s3596_s17 }
  0x3a   :  { %50 = vrot.lane.b32.xlu1 %v41_v18, %s3597_s18 }
  0x3b   :  { %48 = vrot.lane.b32.xlu0 %v31_v2, %s3597_s18 }
  0x3e   :  { %54 = vrot.lane.b32.xlu1 %v43_v19, %s3597_s18 }
  0x3f   :  { %52 = vrot.lane.b32.xlu0 %v33_v0, %s3597_s18  ;;  %v3273_v0 = vcombine.low %v3666_v5, %v3662_v4 }
  0x42   :  { %287 = vrot.lane.b32.xlu1 %v278_v20, %s3598_s19 }
  0x43   :  { %285 = vrot.lane.b32.xlu0 %v3666_v5, %s3598_s19 }
  0x46   :  { %291 = vrot.lane.b32.xlu1 %v280_v21, %s3598_s19 }
  0x47   :  { %289 = vrot.lane.b32.xlu0 %v3662_v4, %s3598_s19 }
  0x4a   :  { %258 = vrot.lane.b32.xlu1 %v249_v22, %s3599_s22 }
  0x4b   :  { %256 = vrot.lane.b32.xlu0 %v3666_v5, %s3599_s22 }
  0x4e   :  { %262 = vrot.lane.b32.xlu1 %v251_v24, %s3599_s22 }
  0x4f   :  { %260 = vrot.lane.b32.xlu0 %v3662_v4, %s3599_s22 }
  0x52   :  { %337 = vperm.xlu1 %3448, %v3719_v26  }
  0x53   :  { %332 = vperm.xlu0 %3447, %v3724_v27  }
  0x7c   :  { %v232_v28 = vpop.permute.xlu1 %231 }
  0x7d   :  { %v228_v29 = vpop.permute.xlu0 %227  ;;  %v237_v31 = vrot.slane %v232_v28, 4 }
  0x7e   :  { %v235_v34 = vrot.slane %v228_v29, 4 }
  0x80   :  { %v234_v30 = vpop.permute.xlu1 %233 }
  0x81   :  { %v238_v32 = vrot.slane %v234_v30, 4  ;;  %v230_v33 = vpop.permute.xlu0 %229 }
  0x82   :  { %v236_v35 = vrot.slane %v230_v33, 4 }
  0x83   :  { %v242_v36 = vsel %vm60_vm1, %v237_v31, %v238_v32 }
  0x84   :  { %v201_v37 = vpop.permute.xlu1 %200  ;;  %v239_v38 = vsel %vm60_vm1, %v235_v34, %v236_v35  ;;  %v243_v39 = vsel %vm240_vm2, %v232_v28, %v242_v36 }
  0x85   :  { %v199_v40 = vpop.permute.xlu0 %198  ;;  %v241_v41 = vsel %vm240_vm2, %v228_v29, %v239_v38  ;;  %v207_v42 = vrot.slane %v201_v37, 4 }
  0x86   :  { %v206_v43 = vrot.slane %v199_v40, 4  ;;  %v3278_v44 = vcombine.high %v241_v41, %v243_v39  ;;  %v3277_v45 = vcombine.low %v241_v41, %v243_v39 }
  0x88   :  { %453 = vmatprep.subr.bf16.mxu0 %v3278_v44  ;;  %v205_v46 = vpop.permute.xlu1 %204  ;;  %v210_v49 = vsel %vm60_vm1, %v206_v43, %v207_v42 }
  0x89   :  { %v209_v47 = vrot.slane %v205_v46, 4  ;;  %454 = vmatpush1.bf16.msra.mxu0 %v3277_v45  ;;  %v203_v48 = vpop.permute.xlu0 %202  ;;  %v212_v53 = vsel %vm211_vm3, %v199_v40, %v210_v49 }
  0x8a   :  { %v208_v50 = vrot.slane %v203_v48, 4 }
  0x8c   :  { %v213_v51 = vsel %vm60_vm1, %v208_v50, %v209_v47  ;;  %v168_v52 = vpop.permute.xlu1 %167 }
  0x8d   :  { %v214_v54 = vsel %vm211_vm3, %v203_v48, %v213_v51  ;;  %v166_v55 = vpop.permute.xlu0 %165  ;;  %v174_v57 = vrot.slane %v168_v52, 4 }
  0x8e   :  { %v173_v58 = vrot.slane %v166_v55, 4  ;;  %v3276_v59 = vcombine.high %v212_v53, %v214_v54  ;;  %v3275_v60 = vcombine.low %v212_v53, %v214_v54 }
  0x90   :  { %455 = vmatprep.subr.bf16.mxu0 %v3276_v59  ;;  %v172_v61 = vpop.permute.xlu1 %171  ;;  %v177_v1 = vsel %vm60_vm1, %v173_v58, %v174_v57 }
  0x91   :  { %v176_v62 = vrot.slane %v172_v61, 4  ;;  %456 = vmatpush1.bf16.msra.mxu0 %v3275_v60  ;;  %v170_v63 = vpop.permute.xlu0 %169  ;;  %v179_v7 = vsel %vm178_vm4, %v166_v55, %v177_v1 }
  0x92   :  { %v175_v2 = vrot.slane %v170_v63, 4  ;;  %457 = vmatprep.subr.bf16.mxu0 %v3274_v56 }
  0x94   :  { %v180_v3 = vsel %vm60_vm1, %v175_v2, %v176_v62  ;;  %v139_v6 = vpop.permute.xlu1 %138 }
  0x95   :  { %v181_v8 = vsel %vm178_vm4, %v170_v63, %v180_v3  ;;  %458 = vmatpush1.bf16.msra.mxu0 %v3273_v0  ;;  %v137_v9 = vpop.permute.xlu0 %136  ;;  %v145_v10 = vrot.slane %v139_v6, 4 }
  0x96   :  { %v144_v11 = vrot.slane %v137_v9, 4  ;;  %v3272_v12 = vcombine.high %v179_v7, %v181_v8  ;;  %v3271_v13 = vcombine.low %v179_v7, %v181_v8 }
  0x98   :  { %459 = vmatprep.subr.bf16.mxu0 %v3272_v12  ;;  %v143_v4 = vpop.permute.xlu1 %142  ;;  %v148_v15 = vsel %vm60_vm1, %v144_v11, %v145_v10 }
  0x99   :  { %v147_v5 = vrot.slane %v143_v4, 4  ;;  %460 = vmatpush1.bf16.msra.mxu0 %v3271_v13  ;;  %v141_v14 = vpop.permute.xlu0 %140  ;;  %v150_v19 = vsel %vm149_vm5, %v137_v9, %v148_v15 }
  0x9a   :  { %v146_v16 = vrot.slane %v141_v14, 4 }
  0x9c   :  { %v151_v17 = vsel %vm60_vm1, %v146_v16, %v147_v5  ;;  %v110_v18 = vpop.permute.xlu1 %109 }
  0x9d   :  { %v152_v20 = vsel %vm149_vm5, %v141_v14, %v151_v17  ;;  %v108_v21 = vpop.permute.xlu0 %107  ;;  %v116_v22 = vrot.slane %v110_v18, 4 }
  0x9e   :  { %v115_v23 = vrot.slane %v108_v21, 4  ;;  %v3270_v24 = vcombine.high %v150_v19, %v152_v20  ;;  %v3269_v28 = vcombine.low %v150_v19, %v152_v20 }
  0xa0   :  { %461 = vmatprep.subr.bf16.mxu0 %v3270_v24  ;;  %v114_v29 = vpop.permute.xlu1 %113  ;;  %v119_v32 = vsel %vm60_vm1, %v115_v23, %v116_v22 }
  0xa1   :  { %v118_v30 = vrot.slane %v114_v29, 4  ;;  %462 = vmatpush1.bf16.msra.mxu0 %v3269_v28  ;;  %v112_v31 = vpop.permute.xlu0 %111  ;;  %v121_v36 = vsel %vm120_vm6, %v108_v21, %v119_v32 }
  0xa2   :  { %v117_v33 = vrot.slane %v112_v31, 4 }
  0xa4   :  { %v122_v34 = vsel %vm60_vm1, %v117_v33, %v118_v30  ;;  %v81_v35 = vpop.permute.xlu1 %80 }
  0xa5   :  { %v123_v37 = vsel %vm120_vm6, %v112_v31, %v122_v34  ;;  %v79_v38 = vpop.permute.xlu0 %78  ;;  %v87_v39 = vrot.slane %v81_v35, 4  ;;  %v3476_v34 = vld [vmem:[%s4920_s2] ss:$8 sps:$4 sm:$0xff]  }
  0xa6   :  { %v86_v40 = vrot.slane %v79_v38, 4  ;;  %v3268_v41 = vcombine.high %v121_v36, %v123_v37  ;;  %v3267_v42 = vcombine.low %v121_v36, %v123_v37  ;;  %v3774_v35 = vld [vmem:[%s4919_s1] sm:$0x3]  ;;  %v500_v36 = vlaneseq }
  0xa7   :  { %vm496_vm11 = vcmp.ge.f32.partialorder %v3774_v35, 5.0  ;;  %vm497_vm12 = vcmp.lt.f32.partialorder %v3774_v35, 46.0 }
  0xa8   :  { %463 = vmatprep.subr.bf16.mxu0 %v3268_v41  ;;  %v85_v43 = vpop.permute.xlu1 %84  ;;  %v90_v46 = vsel %vm60_vm1, %v86_v40, %v87_v39  ;;  %v501_v37 = vshrl.u32 %v500_v36, 7  ;;  %vm498_vm13 = vmand %vm496_vm11, %vm497_vm12 }
  0xa9   :  { %v89_v44 = vrot.slane %v85_v43, 4  ;;  %464 = vmatpush1.bf16.msra.mxu0 %v3267_v42  ;;  %v83_v45 = vpop.permute.xlu0 %82  ;;  %v92_v50 = vsel %vm91_vm7, %v79_v38, %v90_v46  ;;  %v499_v40 = vsel %vm498_vm13, 1, %v3600_v25 }
  0xaa   :  { %v88_v47 = vrot.slane %v83_v45, 4  ;;  %v3780_v38 = vsub.s32 0, %v501_v37  ;;  %v3782_v39 = vsub.s32 1, %v501_v37 }
  0xac   :  { %v93_v48 = vsel %vm60_vm1, %v88_v47, %v89_v44  ;;  %v51_v49 = vpop.permute.xlu1 %50  ;;  %v503_v42 = vrot.slane %v499_v40, %v3780_v38  ;;  %v507_v43 = vrot.slane %v499_v40, %v3782_v39 }
  0xad   :  { %v94_v51 = vsel %vm91_vm7, %v83_v45, %v93_v48  ;;  %v49_v52 = vpop.permute.xlu0 %48  ;;  %v57_v53 = vrot.slane %v51_v49, 4 }
  0xae   :  { %v56_v54 = vrot.slane %v49_v52, 4  ;;  %v3266_v55 = vcombine.high %v92_v50, %v94_v51  ;;  %v3265_v56 = vcombine.low %v92_v50, %v94_v51  ;;  %vm3789_vm14 = vcmp.eq.s32.totalorder %v503_v42, 1 }
  0xaf   :  { %vm3793_vm15 = vcmp.eq.s32.totalorder %v507_v43, 1  ;;  %vm3542_vm13 = vmpackc.low %vm3789_vm14, %vm3789_vm14 }
  0xb0   :  { %465 = vmatprep.subr.bf16.mxu0 %v3266_v55  ;;  %v55_v57 = vpop.permute.xlu1 %54  ;;  %v61_v60 = vsel %vm60_vm1, %v56_v54, %v57_v53  ;;  %vm3538_vm12 = vmpackc.low %vm3793_vm15, %vm3793_vm15 }
  0xb1   :  { %v59_v58 = vrot.slane %v55_v57, 4  ;;  %466 = vmatpush1.bf16.msra.mxu0 %v3265_v56  ;;  %v53_v59 = vpop.permute.xlu0 %52  ;;  %v63_v0 = vsel %vm62_vm8, %v49_v52, %v61_v60 }
  0xb2   :  { %v58_v61 = vrot.slane %v53_v59, 4 }
  0xb4   :  { %v64_v62 = vsel %vm60_vm1, %v58_v61, %v59_v58  ;;  %v288_v63 = vpop.permute.xlu1 %287 }
  0xb5   :  { %v65_v1 = vsel %vm62_vm8, %v53_v59, %v64_v62  ;;  %v286_v2 = vpop.permute.xlu0 %285  ;;  %v294_v3 = vrot.slane %v288_v63, 4 }
  0xb6   :  { %v293_v6 = vrot.slane %v286_v2, 4  ;;  %v3264_v7 = vcombine.high %v63_v0, %v65_v1  ;;  %v3263_v8 = vcombine.low %v63_v0, %v65_v1 }
  0xb8   :  { %467 = vmatprep.subr.bf16.mxu0 %v3264_v7  ;;  %v292_v9 = vpop.permute.xlu1 %291  ;;  %v297_v12 = vsel %vm60_vm1, %v293_v6, %v294_v3  ;;  %v3601_v3 = vmov 2   ;;  %v3602_v6 = vmov 1  }
  0xb9   :  { %v296_v10 = vrot.slane %v292_v9, 4  ;;  %468 = vmatpush1.bf16.msra.mxu0 %v3263_v8  ;;  %v290_v11 = vpop.permute.xlu0 %289  ;;  %v299_v14 = vsel %vm298_vm9, %v286_v2, %v297_v12  ;;  %3450 = vset.pattern.permute.xlu1 %v3601_v3 }
  0xba   :  { %v295_v13 = vrot.slane %v290_v11, 4  ;;  %3449 = vset.pattern.permute.xlu0 %v3602_v6 }
  0xbc   :  { %v300_v4 = vsel %vm60_vm1, %v295_v13, %v296_v10  ;;  %v259_v5 = vpop.permute.xlu1 %258 }
  0xbd   :  { %v301_v15 = vsel %vm298_vm9, %v290_v11, %v300_v4  ;;  %v257_v16 = vpop.permute.xlu0 %256  ;;  %v265_v17 = vrot.slane %v259_v5, 4 }
  0xbe   :  { %v264_v18 = vrot.slane %v257_v16, 4  ;;  %v3282_v19 = vcombine.high %v299_v14, %v301_v15  ;;  %v3281_v20 = vcombine.low %v299_v14, %v301_v15 }
  0xc0   :  { %481 = vmatprep.subr.bf16.mxu0 %v3282_v19  ;;  %v263_v21 = vpop.permute.xlu1 %262  ;;  %v268_v24 = vsel %vm60_vm1, %v264_v18, %v265_v17 }
  0xc1   :  { %v267_v22 = vrot.slane %v263_v21, 4  ;;  %482 = vmatpush2.bf16.msra.mxu0 %v3281_v20  ;;  %v261_v23 = vpop.permute.xlu0 %260  ;;  %v270_v30 = vsel %vm269_vm10, %v257_v16, %v268_v24  ;;  %v773_v24 = vld [vmem:[#allocation2 + $0xc] sm:$0xf] }
  0xc2   :  { %v266_v28 = vrot.slane %v261_v23, 4 }
  0xc4   :  { %v271_v29 = vsel %vm60_vm1, %v266_v28, %v267_v22  ;;  %v747_v28 = vld [vmem:[#allocation2 + $0x1c] sm:$0xf] }
  0xc5   :  { %v272_v31 = vsel %vm269_vm10, %v261_v23, %v271_v29  ;;  %v745_v23 = vld [vmem:[#allocation2 + $0xc] sm:$0xf]  ;;  %v775_v29 = vld [vmem:[#allocation2 + $0x1c] sm:$0xf] }
  0xc6   :  { %v3280_v32 = vcombine.high %v270_v30, %v272_v31  ;;  %v3279_v33 = vcombine.low %v270_v30, %v272_v31  ;;  %v831_v30 = vld [vmem:[#allocation2 + $0x1c] sm:$0xf] }
  0xc8   :  { %483 = vmatprep.subr.bf16.mxu0 %v3280_v32 }
  0xc9   :  { %484 = vmatpush2.bf16.msra.mxu0 %v3279_v33 }
  0xcc   :  { %486 = vmatmul.mubr.bf16.vlgmr.msra.gmra.mxu0 %v3476_v34 }
  0xcd   :  { %v338_v47 = vpop.permute.xlu1 %337 }
  0xce   :  { %v333_v41 = vpop.permute.xlu0 %332 }
 0x18c   :  { %v487_v44 = vpop.f32.mrf.mxu0 }
 0x18d   :  { %v3787_v45 = vadd.f32 %v487_v44, %v333_v41 }
 0x18e   :  { %v489_v46 = vpop.f32.mrf.mxu0 }
 0x18f   :  { %v3797_v50 = vadd.f32 %v489_v46, %v333_v41  ;;  %v510_v53 = vsel %vm3789_vm14, %v3787_v45, 0.0 }
 0x190   :  { %v491_v51 = vpop.f32.mrf.mxu0  ;;  %v522_v1 = vmul.f32 %v510_v53, %v510_v53 }
 0x191   :  { %v3799_v52 = vadd.f32 %v491_v51, %v338_v47  ;;  %v511_v54 = vsel %vm3793_vm15, %v3797_v50, 0.0 }
 0x192   :  { %v493_v55 = vpop.f32.mrf.mxu0  ;;  %v514_v56 = vadd.f32 %v511_v54, %v510_v53  ;;  %v523_v63 = vmul.f32 %v511_v54, %v511_v54 }
 0x193   :  { %v3807_v57 = vadd.f32 %v493_v55, %v338_v47  ;;  %v512_v58 = vsel %vm3789_vm14, %v3799_v52, 0.0 }
 0x194   :  { %515 = vadd.xlane.f32.xlu1 %v514_v56  ;;  %v524_v61 = vmul.f32 %v512_v58, %v512_v58  ;;  %v526_v2 = vadd.f32 %v523_v63, %v522_v1 }
 0x195   :  { %v513_v59 = vsel %vm3793_vm15, %v3807_v57, 0.0 }
 0x196   :  { %v517_v60 = vadd.f32 %v513_v59, %v512_v58  ;;  %v525_v62 = vmul.f32 %v513_v59, %v513_v59 }
 0x198   :  { %518 = vadd.xlane.f32.xlu0 %v517_v60  ;;  %v529_v0 = vadd.f32 %v525_v62, %v524_v61 }
 0x19a   :  { %530 = vadd.xlane.f32.xlu1 %v529_v0 }
 0x19c   :  { %527 = vadd.xlane.f32.xlu0 %v526_v2 }
 0x1ab   :  { %563 = vperm.xlu1 %3450, %v3724_v27  }
 0x1af   :  { %3451 = vset.pattern.permute.xlu1 %v3602_v6 }
 0x21d   :  { %v516_v7 = vpop.xlane.xlu1 %515 }
 0x21e   :  { %v520_v9 = vmul.f32 0.0121951215, %v516_v7 }
 0x220   :  { %v534_v14 = vmul.f32 %v520_v9, %v520_v9  ;;  %v544_v32 = vsub.f32 %v3787_v45, %v520_v9  ;;  %v545_v33 = vsub.f32 %v3797_v50, %v520_v9 }
 0x221   :  { %v519_v8 = vpop.xlane.xlu0 %518 }
 0x222   :  { %v521_v10 = vmul.f32 0.0121951215, %v519_v8 }
 0x223   :  { %v531_v11 = vpop.xlane.xlu1 %530 }
 0x224   :  { %v533_v12 = vmul.f32 0.0121951215, %v531_v11  ;;  %v535_v13 = vmul.f32 %v521_v10, %v521_v10  ;;  %v546_v34 = vsub.f32 %v3799_v52, %v521_v10  ;;  %v547_v36 = vsub.f32 %v3807_v57, %v521_v10 }
 0x225   :  { %v528_v4 = vpop.xlane.xlu0 %527 }
 0x226   :  { %v537_v5 = vsub.f32 %v533_v12, %v535_v13  ;;  %v532_v15 = vmul.f32 0.0121951215, %v528_v4 }
 0x228   :  { %v539_v16 = vadd.f32 1e-05, %v537_v5  ;;  %v536_v17 = vsub.f32 %v532_v15, %v534_v14  ;;  %v801_v15 = vld [vmem:[#allocation2 + $0xc] sm:$0xf] }
 0x22a   :  { %3515 = vrsqrt.f32 %v539_v16  ;;  %v538_v18 = vadd.f32 1e-05, %v536_v17  ;;  %v803_v16 = vld [vmem:[#allocation2 + $0x1c] sm:$0xf] }
 0x22b   :  { %v3481_v17 = vld [vmem:[%s4920_s2 + $0x14] ss:$8 sps:$4 sm:$0xff]  }
 0x22c   :  { %3517 = vrsqrt.f32 %v538_v18  ;;  %3312 = vmatprep.mubr.msk.bf16.mxu1 %vm449_vm0, %v3481_v17  ;;  %v3891_v18 = vld [vmem:[%s4921_s3 + $0x18] sm:$0xff] }
 0x237   :  { %v3516_v19 = vpop.eup %3515 }
 0x238   :  { %v543_v20 = vmul.f32 %v3516_v19, %v3719_v26  ;;  %v3898_v19 = vld [vmem:[%s4921_s3 + $0x10] sm:$0xff] }
 0x239   :  { %v3518_v21 = vpop.eup %3517 }
 0x23a   :  { %555 = vperm.xlu1 %3451, %v543_v20   ;;  %v542_v22 = vmul.f32 %v3518_v21, %v3724_v27  ;;  %v829_v27 = vld [vmem:[#allocation2 + $0xc] sm:$0xf] }
 0x23c   :  { %550 = vperm.xlu0 %3449, %v542_v22  }
 0x23e   :  { %3452 = vset.pattern.permute.xlu1 %v3601_v3 }
 0x23f   :  { %567 = vperm.xlu1 %3452, %v3719_v26   ;;  %v564_v26 = vpop.permute.xlu1 %563 }
 0x240   :  { %754 = vrot.lane.b32.xlu0 %v745_v23, %s3592_s0 }
 0x241   :  { %3454 = vset.pattern.permute.xlu0 %v3600_v25 }
 0x243   :  { %782 = vrot.lane.b32.xlu1 %v773_v24, %s3591_s13 }
 0x244   :  { %758 = vrot.lane.b32.xlu0 %v747_v28, %s3592_s0  ;;  %3453 = vset.pattern.permute.xlu1 %v3600_v25 }
 0x247   :  { %786 = vrot.lane.b32.xlu1 %v775_v29, %s3591_s13 }
 0x248   :  { %838 = vrot.lane.b32.xlu0 %v829_v27, %s3598_s19 }
 0x24c   :  { %842 = vrot.lane.b32.xlu0 %v831_v30, %s3598_s19 }
 0x2b5   :  { %v556_v31 = vpop.permute.xlu1 %555 }
 0x2b6   :  { %v560_v42 = vmul.f32 %v556_v31, %v546_v34  ;;  %v561_v43 = vmul.f32 %v556_v31, %v547_v36 }
 0x2b7   :  { %v551_v37 = vpop.permute.xlu0 %550 }
 0x2b8   :  { %v558_v40 = vmul.f32 %v551_v37, %v544_v32  ;;  %v559_v41 = vmul.f32 %v551_v37, %v545_v33 }
 0x2ba   :  { %v570_v44 = vadd.f32 %v564_v26, %v558_v40  ;;  %v571_v46 = vadd.f32 %v564_v26, %v559_v41  ;;  %v568_v47 = vpop.permute.xlu1 %567 }
 0x2bb   :  { %v572_v51 = vadd.f32 %v568_v47, %v560_v42  ;;  %v573_v53 = vadd.f32 %v568_v47, %v561_v43  ;;  %v755_v20 = vpop.permute.xlu0 %754 }
 0x2bc   :  { %v574_v54 = vmul.f32 0.01, %v570_v44  ;;  %v575_v55 = vmul.f32 0.01, %v571_v46  ;;  %v761_v47 = vrot.slane %v755_v20, 4 }
 0x2bd   :  { %v576_v56 = vmul.f32 0.01, %v572_v51  ;;  %v577_v45 = vmul.f32 0.01, %v573_v53 }
 0x2be   :  { %v3835_v58 = vmax.f32 %v570_v44, %v574_v54  ;;  %v3837_v50 = vmax.f32 %v571_v46, %v575_v55  ;;  %v783_v21 = vpop.permute.xlu1 %782 }
 0x2bf   :  { %v3839_v52 = vmax.f32 %v572_v51, %v576_v56  ;;  %v3841_v57 = vmax.f32 %v573_v53, %v577_v45  ;;  %v759_v22 = vpop.permute.xlu0 %758  ;;  %v789_v46 = vrot.slane %v783_v21, 4 }
 0x2c0   :  { %v582_v59 = vsel %vm3789_vm14, %v3835_v58, 0.0  ;;  %v583_v60 = vsel %vm3793_vm15, %v3837_v50, 0.0 }
 0x2c1   :  { %v3423_v61 = vpack.c.bf16 %v583_v60, %v582_v59  ;;  %v584_v62 = vsel %vm3789_vm14, %v3839_v52, 0.0  ;;  %v585_v63 = vsel %vm3793_vm15, %v3841_v57, 0.0  ;;  %v763_v59 = vrot.slane %v759_v22, 4 }
 0x2c2   :  { %v3424_v0 = vpack.c.bf16 %v585_v63, %v584_v62  ;;  %v787_v23 = vpop.permute.xlu1 %786  ;;  %vm1047_vm14 = vcmp.lt.f32.partialorder %v3774_v35, 47.0 }
 0x2c3   :  { %598 = vst [vmem:[#allocation2 + $0x4] sm:$0xff] %v3423_v61  ;;  %780 = vrot.lane.b32.xlu1 %v3423_v61, %s3591_s13  ;;  %v3903_v24 = vpop.permute.xlu0 %838  ;;  %v791_v53 = vrot.slane %v787_v23, 4  ;;  %v3539_v23 = vpack.c.bf16 %v3841_v57, %v3837_v50  ;;  %v3543_v50 = vpack.c.bf16 %v3839_v52, %v3835_v58  ;;  %vm1048_vm15 = vmand %vm496_vm11, %vm1047_vm14 }
 0x2c4   :  { %599 = vst [vmem:[#allocation2 + $0x14] sm:$0xff] %v3424_v0 }
 0x2c7   :  { %752 = vrot.lane.b32.xlu1 %v3423_v61, %s3592_s0  ;;  %v3905_v29 = vpop.permute.xlu0 %842 }
 0x2ca   :  { %v713_v1 = vld [vmem:[#allocation2 + $0x8] sm:$0xf]  ;;  %v712_v2 = vld [vmem:[#allocation2] sm:$0xff] }
 0x2cb   :  { %722 = vrot.lane.b32.xlu0 %v713_v1, %s3593_s14  ;;  %720 = vrot.lane.b32.xlu1 %v712_v2, %s3593_s14  ;;  %v685_v7 = vld [vmem:[#allocation2 + $0x8] sm:$0xf]  ;;  %v715_v11 = vld [vmem:[#allocation2 + $0x18] sm:$0xf]  ;;  %v714_v14 = vld [vmem:[#allocation2 + $0x10] sm:$0xff] }
 0x2cc   :  { %v657_v8 = vld [vmem:[#allocation2 + $0x8] sm:$0xf]  ;;  %v687_v12 = vld [vmem:[#allocation2 + $0x18] sm:$0xf] }
 0x2cd   :  { %v629_v9 = vld [vmem:[#allocation2 + $0x8] sm:$0xf]  ;;  %v659_v13 = vld [vmem:[#allocation2 + $0x18] sm:$0xf] }
 0x2ce   :  { %v601_v10 = vld [vmem:[#allocation2 + $0x8] sm:$0xf]  ;;  %v631_v4 = vld [vmem:[#allocation2 + $0x18] sm:$0xf] }
 0x2cf   :  { %694 = vrot.lane.b32.xlu0 %v685_v7, %s3594_s15  ;;  %692 = vrot.lane.b32.xlu1 %v712_v2, %s3594_s15  ;;  %v603_v5 = vld [vmem:[#allocation2 + $0x18] sm:$0xf] }
 0x2d3   :  { %666 = vrot.lane.b32.xlu0 %v657_v8, %s3595_s16  ;;  %664 = vrot.lane.b32.xlu1 %v712_v2, %s3595_s16 }
 0x2d7   :  { %638 = vrot.lane.b32.xlu0 %v629_v9, %s3596_s17  ;;  %636 = vrot.lane.b32.xlu1 %v712_v2, %s3596_s17 }
 0x2db   :  { %610 = vrot.lane.b32.xlu0 %v601_v10, %s3597_s18  ;;  %608 = vrot.lane.b32.xlu1 %v712_v2, %s3597_s18 }
 0x2df   :  { %726 = vrot.lane.b32.xlu0 %v715_v11, %s3593_s14  ;;  %836 = vrot.lane.b32.xlu1 %v3423_v61, %s3598_s19 }
 0x2e3   :  { %698 = vrot.lane.b32.xlu0 %v687_v12, %s3594_s15  ;;  %784 = vrot.lane.b32.xlu1 %v3424_v0, %s3591_s13 }
 0x2e7   :  { %670 = vrot.lane.b32.xlu0 %v659_v13, %s3595_s16  ;;  %756 = vrot.lane.b32.xlu1 %v3424_v0, %s3592_s0 }
 0x2eb   :  { %642 = vrot.lane.b32.xlu0 %v631_v4, %s3596_s17  ;;  %808 = vrot.lane.b32.xlu1 %v3423_v61, %s3599_s22 }
 0x2ef   :  { %614 = vrot.lane.b32.xlu0 %v603_v5, %s3597_s18  ;;  %724 = vrot.lane.b32.xlu1 %v714_v14, %s3593_s14 }
 0x2f3   :  { %810 = vrot.lane.b32.xlu0 %v801_v15, %s3599_s22  ;;  %696 = vrot.lane.b32.xlu1 %v714_v14, %s3594_s15 }
 0x2f7   :  { %668 = vrot.lane.b32.xlu1 %v714_v14, %s3595_s16  ;;  %814 = vrot.lane.b32.xlu0 %v803_v16, %s3599_s22 }
 0x2fb   :  { %640 = vrot.lane.b32.xlu1 %v714_v14, %s3596_s17  ;;  %889 = vperm.xlu0 %3454, %v3891_v18  }
 0x2ff   :  { %612 = vrot.lane.b32.xlu1 %v714_v14, %s3597_s18  ;;  %3456 = vset.pattern.permute.xlu0 %v3602_v6 }
 0x303   :  { %840 = vrot.lane.b32.xlu1 %v3424_v0, %s3598_s19 }
 0x307   :  { %812 = vrot.lane.b32.xlu1 %v3424_v0, %s3599_s22 }
 0x30b   :  { %884 = vperm.xlu1 %3453, %v3898_v19  }
 0x30f   :  { %3455 = vset.pattern.permute.xlu1 %v3602_v6 }
 0x335   :  { %v781_v28 = vpop.permute.xlu1 %780 }
 0x336   :  { %v788_v43 = vrot.slane %v781_v28, 4 }
 0x338   :  { %v792_v56 = vsel %vm60_vm1, %v788_v43, %v789_v46 }
 0x339   :  { %v753_v27 = vpop.permute.xlu1 %752  ;;  %v793_v62 = vsel %vm240_vm2, %v781_v28, %v792_v56 }
 0x33a   :  { %v760_v54 = vrot.slane %v753_v27, 4 }
 0x33c   :  { %v764_v0 = vsel %vm60_vm1, %v760_v54, %v761_v47 }
 0x33d   :  { %v723_v30 = vpop.permute.xlu0 %722  ;;  %v721_v26 = vpop.permute.xlu1 %720  ;;  %v765_v10 = vsel %vm211_vm3, %v753_v27, %v764_v0 }
 0x33e   :  { %v729_v9 = vrot.slane %v723_v30, 4  ;;  %v728_v11 = vrot.slane %v721_v26, 4 }
 0x340   :  { %v732_v16 = vsel %vm60_vm1, %v728_v11, %v729_v9 }
 0x341   :  { %v695_v31 = vpop.permute.xlu0 %694  ;;  %v3907_v32 = vpop.permute.xlu1 %692  ;;  %v733_v28 = vsel %vm178_vm4, %v721_v26, %v732_v16 }
 0x342   :  { %v701_v15 = vrot.slane %v695_v31, 4  ;;  %v700_v17 = vrot.slane %v3907_v32, 4 }
 0x344   :  { %v704_v31 = vsel %vm60_vm1, %v700_v17, %v701_v15 }
 0x345   :  { %v3909_v33 = vpop.permute.xlu0 %666  ;;  %v3911_v34 = vpop.permute.xlu1 %664 }
 0x346   :  { %v673_v30 = vrot.slane %v3909_v33, 4  ;;  %v672_v43 = vrot.slane %v3911_v34, 4 }
 0x348   :  { %v676_v48 = vsel %vm60_vm1, %v672_v43, %v673_v30 }
 0x349   :  { %v3913_v36 = vpop.permute.xlu0 %638  ;;  %v3915_v37 = vpop.permute.xlu1 %636 }
 0x34a   :  { %v645_v54 = vrot.slane %v3913_v36, 4 }
 0x34d   :  { %v3917_v40 = vpop.permute.xlu0 %610  ;;  %v3919_v41 = vpop.permute.xlu1 %608 }
 0x34e   :  { %v617_v36 = vrot.slane %v3917_v40, 4  ;;  %v616_v0 = vrot.slane %v3919_v41, 4 }
 0x350   :  { %v620_v40 = vsel %vm60_vm1, %v616_v0, %v617_v36 }
 0x351   :  { %v3921_v42 = vpop.permute.xlu1 %836  ;;  %v727_v44 = vpop.permute.xlu0 %726 }
 0x352   :  { %v731_v21 = vrot.slane %v727_v44, 4 }
 0x355   :  { %v785_v51 = vpop.permute.xlu1 %784  ;;  %v699_v60 = vpop.permute.xlu0 %698 }
 0x356   :  { %v790_v55 = vrot.slane %v785_v51, 4  ;;  %v703_v57 = vrot.slane %v699_v60, 4 }
 0x358   :  { %v794_v45 = vsel %vm60_vm1, %v790_v55, %v791_v53  ;;  %v644_v55 = vrot.slane %v3915_v37, 4 }
 0x359   :  { %v757_v61 = vpop.permute.xlu1 %756  ;;  %v795_v63 = vsel %vm240_vm2, %v785_v51, %v794_v45  ;;  %v671_v14 = vpop.permute.xlu0 %670  ;;  %v705_v51 = vsel %vm149_vm5, %v3907_v32, %v704_v31  ;;  %v677_v32 = vsel %vm120_vm6, %v3911_v34, %v676_v48 }
 0x35a   :  { %v762_v1 = vrot.slane %v757_v61, 4  ;;  %v3307_v2 = vcombine.high %v793_v62, %v795_v63  ;;  %v3306_v7 = vcombine.low %v793_v62, %v795_v63  ;;  %v675_v52 = vrot.slane %v671_v14, 4 }
 0x35b   :  { %v648_v63 = vsel %vm60_vm1, %v644_v55, %v645_v54 }
 0x35c   :  { %v766_v8 = vsel %vm60_vm1, %v762_v1, %v763_v59  ;;  %1004 = vmatprep.subr.bf16.mxu1 %v3307_v2  ;;  %v649_v34 = vsel %vm91_vm7, %v3915_v37, %v648_v63  ;;  %v847_v37 = vrot.slane %v3905_v29, 4 }
 0x35d   :  { %v767_v12 = vsel %vm211_vm3, %v757_v61, %v766_v8  ;;  %1005 = vmatpush1.bf16.msra.mxu1 %v3306_v7  ;;  %v3931_v13 = vpop.permute.xlu1 %808  ;;  %v643_v44 = vpop.permute.xlu0 %642 }
 0x35e   :  { %v3305_v4 = vcombine.high %v765_v10, %v767_v12  ;;  %v3304_v5 = vcombine.low %v765_v10, %v767_v12  ;;  %v647_v7 = vrot.slane %v643_v44, 4  ;;  %v844_v12 = vrot.slane %v3921_v42, 4 }
 0x360   :  { %1006 = vmatprep.subr.bf16.mxu1 %v3305_v4 }
 0x361   :  { %v725_v20 = vpop.permute.xlu1 %724  ;;  %1007 = vmatpush1.bf16.msra.mxu1 %v3304_v5  ;;  %v615_v61 = vpop.permute.xlu0 %614 }
 0x362   :  { %v730_v22 = vrot.slane %v725_v20, 4  ;;  %3540 = vmatprep.subr.msk.bf16.mxu1 %vm3538_vm12, %v3539_v23  ;;  %v619_v15 = vrot.slane %v615_v61, 4  ;;  %v621_v23 = vsel %vm62_vm8, %v3919_v41, %v620_v40 }
 0x364   :  { %v734_v27 = vsel %vm60_vm1, %v730_v22, %v731_v21  ;;  %v845_v21 = vrot.slane %v3903_v24, 4  ;;  %v816_v24 = vrot.slane %v3931_v13, 4 }
 0x365   :  { %v735_v46 = vsel %vm178_vm4, %v725_v20, %v734_v27  ;;  %v697_v49 = vpop.permute.xlu1 %696  ;;  %3544 = vmatpush1.bf16.msk.msra.mxu1 %vm3542_vm13, %v3543_v50  ;;  %v811_v4 = vpop.permute.xlu0 %810 }
 0x366   :  { %v702_v26 = vrot.slane %v697_v49, 4  ;;  %v3301_v47 = vcombine.high %v733_v28, %v735_v46  ;;  %v3300_v33 = vcombine.low %v733_v28, %v735_v46  ;;  %v848_v28 = vsel %vm60_vm1, %v844_v12, %v845_v21 }
 0x367   :  { %v817_v43 = vrot.slane %v811_v4, 4  ;;  %v849_v41 = vsel %vm298_vm9, %v3921_v42, %v848_v28 }
 0x368   :  { %v706_v53 = vsel %vm60_vm1, %v702_v26, %v703_v57  ;;  %1010 = vmatprep.subr.bf16.mxu1 %v3301_v47 }
 0x369   :  { %v707_v56 = vsel %vm149_vm5, %v697_v49, %v706_v53  ;;  %v669_v58 = vpop.permute.xlu1 %668  ;;  %1011 = vmatpush1.bf16.msra.mxu1 %v3300_v33  ;;  %v815_v31 = vpop.permute.xlu0 %814  ;;  %v820_v47 = vsel %vm60_vm1, %v816_v24, %v817_v43 }
 0x36a   :  { %v674_v45 = vrot.slane %v669_v58, 4  ;;  %v3299_v59 = vcombine.high %v705_v51, %v707_v56  ;;  %v3298_v60 = vcombine.low %v705_v51, %v707_v56  ;;  %v819_v29 = vrot.slane %v815_v31, 4 }
 0x36b   :  { %v821_v48 = vsel %vm269_vm10, %v3931_v13, %v820_v47  ;;  %v1297_v47 = vld [vmem:[#allocation2 + $0x1c] sm:$0xf] }
 0x36c   :  { %v678_v62 = vsel %vm60_vm1, %v674_v45, %v675_v52  ;;  %1012 = vmatprep.subr.bf16.mxu1 %v3299_v59  ;;  %v1049_v52 = vsel %vm1048_vm15, 1, %v3600_v25 }
 0x36d   :  { %v679_v1 = vsel %vm120_vm6, %v669_v58, %v678_v62  ;;  %v641_v2 = vpop.permute.xlu1 %640  ;;  %1013 = vmatpush1.bf16.msra.mxu1 %v3298_v60  ;;  %v3479_v58 = vld [vmem:[%s4920_s2 + $0x10] ss:$8 sps:$4 sm:$0xff]   ;;  %v1053_v13 = vrot.slane %v1049_v52, %v3780_v38  ;;  %v1057_v59 = vrot.slane %v1049_v52, %v3782_v39 }
 0x36e   :  { %v646_v8 = vrot.slane %v641_v2, 4  ;;  %v3297_v9 = vcombine.high %v677_v32, %v679_v1  ;;  %v3296_v10 = vcombine.low %v677_v32, %v679_v1 }
 0x36f   :  { %vm3999_vm12 = vcmp.eq.s32.totalorder %v1053_v13, 1  ;;  %vm4003_vm13 = vcmp.eq.s32.totalorder %v1057_v59, 1 }
 0x370   :  { %v650_v11 = vsel %vm60_vm1, %v646_v8, %v647_v7  ;;  %1014 = vmatprep.subr.bf16.mxu1 %v3297_v9  ;;  %vm3547_vm14 = vmpackc.low %vm4003_vm13, %vm4003_vm13 }
 0x371   :  { %v651_v5 = vsel %vm91_vm7, %v641_v2, %v650_v11  ;;  %v613_v14 = vpop.permute.xlu1 %612  ;;  %1015 = vmatpush1.bf16.msra.mxu1 %v3296_v10  ;;  %vm3550_vm15 = vmpackc.low %vm3999_vm12, %vm3999_vm12 }
 0x372   :  { %v618_v16 = vrot.slane %v613_v14, 4  ;;  %v3295_v17 = vcombine.high %v649_v34, %v651_v5  ;;  %v3294_v20 = vcombine.low %v649_v34, %v651_v5 }
 0x374   :  { %v622_v22 = vsel %vm60_vm1, %v618_v16, %v619_v15  ;;  %1016 = vmatprep.subr.bf16.mxu1 %v3295_v17 }
 0x375   :  { %v623_v27 = vsel %vm62_vm8, %v613_v14, %v622_v22  ;;  %v841_v30 = vpop.permute.xlu1 %840  ;;  %1017 = vmatpush1.bf16.msra.mxu1 %v3294_v20 }
 0x376   :  { %v846_v44 = vrot.slane %v841_v30, 4  ;;  %v3293_v46 = vcombine.high %v621_v23, %v623_v27  ;;  %v3292_v49 = vcombine.low %v621_v23, %v623_v27  ;;  %v890_v62 = vpop.permute.xlu0 %889 }
 0x378   :  { %v850_v50 = vsel %vm60_vm1, %v846_v44, %v847_v37  ;;  %1018 = vmatprep.subr.bf16.mxu1 %v3293_v46 }
 0x379   :  { %v851_v57 = vsel %vm298_vm9, %v841_v30, %v850_v50  ;;  %v813_v26 = vpop.permute.xlu1 %812  ;;  %1019 = vmatpush1.bf16.msra.mxu1 %v3292_v49 }
 0x37a   :  { %v818_v33 = vrot.slane %v813_v26, 4  ;;  %v3311_v51 = vcombine.high %v849_v41, %v851_v57  ;;  %v3310_v53 = vcombine.low %v849_v41, %v851_v57 }
 0x37c   :  { %v822_v54 = vsel %vm60_vm1, %v818_v33, %v819_v29  ;;  %1032 = vmatprep.subr.bf16.mxu1 %v3311_v51  ;;  %v1323_v33 = vld [vmem:[#allocation2 + $0xc] sm:$0xf] }
 0x37d   :  { %1033 = vmatpush2.bf16.msra.mxu1 %v3310_v53  ;;  %v823_v55 = vsel %vm269_vm10, %v813_v26, %v822_v54  ;;  %v1295_v26 = vld [vmem:[#allocation2 + $0xc] sm:$0xf]  ;;  %v1325_v53 = vld [vmem:[#allocation2 + $0x1c] sm:$0xf] }
 0x37e   :  { %v3309_v56 = vcombine.high %v821_v48, %v823_v55  ;;  %v3308_v42 = vcombine.low %v821_v48, %v823_v55  ;;  %v1379_v51 = vld [vmem:[#allocation2 + $0xc] sm:$0xf] }
 0x380   :  { %1034 = vmatprep.subr.bf16.mxu1 %v3309_v56 }
 0x381   :  { %1035 = vmatpush2.bf16.msra.mxu1 %v3308_v42 }
 0x384   :  { %1037 = vmatmul.mubr.bf16.vlgmr.msra.gmra.mxu1 %v3479_v58 }
 0x386   :  { %v885_v45 = vpop.permute.xlu1 %884 }
 0x444   :  { %v1038_v60 = vpop.f32.mrf.mxu1 }
 0x445   :  { %v3997_v61 = vadd.f32 %v1038_v60, %v885_v45 }
 0x446   :  { %v1040_v32 = vpop.f32.mrf.mxu1 }
 0x447   :  { %v4007_v0 = vadd.f32 %v1040_v32, %v885_v45  ;;  %v1060_v7 = vsel %vm3999_vm12, %v3997_v61, 0.0 }
 0x448   :  { %v1042_v1 = vpop.f32.mrf.mxu1  ;;  %v1072_v40 = vmul.f32 %v1060_v7, %v1060_v7 }
 0x449   :  { %v4009_v2 = vadd.f32 %v1042_v1, %v890_v62  ;;  %v1061_v8 = vsel %vm4003_vm13, %v4007_v0, 0.0 }
 0x44a   :  { %v1044_v9 = vpop.f32.mrf.mxu1  ;;  %v1064_v10 = vadd.f32 %v1061_v8, %v1060_v7  ;;  %v1073_v11 = vmul.f32 %v1061_v8, %v1061_v8 }
 0x44b   :  { %v4017_v34 = vadd.f32 %v1044_v9, %v890_v62  ;;  %v1062_v12 = vsel %vm3999_vm12, %v4009_v2, 0.0 }
 0x44c   :  { %1065 = vadd.xlane.f32.xlu1 %v1064_v10  ;;  %v1076_v5 = vadd.f32 %v1073_v11, %v1072_v40  ;;  %v1074_v16 = vmul.f32 %v1062_v12, %v1062_v12 }
 0x44d   :  { %v1063_v4 = vsel %vm4003_vm13, %v4017_v34, 0.0 }
 0x44e   :  { %v1067_v14 = vadd.f32 %v1063_v4, %v1062_v12  ;;  %v1075_v15 = vmul.f32 %v1063_v4, %v1063_v4 }
 0x450   :  { %1077 = vadd.xlane.f32.xlu1 %v1076_v5  ;;  %1068 = vadd.xlane.f32.xlu0 %v1067_v14  ;;  %v1079_v17 = vadd.f32 %v1075_v15, %v1074_v16 }
 0x454   :  { %1080 = vadd.xlane.f32.xlu0 %v1079_v17 }
 0x4d5   :  { %v1066_v20 = vpop.xlane.xlu1 %1065 }
 0x4d6   :  { %v1070_v21 = vmul.f32 0.011904762, %v1066_v20 }
 0x4d8   :  { %v1084_v23 = vmul.f32 %v1070_v21, %v1070_v21  ;;  %v1094_v54 = vsub.f32 %v3997_v61, %v1070_v21  ;;  %v1095_v48 = vsub.f32 %v4007_v0, %v1070_v21 }
 0x4d9   :  { %v1078_v22 = vpop.xlane.xlu1 %1077  ;;  %v1069_v37 = vpop.xlane.xlu0 %1068 }
 0x4da   :  { %v1082_v28 = vmul.f32 0.011904762, %v1078_v22  ;;  %v1071_v27 = vmul.f32 0.011904762, %v1069_v37 }
 0x4dc   :  { %v1086_v30 = vsub.f32 %v1082_v28, %v1084_v23  ;;  %v1085_v44 = vmul.f32 %v1071_v27, %v1071_v27  ;;  %v1096_v52 = vsub.f32 %v4009_v2, %v1071_v27  ;;  %v1097_v45 = vsub.f32 %v4017_v34, %v1071_v27 }
 0x4dd   :  { %v1081_v31 = vpop.xlane.xlu0 %1080 }
 0x4de   :  { %v1088_v43 = vadd.f32 1e-05, %v1086_v30  ;;  %v1083_v46 = vmul.f32 0.011904762, %v1081_v31 }
 0x4e0   :  { %3519 = vrsqrt.f32 %v1088_v43  ;;  %v1087_v49 = vsub.f32 %v1083_v46, %v1085_v44  ;;  %v1351_v44 = vld [vmem:[#allocation2 + $0xc] sm:$0xf]  ;;  %v1353_v46 = vld [vmem:[#allocation2 + $0x1c] sm:$0xf] }
 0x4e2   :  { %v1089_v24 = vadd.f32 1e-05, %v1087_v49  ;;  %v3482_v49 = vld [vmem:[%s4920_s2 + $0x24] ss:$8 sps:$4 sm:$0xff]  }
 0x4e3   :  { %3341 = vmatprep.mubr.msk.bf16.mxu0 %vm449_vm0, %v3482_v49 }
 0x4e4   :  { %3521 = vrsqrt.f32 %v1089_v24  ;;  %v4098_v24 = vld [vmem:[%s4921_s3 + $0x28] sm:$0xff] }
 0x4ed   :  { %v3520_v50 = vpop.eup %3519 }
 0x4ee   :  { %v1092_v29 = vmul.f32 %v3520_v50, %v3898_v19  ;;  %v4105_v50 = vld [vmem:[%s4921_s3 + $0x20] sm:$0xff] }
 0x4f0   :  { %1100 = vperm.xlu1 %3455, %v1092_v29  }
 0x4f1   :  { %v3522_v41 = vpop.eup %3521 }
 0x4f2   :  { %v1093_v57 = vmul.f32 %v3522_v41, %v3891_v18 }
 0x4f4   :  { %3457 = vset.pattern.permute.xlu1 %v3601_v3  ;;  %1105 = vperm.xlu0 %3456, %v1093_v57  }
 0x4f5   :  { %1113 = vperm.xlu1 %3457, %v3898_v19   ;;  %v1381_v19 = vld [vmem:[#allocation2 + $0x1c] sm:$0xf] }
 0x4f8   :  { %1304 = vrot.lane.b32.xlu0 %v1295_v26, %s3592_s0 }
 0x4f9   :  { %1117 = vperm.xlu1 %3457, %v3891_v18   ;;  %3459 = vset.pattern.permute.xlu0 %v3600_v25 }
 0x4fc   :  { %1308 = vrot.lane.b32.xlu0 %v1297_v47, %s3592_s0 }
 0x4fd   :  { %1332 = vrot.lane.b32.xlu1 %v1323_v33, %s3591_s13 }
 0x4fe   :  { %3458 = vset.pattern.permute.xlu1 %v3600_v25 }
 0x500   :  { %1388 = vrot.lane.b32.xlu0 %v1379_v51, %s3598_s19 }
 0x501   :  { %1336 = vrot.lane.b32.xlu1 %v1325_v53, %s3591_s13 }
 0x504   :  { %1392 = vrot.lane.b32.xlu0 %v1381_v19, %s3598_s19 }
 0x56b   :  { %v1101_v18 = vpop.permute.xlu1 %1100 }
 0x56c   :  { %v1108_v55 = vmul.f32 %v1101_v18, %v1094_v54  ;;  %v1109_v56 = vmul.f32 %v1101_v18, %v1095_v48 }
 0x56f   :  { %v1106_v42 = vpop.permute.xlu0 %1105 }
 0x570   :  { %v1114_v58 = vpop.permute.xlu1 %1113  ;;  %v1110_v60 = vmul.f32 %v1106_v42, %v1096_v52  ;;  %v1111_v32 = vmul.f32 %v1106_v42, %v1097_v45 }
 0x571   :  { %v1120_v13 = vadd.f32 %v1114_v58, %v1108_v55  ;;  %v1121_v59 = vadd.f32 %v1114_v58, %v1109_v56 }
 0x573   :  { %v1124_v62 = vmul.f32 0.01, %v1120_v13  ;;  %v1125_v1 = vmul.f32 0.01, %v1121_v59  ;;  %v1305_v29 = vpop.permute.xlu0 %1304 }
 0x574   :  { %v1118_v7 = vpop.permute.xlu1 %1117 }
 0x575   :  { %v4042_v8 = vmax.f32 %v1120_v13, %v1124_v62  ;;  %v4044_v61 = vmax.f32 %v1121_v59, %v1125_v1  ;;  %v1122_v0 = vadd.f32 %v1118_v7, %v1110_v60  ;;  %v1123_v9 = vadd.f32 %v1118_v7, %v1111_v32 }
 0x576   :  { %v1311_v62 = vrot.slane %v1305_v29, 4 }
 0x577   :  { %v1132_v10 = vsel %vm3999_vm12, %v4042_v8, 0.0  ;;  %v1133_v2 = vsel %vm4003_vm13, %v4044_v61, 0.0  ;;  %v1126_v11 = vmul.f32 0.01, %v1122_v0  ;;  %v1127_v34 = vmul.f32 0.01, %v1123_v9  ;;  %v1309_v57 = vpop.permute.xlu0 %1308 }
 0x578   :  { %v3425_v40 = vpack.c.bf16 %v1133_v2, %v1132_v10  ;;  %v1333_v41 = vpop.permute.xlu1 %1332 }
 0x579   :  { %v4052_v12 = vmax.f32 %v1122_v0, %v1126_v11  ;;  %v4054_v4 = vmax.f32 %v1123_v9, %v1127_v34  ;;  %v1339_v32 = vrot.slane %v1333_v41, 4  ;;  %v1313_v11 = vrot.slane %v1309_v57, 4 }
 0x57a   :  { %1148 = vst [vmem:[#allocation2 + $0x4] sm:$0xff] %v3425_v40  ;;  %1330 = vrot.lane.b32.xlu1 %v3425_v40, %s3591_s13 }
 0x57b   :  { %v1134_v5 = vsel %vm3999_vm12, %v4052_v12, 0.0  ;;  %v1135_v14 = vsel %vm4003_vm13, %v4054_v4, 0.0  ;;  %v4110_v47 = vpop.permute.xlu0 %1388 }
 0x57c   :  { %v3426_v15 = vpack.c.bf16 %v1135_v14, %v1134_v5  ;;  %v1337_v26 = vpop.permute.xlu1 %1336 }
 0x57d   :  { %v1341_v7 = vrot.slane %v1337_v26, 4  ;;  %v3548_v26 = vpack.c.bf16 %v4054_v4, %v4044_v61  ;;  %v3551_v61 = vpack.c.bf16 %v4052_v12, %v4042_v8 }
 0x57e   :  { %1149 = vst [vmem:[#allocation2 + $0x14] sm:$0xff] %v3426_v15  ;;  %1302 = vrot.lane.b32.xlu1 %v3425_v40, %s3592_s0 }
 0x57f   :  { %v4112_v51 = vpop.permute.xlu0 %1392 }
 0x581   :  { %v1263_v16 = vld [vmem:[#allocation2 + $0x8] sm:$0xf]  ;;  %v1262_v17 = vld [vmem:[#allocation2] sm:$0xff] }
 0x582   :  { %1272 = vrot.lane.b32.xlu0 %v1263_v16, %s3593_s14  ;;  %1270 = vrot.lane.b32.xlu1 %v1262_v17, %s3593_s14  ;;  %v1235_v20 = vld [vmem:[#allocation2 + $0x8] sm:$0xf] }
 0x583   :  { %v1207_v21 = vld [vmem:[#allocation2 + $0x8] sm:$0xf] }
 0x584   :  { %v1179_v22 = vld [vmem:[#allocation2 + $0x8] sm:$0xf] }
 0x585   :  { %v1151_v37 = vld [vmem:[#allocation2 + $0x8] sm:$0xf]  ;;  %v1265_v23 = vld [vmem:[#allocation2 + $0x18] sm:$0xf]  ;;  %v1264_v43 = vld [vmem:[#allocation2 + $0x10] sm:$0xff] }
 0x586   :  { %1244 = vrot.lane.b32.xlu0 %v1235_v20, %s3594_s15  ;;  %1242 = vrot.lane.b32.xlu1 %v1262_v17, %s3594_s15  ;;  %v1237_v28 = vld [vmem:[#allocation2 + $0x18] sm:$0xf] }
 0x587   :  { %v1209_v27 = vld [vmem:[#allocation2 + $0x18] sm:$0xf] }
 0x588   :  { %v1181_v30 = vld [vmem:[#allocation2 + $0x18] sm:$0xf] }
 0x589   :  { %v1153_v31 = vld [vmem:[#allocation2 + $0x18] sm:$0xf] }
 0x58a   :  { %1216 = vrot.lane.b32.xlu0 %v1207_v21, %s3595_s16  ;;  %1214 = vrot.lane.b32.xlu1 %v1262_v17, %s3595_s16 }
 0x58e   :  { %1188 = vrot.lane.b32.xlu0 %v1179_v22, %s3596_s17  ;;  %1186 = vrot.lane.b32.xlu1 %v1262_v17, %s3596_s17 }
 0x592   :  { %1160 = vrot.lane.b32.xlu0 %v1151_v37, %s3597_s18  ;;  %1158 = vrot.lane.b32.xlu1 %v1262_v17, %s3597_s18 }
 0x596   :  { %1276 = vrot.lane.b32.xlu0 %v1265_v23, %s3593_s14  ;;  %1386 = vrot.lane.b32.xlu1 %v3425_v40, %s3598_s19 }
 0x59a   :  { %1248 = vrot.lane.b32.xlu0 %v1237_v28, %s3594_s15  ;;  %1334 = vrot.lane.b32.xlu1 %v3426_v15, %s3591_s13 }
 0x59e   :  { %1220 = vrot.lane.b32.xlu0 %v1209_v27, %s3595_s16  ;;  %1306 = vrot.lane.b32.xlu1 %v3426_v15, %s3592_s0 }
 0x5a2   :  { %1192 = vrot.lane.b32.xlu0 %v1181_v30, %s3596_s17  ;;  %1358 = vrot.lane.b32.xlu1 %v3425_v40, %s3599_s22 }
 0x5a6   :  { %1164 = vrot.lane.b32.xlu0 %v1153_v31, %s3597_s18  ;;  %1274 = vrot.lane.b32.xlu1 %v1264_v43, %s3593_s14 }
 0x5aa   :  { %1360 = vrot.lane.b32.xlu0 %v1351_v44, %s3599_s22  ;;  %1246 = vrot.lane.b32.xlu1 %v1264_v43, %s3594_s15 }
 0x5ae   :  { %1218 = vrot.lane.b32.xlu1 %v1264_v43, %s3595_s16  ;;  %1364 = vrot.lane.b32.xlu0 %v1353_v46, %s3599_s22 }
 0x5b2   :  { %1190 = vrot.lane.b32.xlu1 %v1264_v43, %s3596_s17  ;;  %1439 = vperm.xlu0 %3459, %v4098_v24  }
 0x5b6   :  { %1162 = vrot.lane.b32.xlu1 %v1264_v43, %s3597_s18  ;;  %3461 = vset.pattern.permute.xlu0 %v3602_v6 }
 0x5ba   :  { %1390 = vrot.lane.b32.xlu1 %v3426_v15, %s3598_s19 }
 0x5be   :  { %1362 = vrot.lane.b32.xlu1 %v3426_v15, %s3599_s22 }
 0x5c2   :  { %1434 = vperm.xlu1 %3458, %v4105_v50  }
 0x5c6   :  { %3460 = vset.pattern.permute.xlu1 %v3602_v6 }
 0x5ec   :  { %v1331_v33 = vpop.permute.xlu1 %1330 }
 0x5ed   :  { %v1338_v59 = vrot.slane %v1331_v33, 4 }
 0x5ef   :  { %v1342_v0 = vsel %vm60_vm1, %v1338_v59, %v1339_v32 }
 0x5f0   :  { %v1303_v53 = vpop.permute.xlu1 %1302  ;;  %v1343_v34 = vsel %vm240_vm2, %v1331_v33, %v1342_v0 }
 0x5f1   :  { %v1310_v9 = vrot.slane %v1303_v53, 4 }
 0x5f3   :  { %v1314_v15 = vsel %vm60_vm1, %v1310_v9, %v1311_v62 }
 0x5f4   :  { %v1273_v19 = vpop.permute.xlu0 %1272  ;;  %v1271_v18 = vpop.permute.xlu1 %1270  ;;  %v1315_v37 = vsel %vm211_vm3, %v1303_v53, %v1314_v15 }
 0x5f5   :  { %v1279_v22 = vrot.slane %v1273_v19, 4  ;;  %v1278_v23 = vrot.slane %v1271_v18, 4 }
 0x5f7   :  { %v1282_v46 = vsel %vm60_vm1, %v1278_v23, %v1279_v22 }
 0x5f8   :  { %v1245_v54 = vpop.permute.xlu0 %1244  ;;  %v4114_v48 = vpop.permute.xlu1 %1242  ;;  %v1283_v33 = vsel %vm178_vm4, %v1271_v18, %v1282_v46 }
 0x5f9   :  { %v1251_v44 = vrot.slane %v1245_v54, 4  ;;  %v1250_v49 = vrot.slane %v4114_v48, 4 }
 0x5fb   :  { %v1254_v54 = vsel %vm60_vm1, %v1250_v49, %v1251_v44 }
 0x5fc   :  { %v4116_v55 = vpop.permute.xlu0 %1216  ;;  %v4118_v56 = vpop.permute.xlu1 %1214 }
 0x5fd   :  { %v1223_v19 = vrot.slane %v4116_v55, 4  ;;  %v1222_v59 = vrot.slane %v4118_v56, 4 }
 0x5ff   :  { %v1226_v36 = vsel %vm60_vm1, %v1222_v59, %v1223_v19 }
 0x600   :  { %v4120_v42 = vpop.permute.xlu0 %1188  ;;  %v4122_v58 = vpop.permute.xlu1 %1186 }
 0x601   :  { %v1195_v0 = vrot.slane %v4120_v42, 4  ;;  %v1194_v9 = vrot.slane %v4122_v58, 4 }
 0x604   :  { %v4124_v52 = vpop.permute.xlu0 %1160  ;;  %v4126_v45 = vpop.permute.xlu1 %1158 }
 0x605   :  { %v1167_v42 = vrot.slane %v4124_v52, 4  ;;  %v1166_v15 = vrot.slane %v4126_v45, 4 }
 0x607   :  { %v1170_v52 = vsel %vm60_vm1, %v1166_v15, %v1167_v42 }
 0x608   :  { %v4128_v13 = vpop.permute.xlu1 %1386  ;;  %v1277_v60 = vpop.permute.xlu0 %1276 }
 0x609   :  { %v1281_v41 = vrot.slane %v1277_v60, 4 }
 0x60c   :  { %v1335_v1 = vpop.permute.xlu1 %1334  ;;  %v1249_v40 = vpop.permute.xlu0 %1248 }
 0x60d   :  { %v1340_v10 = vrot.slane %v1335_v1, 4  ;;  %v1253_v4 = vrot.slane %v1249_v40, 4 }
 0x60f   :  { %v1344_v2 = vsel %vm60_vm1, %v1340_v10, %v1341_v7 }
 0x610   :  { %v1345_v5 = vsel %vm240_vm2, %v1335_v1, %v1344_v2  ;;  %v1307_v14 = vpop.permute.xlu1 %1306  ;;  %v1221_v43 = vpop.permute.xlu0 %1220  ;;  %v1255_v1 = vsel %vm149_vm5, %v4114_v48, %v1254_v54  ;;  %v1227_v48 = vsel %vm120_vm6, %v4118_v56, %v1226_v36 }
 0x611   :  { %v3335_v16 = vcombine.low %v1343_v34, %v1345_v5  ;;  %v1312_v17 = vrot.slane %v1307_v14, 4  ;;  %v3336_v20 = vcombine.high %v1343_v34, %v1345_v5  ;;  %v1225_v12 = vrot.slane %v1221_v43, 4 }
 0x613   :  { %v1316_v21 = vsel %vm60_vm1, %v1312_v17, %v1313_v11  ;;  %1554 = vmatprep.subr.bf16.mxu0 %v3336_v20 }
 0x614   :  { %v1317_v28 = vsel %vm211_vm3, %v1307_v14, %v1316_v21  ;;  %1555 = vmatpush1.bf16.msra.mxu0 %v3335_v16  ;;  %v4138_v27 = vpop.permute.xlu1 %1358  ;;  %v1193_v60 = vpop.permute.xlu0 %1192  ;;  %v1198_v14 = vsel %vm60_vm1, %v1194_v9, %v1195_v0 }
 0x615   :  { %v3333_v30 = vcombine.low %v1315_v37, %v1317_v28  ;;  %v3334_v31 = vcombine.high %v1315_v37, %v1317_v28  ;;  %v1197_v20 = vrot.slane %v1193_v60, 4  ;;  %v1199_v56 = vsel %vm91_vm7, %v4122_v58, %v1198_v14 }
 0x616   :  { %v1394_v28 = vrot.slane %v4128_v13, 4  ;;  %v1397_v58 = vrot.slane %v4112_v51, 4 }
 0x617   :  { %1556 = vmatprep.subr.bf16.mxu0 %v3334_v31 }
 0x618   :  { %v1275_v29 = vpop.permute.xlu1 %1274  ;;  %1557 = vmatpush1.bf16.msra.mxu0 %v3333_v30  ;;  %v1165_v40 = vpop.permute.xlu0 %1164 }
 0x619   :  { %v1280_v57 = vrot.slane %v1275_v29, 4  ;;  %3549 = vmatprep.subr.msk.bf16.mxu0 %vm3547_vm14, %v3548_v26  ;;  %v1169_v44 = vrot.slane %v1165_v40, 4  ;;  %v1171_v26 = vsel %vm62_vm8, %v4126_v45, %v1170_v52 }
 0x61b   :  { %v1284_v53 = vsel %vm60_vm1, %v1280_v57, %v1281_v41  ;;  %v1395_v41 = vrot.slane %v4110_v47, 4  ;;  %v1366_v47 = vrot.slane %v4138_v27, 4 }
 0x61c   :  { %v1285_v32 = vsel %vm178_vm4, %v1275_v29, %v1284_v53  ;;  %v1247_v63 = vpop.permute.xlu1 %1246  ;;  %3552 = vmatpush1.bf16.msk.msra.mxu0 %vm3550_vm15, %v3551_v61  ;;  %v1361_v30 = vpop.permute.xlu0 %1360 }
 0x61d   :  { %v3329_v18 = vcombine.low %v1283_v33, %v1285_v32  ;;  %v1252_v62 = vrot.slane %v1247_v63, 4  ;;  %v3330_v55 = vcombine.high %v1283_v33, %v1285_v32  ;;  %v1398_v33 = vsel %vm60_vm1, %v1394_v28, %v1395_v41 }
 0x61e   :  { %v1367_v59 = vrot.slane %v1361_v30, 4  ;;  %v1399_v45 = vsel %vm298_vm9, %v4128_v13, %v1398_v33 }
 0x61f   :  { %v1256_v7 = vsel %vm60_vm1, %v1252_v62, %v1253_v4  ;;  %1560 = vmatprep.subr.bf16.mxu0 %v3330_v55 }
 0x620   :  { %v1257_v10 = vsel %vm149_vm5, %v1247_v63, %v1256_v7  ;;  %v1219_v8 = vpop.permute.xlu1 %1218  ;;  %1561 = vmatpush1.bf16.msra.mxu0 %v3329_v18  ;;  %v1365_v54 = vpop.permute.xlu0 %1364  ;;  %v1370_v62 = vsel %vm60_vm1, %v1366_v47, %v1367_v59 }
 0x621   :  { %v3327_v2 = vcombine.low %v1255_v1, %v1257_v10  ;;  %v1224_v11 = vrot.slane %v1219_v8, 4  ;;  %v3328_v34 = vcombine.high %v1255_v1, %v1257_v10  ;;  %v1369_v51 = vrot.slane %v1365_v54, 4 }
 0x622   :  { %v1371_v36 = vsel %vm269_vm10, %v4138_v27, %v1370_v62  ;;  %v1873_v62 = vld [vmem:[#allocation2 + $0xc] sm:$0xf] }
 0x623   :  { %v1228_v5 = vsel %vm60_vm1, %v1224_v11, %v1225_v12  ;;  %1562 = vmatprep.subr.bf16.mxu0 %v3328_v34  ;;  %v4201_v12 = vld [vmem:[%s4919_s1] sm:$0x3] }
 0x624   :  { %v1229_v16 = vsel %vm120_vm6, %v1219_v8, %v1228_v5  ;;  %v1191_v17 = vpop.permute.xlu1 %1190  ;;  %1563 = vmatpush1.bf16.msra.mxu0 %v3327_v2  ;;  %v3484_v8 = vld [vmem:[%s4920_s2 + $0x20] ss:$8 sps:$4 sm:$0xff]   ;;  %vm1597_vm12 = vcmp.lt.f32.partialorder %v4201_v12, 48.0 }
 0x625   :  { %v3325_v21 = vcombine.low %v1227_v48, %v1229_v16  ;;  %v1196_v22 = vrot.slane %v1191_v17, 4  ;;  %v3326_v37 = vcombine.high %v1227_v48, %v1229_v16  ;;  %vm1598_vm13 = vmand %vm496_vm11, %vm1597_vm12 }
 0x626   :  { %v1599_v27 = vsel %vm1598_vm13, 1, %v3600_v25 }
 0x627   :  { %v1200_v23 = vsel %vm60_vm1, %v1196_v22, %v1197_v20  ;;  %1564 = vmatprep.subr.bf16.mxu0 %v3326_v37  ;;  %v1603_v11 = vrot.slane %v1599_v27, %v3780_v38  ;;  %v1607_v34 = vrot.slane %v1599_v27, %v3782_v39 }
 0x628   :  { %v1201_v31 = vsel %vm91_vm7, %v1191_v17, %v1200_v23  ;;  %v1163_v43 = vpop.permute.xlu1 %1162  ;;  %1565 = vmatpush1.bf16.msra.mxu0 %v3325_v21 }
 0x629   :  { %v3323_v46 = vcombine.low %v1199_v56, %v1201_v31  ;;  %v1168_v49 = vrot.slane %v1163_v43, 4  ;;  %v3324_v29 = vcombine.high %v1199_v56, %v1201_v31  ;;  %vm4211_vm14 = vcmp.eq.s32.totalorder %v1603_v11, 1 }
 0x62a   :  { %vm4215_vm15 = vcmp.eq.s32.totalorder %v1607_v34, 1  ;;  %vm3558_vm13 = vmpackc.low %vm4211_vm14, %vm4211_vm14 }
 0x62b   :  { %v1172_v57 = vsel %vm60_vm1, %v1168_v49, %v1169_v44  ;;  %1566 = vmatprep.subr.bf16.mxu0 %v3324_v29  ;;  %vm3555_vm12 = vmpackc.low %vm4215_vm15, %vm4215_vm15 }
 0x62c   :  { %v1173_v53 = vsel %vm62_vm8, %v1163_v43, %v1172_v57  ;;  %v1391_v19 = vpop.permute.xlu1 %1390  ;;  %1567 = vmatpush1.bf16.msra.mxu0 %v3323_v46 }
 0x62d   :  { %v3321_v60 = vcombine.low %v1171_v26, %v1173_v53  ;;  %v1396_v32 = vrot.slane %v1391_v19, 4  ;;  %v3322_v63 = vcombine.high %v1171_v26, %v1173_v53  ;;  %v1440_v15 = vpop.permute.xlu0 %1439 }
 0x62f   :  { %v1400_v61 = vsel %vm60_vm1, %v1396_v32, %v1397_v58  ;;  %1568 = vmatprep.subr.bf16.mxu0 %v3322_v63 }
 0x630   :  { %v1401_v4 = vsel %vm298_vm9, %v1391_v19, %v1400_v61  ;;  %v1363_v18 = vpop.permute.xlu1 %1362  ;;  %1569 = vmatpush1.bf16.msra.mxu0 %v3321_v60 }
 0x631   :  { %v3339_v55 = vcombine.low %v1399_v45, %v1401_v4  ;;  %v1368_v1 = vrot.slane %v1363_v18, 4  ;;  %v3340_v7 = vcombine.high %v1399_v45, %v1401_v4 }
 0x633   :  { %v1372_v0 = vsel %vm60_vm1, %v1368_v1, %v1369_v51  ;;  %1582 = vmatprep.subr.bf16.mxu0 %v3340_v7  ;;  %v1845_v1 = vld [vmem:[#allocation2 + $0xc] sm:$0xf]  ;;  %v1847_v7 = vld [vmem:[#allocation2 + $0x1c] sm:$0xf] }
 0x634   :  { %1583 = vmatpush2.bf16.msra.mxu0 %v3339_v55  ;;  %v1373_v9 = vsel %vm269_vm10, %v1363_v18, %v1372_v0  ;;  %v1875_v55 = vld [vmem:[#allocation2 + $0x1c] sm:$0xf] }
 0x635   :  { %v3337_v10 = vcombine.low %v1371_v36, %v1373_v9  ;;  %v3338_v13 = vcombine.high %v1371_v36, %v1373_v9 }
 0x637   :  { %1584 = vmatprep.subr.bf16.mxu0 %v3338_v13 }
 0x638   :  { %1585 = vmatpush2.bf16.msra.mxu0 %v3337_v10 }
 0x63b   :  { %1587 = vmatmul.mubr.bf16.vlgmr.msra.gmra.mxu0 %v3484_v8 }
 0x63d   :  { %v1435_v2 = vpop.permute.xlu1 %1434 }
 0x6fb   :  { %v1588_v40 = vpop.f32.mrf.mxu0 }
 0x6fc   :  { %v4209_v48 = vadd.f32 %v1588_v40, %v1435_v2 }
 0x6fd   :  { %v1590_v42 = vpop.f32.mrf.mxu0 }
 0x6fe   :  { %v1591_v16 = vadd.f32 %v1590_v42, %v1435_v2  ;;  %v1610_v20 = vsel %vm4211_vm14, %v4209_v48, 0.0 }
 0x6ff   :  { %v1592_v17 = vpop.f32.mrf.mxu0  ;;  %v1622_v28 = vmul.f32 %v1610_v20, %v1610_v20 }
 0x700   :  { %v1611_v21 = vsel %vm4215_vm15, %v1591_v16, 0.0  ;;  %v4224_v22 = vadd.f32 %v1592_v17, %v1440_v15 }
 0x701   :  { %v1614_v37 = vadd.f32 %v1611_v21, %v1610_v20  ;;  %v1623_v23 = vmul.f32 %v1611_v21, %v1611_v21  ;;  %v1594_v56 = vpop.f32.mrf.mxu0 }
 0x702   :  { %v1595_v52 = vadd.f32 %v1594_v56, %v1440_v15  ;;  %v1612_v30 = vsel %vm4211_vm14, %v4224_v22, 0.0 }
 0x703   :  { %1615 = vadd.xlane.f32.xlu1 %v1614_v37  ;;  %v1626_v46 = vadd.f32 %v1623_v23, %v1622_v28  ;;  %v1624_v49 = vmul.f32 %v1612_v30, %v1612_v30 }
 0x704   :  { %v1613_v31 = vsel %vm4215_vm15, %v1595_v52, 0.0 }
 0x705   :  { %v1617_v43 = vadd.f32 %v1613_v31, %v1612_v30  ;;  %v1625_v44 = vmul.f32 %v1613_v31, %v1613_v31 }
 0x707   :  { %1627 = vadd.xlane.f32.xlu1 %v1626_v46  ;;  %1618 = vadd.xlane.f32.xlu0 %v1617_v43  ;;  %v1629_v29 = vadd.f32 %v1625_v44, %v1624_v49 }
 0x70b   :  { %1630 = vadd.xlane.f32.xlu0 %v1629_v29 }
 0x78c   :  { %v1616_v41 = vpop.xlane.xlu1 %1615 }
 0x78d   :  { %v1620_v57 = vmul.f32 0.011627907, %v1616_v41 }
 0x78f   :  { %v1634_v33 = vmul.f32 %v1620_v57, %v1620_v57  ;;  %v1645_v36 = vsub.f32 %v1591_v16, %v1620_v57 }
 0x790   :  { %v1628_v58 = vpop.xlane.xlu1 %1627  ;;  %v1619_v26 = vpop.xlane.xlu0 %1618 }
 0x791   :  { %v1632_v53 = vmul.f32 0.011627907, %v1628_v58  ;;  %v1621_v19 = vmul.f32 0.011627907, %v1619_v26  ;;  %v1929_v26 = vld [vmem:[#allocation2 + $0xc] sm:$0xf] }
 0x793   :  { %v1636_v54 = vsub.f32 %v1632_v53, %v1634_v33  ;;  %v1635_v32 = vmul.f32 %v1621_v19, %v1621_v19  ;;  %v1646_v8 = vsub.f32 %v4224_v22, %v1621_v19  ;;  %v1647_v27 = vsub.f32 %v1595_v52, %v1621_v19  ;;  %v1931_v33 = vld [vmem:[#allocation2 + $0x1c] sm:$0xf] }
 0x794   :  { %v1631_v59 = vpop.xlane.xlu0 %1630 }
 0x795   :  { %v1638_v60 = vadd.f32 1e-05, %v1636_v54  ;;  %v1633_v63 = vmul.f32 0.011627907, %v1631_v59 }
 0x797   :  { %3523 = vrsqrt.f32 %v1638_v60  ;;  %v1637_v47 = vsub.f32 %v1633_v63, %v1635_v32  ;;  %v1901_v63 = vld [vmem:[#allocation2 + $0xc] sm:$0xf] }
 0x799   :  { %v1639_v61 = vadd.f32 1e-05, %v1637_v47  ;;  %v3485_v47 = vld [vmem:[%s4920_s2 + $0x34] ss:$8 sps:$4 sm:$0xff]  }
 0x79a   :  { %3370 = vmatprep.mubr.msk.bf16.mxu1 %vm449_vm0, %v3485_v47 }
 0x79b   :  { %3525 = vrsqrt.f32 %v1639_v61  ;;  %v1903_v61 = vld [vmem:[#allocation2 + $0x1c] sm:$0xf] }
 0x7a4   :  { %v3524_v51 = vpop.eup %3523 }
 0x7a5   :  { %v1642_v45 = vmul.f32 %v3524_v51, %v4105_v50  ;;  %v4303_v51 = vld [vmem:[%s4921_s3 + $0x30] sm:$0xff] }
 0x7a7   :  { %1650 = vperm.xlu1 %3460, %v1642_v45   ;;  %v4308_v45 = vld [vmem:[%s4921_s3 + $0x38] sm:$0xff] }
 0x7a8   :  { %v3526_v4 = vpop.eup %3525 }
 0x7a9   :  { %v1643_v18 = vmul.f32 %v3526_v4, %v4098_v24 }
 0x7ab   :  { %3462 = vset.pattern.permute.xlu1 %v3601_v3  ;;  %1655 = vperm.xlu0 %3461, %v1643_v18  }
 0x7ac   :  { %1663 = vperm.xlu1 %3462, %v4105_v50   ;;  %v1644_v50 = vsub.f32 %v4209_v48, %v1620_v57 }
 0x7af   :  { %3463 = vset.pattern.permute.xlu0 %v3600_v25 }
 0x7b0   :  { %1667 = vperm.xlu1 %3462, %v4098_v24  }
 0x7b4   :  { %1882 = vrot.lane.b32.xlu1 %v1873_v62, %s3591_s13 }
 0x7b5   :  { %3464 = vset.pattern.permute.xlu1 %v3600_v25 }
 0x7b8   :  { %1886 = vrot.lane.b32.xlu1 %v1875_v55, %s3591_s13 }
 0x7bc   :  { %1854 = vrot.lane.b32.xlu1 %v1845_v1, %s3592_s0 }
 0x7c0   :  { %1858 = vrot.lane.b32.xlu1 %v1847_v7, %s3592_s0 }
 0x822   :  { %v1651_v0 = vpop.permute.xlu1 %1650 }
 0x823   :  { %v1658_v9 = vmul.f32 %v1651_v0, %v1644_v50  ;;  %v1659_v24 = vmul.f32 %v1651_v0, %v1645_v36 }
 0x826   :  { %v1656_v10 = vpop.permute.xlu0 %1655 }
 0x827   :  { %v1664_v13 = vpop.permute.xlu1 %1663  ;;  %v1660_v34 = vmul.f32 %v1656_v10, %v1646_v8  ;;  %v1661_v40 = vmul.f32 %v1656_v10, %v1647_v27 }
 0x828   :  { %v1670_v2 = vadd.f32 %v1664_v13, %v1658_v9  ;;  %v1671_v11 = vadd.f32 %v1664_v13, %v1659_v24 }
 0x82a   :  { %v1674_v42 = vmul.f32 0.01, %v1670_v2  ;;  %v1675_v15 = vmul.f32 0.01, %v1671_v11 }
 0x82b   :  { %v1668_v17 = vpop.permute.xlu1 %1667 }
 0x82c   :  { %v4244_v20 = vmax.f32 %v1670_v2, %v1674_v42  ;;  %v4246_v21 = vmax.f32 %v1671_v11, %v1675_v15  ;;  %v1672_v48 = vadd.f32 %v1668_v17, %v1660_v34  ;;  %v1673_v16 = vadd.f32 %v1668_v17, %v1661_v40 }
 0x82e   :  { %v1682_v37 = vsel %vm4211_vm14, %v4244_v20, 0.0  ;;  %v1683_v22 = vsel %vm4215_vm15, %v4246_v21, 0.0  ;;  %v1676_v23 = vmul.f32 0.01, %v1672_v48  ;;  %v1677_v56 = vmul.f32 0.01, %v1673_v16 }
 0x82f   :  { %v3427_v52 = vpack.c.bf16 %v1683_v22, %v1682_v37  ;;  %v1883_v4 = vpop.permute.xlu1 %1882 }
 0x830   :  { %v4254_v28 = vmax.f32 %v1672_v48, %v1676_v23  ;;  %v4256_v30 = vmax.f32 %v1673_v16, %v1677_v56  ;;  %v1889_v34 = vrot.slane %v1883_v4, 4 }
 0x831   :  { %1698 = vst [vmem:[#allocation2 + $0x4] sm:$0xff] %v3427_v52  ;;  %1880 = vrot.lane.b32.xlu1 %v3427_v52, %s3591_s13 }
 0x832   :  { %v1684_v31 = vsel %vm4211_vm14, %v4254_v28, 0.0  ;;  %v1685_v43 = vsel %vm4215_vm15, %v4256_v30, 0.0  ;;  %v3559_v14 = vpack.c.bf16 %v4254_v28, %v4244_v20  ;;  %vm2147_vm14 = vcmp.lt.f32.partialorder %v4201_v12, 49.0 }
 0x833   :  { %v3428_v44 = vpack.c.bf16 %v1685_v43, %v1684_v31  ;;  %v1887_v18 = vpop.permute.xlu1 %1886  ;;  %vm2148_vm15 = vmand %vm496_vm11, %vm2147_vm14 }
 0x834   :  { %v1891_v15 = vrot.slane %v1887_v18, 4 }
 0x835   :  { %1699 = vst [vmem:[#allocation2 + $0x14] sm:$0xff] %v3428_v44  ;;  %1852 = vrot.lane.b32.xlu1 %v3427_v52, %s3592_s0 }
 0x837   :  { %v1855_v62 = vpop.permute.xlu1 %1854 }
 0x838   :  { %v1812_v46 = vld [vmem:[#allocation2] sm:$0xff]  ;;  %v1813_v49 = vld [vmem:[#allocation2 + $0x8] sm:$0xf]  ;;  %v1861_v37 = vrot.slane %v1855_v62, 4  ;;  %v3556_v62 = vpack.c.bf16 %v4256_v30, %v4246_v21 }
 0x839   :  { %1820 = vrot.lane.b32.xlu0 %v1812_v46, %s3593_s14  ;;  %1822 = vrot.lane.b32.xlu1 %v1813_v49, %s3593_s14  ;;  %v1785_v29 = vld [vmem:[#allocation2 + $0x8] sm:$0xf] }
 0x83a   :  { %v1757_v41 = vld [vmem:[#allocation2 + $0x8] sm:$0xf] }
 0x83b   :  { %v1729_v57 = vld [vmem:[#allocation2 + $0x8] sm:$0xf]  ;;  %v1859_v55 = vpop.permute.xlu1 %1858 }
 0x83c   :  { %v1701_v58 = vld [vmem:[#allocation2 + $0x8] sm:$0xf]  ;;  %v1814_v53 = vld [vmem:[#allocation2 + $0x10] sm:$0xff]  ;;  %v1815_v19 = vld [vmem:[#allocation2 + $0x18] sm:$0xf]  ;;  %v1863_v23 = vrot.slane %v1859_v55, 4 }
 0x83d   :  { %1792 = vrot.lane.b32.xlu0 %v1812_v46, %s3594_s15  ;;  %1794 = vrot.lane.b32.xlu1 %v1785_v29, %s3594_s15  ;;  %v1787_v54 = vld [vmem:[#allocation2 + $0x18] sm:$0xf] }
 0x83e   :  { %v1759_v59 = vld [vmem:[#allocation2 + $0x18] sm:$0xf] }
 0x83f   :  { %v1731_v60 = vld [vmem:[#allocation2 + $0x18] sm:$0xf] }
 0x840   :  { %v1703_v32 = vld [vmem:[#allocation2 + $0x18] sm:$0xf] }
 0x841   :  { %1764 = vrot.lane.b32.xlu0 %v1812_v46, %s3595_s16  ;;  %1766 = vrot.lane.b32.xlu1 %v1757_v41, %s3595_s16 }
 0x845   :  { %1736 = vrot.lane.b32.xlu0 %v1812_v46, %s3596_s17  ;;  %1738 = vrot.lane.b32.xlu1 %v1729_v57, %s3596_s17 }
 0x849   :  { %1708 = vrot.lane.b32.xlu0 %v1812_v46, %s3597_s18  ;;  %1710 = vrot.lane.b32.xlu1 %v1701_v58, %s3597_s18 }
 0x84d   :  { %1936 = vrot.lane.b32.xlu0 %v3427_v52, %s3598_s19  ;;  %1884 = vrot.lane.b32.xlu1 %v3428_v44, %s3591_s13 }
 0x851   :  { %1856 = vrot.lane.b32.xlu0 %v3428_v44, %s3592_s0  ;;  %1938 = vrot.lane.b32.xlu1 %v1929_v26, %s3598_s19 }
 0x855   :  { %1908 = vrot.lane.b32.xlu0 %v3427_v52, %s3599_s22  ;;  %1942 = vrot.lane.b32.xlu1 %v1931_v33, %s3598_s19 }
 0x859   :  { %1824 = vrot.lane.b32.xlu0 %v1814_v53, %s3593_s14  ;;  %1826 = vrot.lane.b32.xlu1 %v1815_v19, %s3593_s14 }
 0x85d   :  { %1796 = vrot.lane.b32.xlu0 %v1814_v53, %s3594_s15  ;;  %1798 = vrot.lane.b32.xlu1 %v1787_v54, %s3594_s15 }
 0x861   :  { %1768 = vrot.lane.b32.xlu0 %v1814_v53, %s3595_s16  ;;  %1770 = vrot.lane.b32.xlu1 %v1759_v59, %s3595_s16 }
 0x865   :  { %1740 = vrot.lane.b32.xlu0 %v1814_v53, %s3596_s17  ;;  %1742 = vrot.lane.b32.xlu1 %v1731_v60, %s3596_s17 }
 0x869   :  { %1712 = vrot.lane.b32.xlu0 %v1814_v53, %s3597_s18  ;;  %1714 = vrot.lane.b32.xlu1 %v1703_v32, %s3597_s18 }
 0x86d   :  { %1940 = vrot.lane.b32.xlu0 %v3428_v44, %s3598_s19  ;;  %1910 = vrot.lane.b32.xlu1 %v1901_v63, %s3599_s22 }
 0x871   :  { %1912 = vrot.lane.b32.xlu0 %v3428_v44, %s3599_s22  ;;  %1914 = vrot.lane.b32.xlu1 %v1903_v61, %s3599_s22 }
 0x875   :  { %1984 = vperm.xlu0 %3463, %v4303_v51   ;;  %1989 = vperm.xlu1 %3464, %v4308_v45  }
 0x879   :  { %3466 = vset.pattern.permute.xlu1 %v3601_v3  ;;  %3465 = vset.pattern.permute.xlu0 %v3602_v6 }
 0x8a3   :  { %v1881_v1 = vpop.permute.xlu1 %1880 }
 0x8a4   :  { %v1888_v11 = vrot.slane %v1881_v1, 4 }
 0x8a6   :  { %v1892_v17 = vsel %vm60_vm1, %v1888_v11, %v1889_v34 }
 0x8a7   :  { %v1853_v7 = vpop.permute.xlu1 %1852  ;;  %v1893_v56 = vsel %vm240_vm2, %v1881_v1, %v1892_v17 }
 0x8a8   :  { %v1860_v48 = vrot.slane %v1853_v7, 4 }
 0x8aa   :  { %v1864_v44 = vsel %vm60_vm1, %v1860_v48, %v1861_v37 }
 0x8ab   :  { %v1821_v0 = vpop.permute.xlu0 %1820  ;;  %v1823_v50 = vpop.permute.xlu1 %1822  ;;  %v1865_v58 = vsel %vm211_vm3, %v1853_v7, %v1864_v44 }
 0x8ac   :  { %v1828_v57 = vrot.slane %v1821_v0, 4  ;;  %v1829_v26 = vrot.slane %v1823_v50, 4 }
 0x8ae   :  { %v1832_v32 = vsel %vm60_vm1, %v1828_v57, %v1829_v26 }
 0x8af   :  { %v4314_v36 = vpop.permute.xlu0 %1792  ;;  %v1795_v9 = vpop.permute.xlu1 %1794  ;;  %v1833_v1 = vsel %vm178_vm4, %v1821_v0, %v1832_v32 }
 0x8b0   :  { %v1800_v60 = vrot.slane %v4314_v36, 4  ;;  %v1801_v63 = vrot.slane %v1795_v9, 4 }
 0x8b2   :  { %v1804_v50 = vsel %vm60_vm1, %v1800_v60, %v1801_v63 }
 0x8b3   :  { %v4316_v24 = vpop.permute.xlu0 %1764  ;;  %v4318_v10 = vpop.permute.xlu1 %1766 }
 0x8b4   :  { %v1772_v7 = vrot.slane %v4316_v24, 4  ;;  %v1773_v9 = vrot.slane %v4318_v10, 4  ;;  %v1805_v10 = vsel %vm149_vm5, %v4314_v36, %v1804_v50 }
 0x8b6   :  { %v1776_v48 = vsel %vm60_vm1, %v1772_v7, %v1773_v9 }
 0x8b7   :  { %v4320_v13 = vpop.permute.xlu0 %1736  ;;  %v4322_v8 = vpop.permute.xlu1 %1738  ;;  %v1777_v36 = vsel %vm120_vm6, %v4316_v24, %v1776_v48 }
 0x8b8   :  { %v1744_v5 = vrot.slane %v4320_v13, 4 }
 0x8bb   :  { %v4324_v27 = vpop.permute.xlu0 %1708  ;;  %v4326_v2 = vpop.permute.xlu1 %1710 }
 0x8bc   :  { %v1716_v44 = vrot.slane %v4324_v27, 4 }
 0x8bf   :  { %v4328_v40 = vpop.permute.xlu0 %1936  ;;  %v1885_v42 = vpop.permute.xlu1 %1884 }
 0x8c0   :  { %v1890_v16 = vrot.slane %v1885_v42, 4 }
 0x8c2   :  { %v1894_v22 = vsel %vm60_vm1, %v1890_v16, %v1891_v15  ;;  %v1745_v16 = vrot.slane %v4322_v8, 4  ;;  %v1717_v8 = vrot.slane %v4326_v2, 4 }
 0x8c3   :  { %v1857_v52 = vpop.permute.xlu0 %1856  ;;  %v1895_v31 = vsel %vm240_vm2, %v1885_v42, %v1894_v22  ;;  %v4334_v43 = vpop.permute.xlu1 %1938 }
 0x8c4   :  { %v1862_v46 = vrot.slane %v1857_v52, 4  ;;  %v3364_v49 = vcombine.low %v1893_v56, %v1895_v31  ;;  %v3365_v29 = vcombine.high %v1893_v56, %v1895_v31  ;;  %v1720_v24 = vsel %vm60_vm1, %v1716_v44, %v1717_v8 }
 0x8c6   :  { %v1866_v41 = vsel %vm60_vm1, %v1862_v46, %v1863_v23  ;;  %2104 = vmatprep.subr.bf16.mxu1 %v3365_v29  ;;  %v1748_v46 = vsel %vm60_vm1, %v1744_v5, %v1745_v16 }
 0x8c7   :  { %v1867_v33 = vsel %vm211_vm3, %v1857_v52, %v1866_v41  ;;  %v4340_v53 = vpop.permute.xlu0 %1908  ;;  %2105 = vmatpush1.bf16.msra.mxu1 %v3364_v49  ;;  %v4342_v19 = vpop.permute.xlu1 %1942  ;;  %v1749_v2 = vsel %vm91_vm7, %v4320_v13, %v1748_v46  ;;  %v1721_v13 = vsel %vm62_vm8, %v4324_v27, %v1720_v24 }
 0x8c8   :  { %v3362_v54 = vcombine.low %v1865_v58, %v1867_v33  ;;  %v3363_v59 = vcombine.high %v1865_v58, %v1867_v33 }
 0x8ca   :  { %2106 = vmatprep.subr.bf16.mxu1 %v3363_v59  ;;  %v1945_v59 = vrot.slane %v4334_v43, 4  ;;  %v1947_v43 = vrot.slane %v4342_v19, 4 }
 0x8cb   :  { %v1825_v47 = vpop.permute.xlu0 %1824  ;;  %v1827_v61 = vpop.permute.xlu1 %1826  ;;  %2107 = vmatpush1.bf16.msra.mxu1 %v3362_v54 }
 0x8cc   :  { %v1830_v4 = vrot.slane %v1825_v47, 4  ;;  %v1831_v18 = vrot.slane %v1827_v61, 4  ;;  %3557 = vmatprep.subr.msk.bf16.mxu1 %vm3555_vm12, %v3556_v62  ;;  %v1944_v62 = vrot.slane %v4328_v40, 4 }
 0x8ce   :  { %v1834_v55 = vsel %vm60_vm1, %v1830_v4, %v1831_v18 }
 0x8cf   :  { %v1797_v11 = vpop.permute.xlu0 %1796  ;;  %v1799_v34 = vpop.permute.xlu1 %1798  ;;  %3560 = vmatpush1.bf16.msk.msra.mxu1 %vm3558_vm13, %v3559_v14  ;;  %v1835_v21 = vsel %vm178_vm4, %v1825_v47, %v1834_v55 }
 0x8d0   :  { %v1802_v30 = vrot.slane %v1797_v11, 4  ;;  %v1803_v0 = vrot.slane %v1799_v34, 4  ;;  %v3358_v42 = vcombine.low %v1833_v1, %v1835_v21  ;;  %v3359_v15 = vcombine.high %v1833_v1, %v1835_v21 }
 0x8d1   :  { %v1948_v1 = vsel %vm60_vm1, %v1944_v62, %v1945_v59 }
 0x8d2   :  { %v1806_v17 = vsel %vm60_vm1, %v1802_v30, %v1803_v0  ;;  %2110 = vmatprep.subr.bf16.mxu1 %v3359_v15  ;;  %v1916_v30 = vrot.slane %v4340_v53, 4  ;;  %v1949_v19 = vsel %vm298_vm9, %v4328_v40, %v1948_v1 }
 0x8d3   :  { %v1769_v20 = vpop.permute.xlu0 %1768  ;;  %v1771_v28 = vpop.permute.xlu1 %1770  ;;  %2111 = vmatpush1.bf16.msra.mxu1 %v3358_v42  ;;  %v1807_v37 = vsel %vm149_vm5, %v1797_v11, %v1806_v17 }
 0x8d4   :  { %v1774_v22 = vrot.slane %v1769_v20, 4  ;;  %v1775_v23 = vrot.slane %v1771_v28, 4  ;;  %v3356_v56 = vcombine.low %v1805_v10, %v1807_v37  ;;  %v3357_v52 = vcombine.high %v1805_v10, %v1807_v37 }
 0x8d6   :  { %v1778_v31 = vsel %vm60_vm1, %v1774_v22, %v1775_v23  ;;  %2112 = vmatprep.subr.bf16.mxu1 %v3357_v52  ;;  %v3487_v23 = vld [vmem:[%s4920_s2 + $0x30] ss:$8 sps:$4 sm:$0xff]  }
 0x8d7   :  { %v1741_v49 = vpop.permute.xlu0 %1740  ;;  %v1743_v29 = vpop.permute.xlu1 %1742  ;;  %2113 = vmatpush1.bf16.msra.mxu1 %v3356_v56  ;;  %v1779_v41 = vsel %vm120_vm6, %v1769_v20, %v1778_v31 }
 0x8d8   :  { %v1746_v57 = vrot.slane %v1741_v49, 4  ;;  %v1747_v58 = vrot.slane %v1743_v29, 4  ;;  %v3354_v26 = vcombine.low %v1777_v36, %v1779_v41  ;;  %v3355_v33 = vcombine.high %v1777_v36, %v1779_v41 }
 0x8da   :  { %v1750_v54 = vsel %vm60_vm1, %v1746_v57, %v1747_v58  ;;  %2114 = vmatprep.subr.bf16.mxu1 %v3355_v33 }
 0x8db   :  { %v1713_v60 = vpop.permute.xlu0 %1712  ;;  %v1715_v32 = vpop.permute.xlu1 %1714  ;;  %2115 = vmatpush1.bf16.msra.mxu1 %v3354_v26  ;;  %v1751_v63 = vsel %vm91_vm7, %v1741_v49, %v1750_v54 }
 0x8dc   :  { %v1718_v47 = vrot.slane %v1713_v60, 4  ;;  %v1719_v61 = vrot.slane %v1715_v32, 4  ;;  %v3352_v4 = vcombine.low %v1749_v2, %v1751_v63  ;;  %v3353_v18 = vcombine.high %v1749_v2, %v1751_v63 }
 0x8de   :  { %v1722_v55 = vsel %vm60_vm1, %v1718_v47, %v1719_v61  ;;  %2116 = vmatprep.subr.bf16.mxu1 %v3353_v18 }
 0x8df   :  { %v1941_v7 = vpop.permute.xlu0 %1940  ;;  %v1911_v50 = vpop.permute.xlu1 %1910  ;;  %2117 = vmatpush1.bf16.msra.mxu1 %v3352_v4  ;;  %v1723_v9 = vsel %vm62_vm8, %v1713_v60, %v1722_v55 }
 0x8e0   :  { %v1946_v11 = vrot.slane %v1941_v7, 4  ;;  %v1917_v34 = vrot.slane %v1911_v50, 4  ;;  %v3350_v14 = vcombine.low %v1721_v13, %v1723_v9  ;;  %v3351_v21 = vcombine.high %v1721_v13, %v1723_v9 }
 0x8e2   :  { %v1950_v0 = vsel %vm60_vm1, %v1946_v11, %v1947_v43  ;;  %2118 = vmatprep.subr.bf16.mxu1 %v3351_v21  ;;  %v1920_v17 = vsel %vm60_vm1, %v1916_v30, %v1917_v34 }
 0x8e3   :  { %v1951_v42 = vsel %vm298_vm9, %v1941_v7, %v1950_v0  ;;  %v1913_v15 = vpop.permute.xlu0 %1912  ;;  %v1915_v27 = vpop.permute.xlu1 %1914  ;;  %2119 = vmatpush1.bf16.msra.mxu1 %v3350_v14  ;;  %v1921_v28 = vsel %vm269_vm10, %v4340_v53, %v1920_v17  ;;  %v2149_v53 = vsel %vm2148_vm15, 1, %v3600_v25 }
 0x8e4   :  { %v3368_v10 = vcombine.low %v1949_v19, %v1951_v42  ;;  %v3369_v5 = vcombine.high %v1949_v19, %v1951_v42  ;;  %v1918_v48 = vrot.slane %v1913_v15, 4  ;;  %v1919_v16 = vrot.slane %v1915_v27, 4  ;;  %v2423_v27 = vld [vmem:[#allocation2 + $0xc] sm:$0xf] }
 0x8e5   :  { %v2153_v56 = vrot.slane %v2149_v53, %v3780_v38  ;;  %v2157_v31 = vrot.slane %v2149_v53, %v3782_v39 }
 0x8e6   :  { %v1922_v20 = vsel %vm60_vm1, %v1918_v48, %v1919_v16  ;;  %2132 = vmatprep.subr.bf16.mxu1 %v3369_v5  ;;  %v2395_v5 = vld [vmem:[#allocation2 + $0xc] sm:$0xf]  ;;  %v2397_v48 = vld [vmem:[#allocation2 + $0x1c] sm:$0xf] }
 0x8e7   :  { %2133 = vmatpush2.bf16.msra.mxu1 %v3368_v10  ;;  %v1923_v40 = vsel %vm269_vm10, %v1913_v15, %v1922_v20  ;;  %vm4411_vm12 = vcmp.eq.s32.totalorder %v2153_v56, 1  ;;  %vm4415_vm13 = vcmp.eq.s32.totalorder %v2157_v31, 1  ;;  %v2425_v10 = vld [vmem:[#allocation2 + $0x1c] sm:$0xf] }
 0x8e8   :  { %v3366_v37 = vcombine.low %v1921_v28, %v1923_v40  ;;  %v3367_v22 = vcombine.high %v1921_v28, %v1923_v40  ;;  %vm3566_vm14 = vmpackc.low %vm4411_vm12, %vm4411_vm12 }
 0x8ea   :  { %2134 = vmatprep.subr.bf16.mxu1 %v3367_v22 }
 0x8eb   :  { %2135 = vmatpush2.bf16.msra.mxu1 %v3366_v37 }
 0x8ee   :  { %2137 = vmatmul.mubr.bf16.vlgmr.msra.gmra.mxu1 %v3487_v23 }
 0x8ef   :  { %2988 = vmatprep.mubr.bf16.mxu1 %v3600_v25 }
 0x8f0   :  { %v1985_v52 = vpop.permute.xlu0 %1984  ;;  %v1990_v49 = vpop.permute.xlu1 %1989 }
 0x9ae   :  { %v2138_v36 = vpop.f32.mrf.mxu1 }
 0x9af   :  { %v4409_v44 = vadd.f32 %v2138_v36, %v1985_v52 }
 0x9b0   :  { %v2140_v8 = vpop.f32.mrf.mxu1 }
 0x9b1   :  { %v4419_v29 = vadd.f32 %v2140_v8, %v1985_v52  ;;  %v2160_v57 = vsel %vm4411_vm12, %v4409_v44, 0.0 }
 0x9b2   :  { %v2142_v41 = vpop.f32.mrf.mxu1  ;;  %v2172_v61 = vmul.f32 %v2160_v57, %v2160_v57 }
 0x9b3   :  { %v2161_v58 = vsel %vm4415_vm13, %v4419_v29, 0.0  ;;  %v4427_v26 = vadd.f32 %v2142_v41, %v1990_v49 }
 0x9b4   :  { %v2164_v33 = vadd.f32 %v2161_v58, %v2160_v57  ;;  %v2144_v54 = vpop.f32.mrf.mxu1  ;;  %v2173_v32 = vmul.f32 %v2161_v58, %v2161_v58 }
 0x9b5   :  { %v2162_v24 = vsel %vm4411_vm12, %v4427_v26, 0.0  ;;  %v2145_v59 = vadd.f32 %v2144_v54, %v1990_v49 }
 0x9b6   :  { %2165 = vadd.xlane.f32.xlu1 %v2164_v33  ;;  %v2174_v2 = vmul.f32 %v2162_v24, %v2162_v24  ;;  %v2176_v18 = vadd.f32 %v2173_v32, %v2172_v61 }
 0x9b7   :  { %v2163_v60 = vsel %vm4415_vm13, %v2145_v59, 0.0 }
 0x9b8   :  { %v2167_v63 = vadd.f32 %v2163_v60, %v2162_v24  ;;  %v2175_v47 = vmul.f32 %v2163_v60, %v2163_v60 }
 0x9ba   :  { %2168 = vadd.xlane.f32.xlu0 %v2167_v63  ;;  %v2179_v4 = vadd.f32 %v2175_v47, %v2174_v2 }
 0x9bc   :  { %2180 = vadd.xlane.f32.xlu1 %v2179_v4 }
 0x9be   :  { %2177 = vadd.xlane.f32.xlu0 %v2176_v18 }
 0x9cd   :  { %2213 = vperm.xlu1 %3466, %v4303_v51  }
 0x9d1   :  { %3467 = vset.pattern.permute.xlu1 %v3602_v6 }
 0xa3f   :  { %v2166_v62 = vpop.xlane.xlu1 %2165 }
 0xa40   :  { %v2170_v1 = vmul.f32 0.011363637, %v2166_v62 }
 0xa42   :  { %v2184_v34 = vmul.f32 %v2170_v1, %v2170_v1  ;;  %v2195_v20 = vsub.f32 %v4419_v29, %v2170_v1 }
 0xa43   :  { %v2169_v55 = vpop.xlane.xlu0 %2168 }
 0xa44   :  { %v2171_v43 = vmul.f32 0.011363637, %v2169_v55 }
 0xa45   :  { %v2181_v7 = vpop.xlane.xlu1 %2180 }
 0xa46   :  { %v2183_v50 = vmul.f32 0.011363637, %v2181_v7  ;;  %v2185_v13 = vmul.f32 %v2171_v43, %v2171_v43  ;;  %v2196_v28 = vsub.f32 %v4427_v26, %v2171_v43  ;;  %v2197_v40 = vsub.f32 %v2145_v59, %v2171_v43  ;;  %v2481_v43 = vld [vmem:[#allocation2 + $0x1c] sm:$0xf] }
 0xa47   :  { %v2178_v9 = vpop.xlane.xlu0 %2177 }
 0xa48   :  { %v2187_v11 = vsub.f32 %v2183_v50, %v2185_v13  ;;  %v2182_v14 = vmul.f32 0.011363637, %v2178_v9 }
 0xa4a   :  { %v2189_v21 = vadd.f32 1e-05, %v2187_v11  ;;  %v2186_v30 = vsub.f32 %v2182_v14, %v2184_v34  ;;  %v2451_v14 = vld [vmem:[#allocation2 + $0xc] sm:$0xf] }
 0xa4c   :  { %3527 = vrsqrt.f32 %v2189_v21  ;;  %v2188_v0 = vadd.f32 1e-05, %v2186_v30  ;;  %v3488_v21 = vld [vmem:[%s4920_s2 + $0x44] ss:$8 sps:$4 sm:$0xff]   ;;  %v2453_v30 = vld [vmem:[#allocation2 + $0x1c] sm:$0xf] }
 0xa4d   :  { %3399 = vmatprep.mubr.msk.bf16.mxu0 %vm449_vm0, %v3488_v21 }
 0xa4e   :  { %3529 = vrsqrt.f32 %v2188_v0  ;;  %v4508_v0 = vld [vmem:[%s4921_s3 + $0x40] sm:$0xff] }
 0xa59   :  { %v3528_v19 = vpop.eup %3527 }
 0xa5a   :  { %v2193_v42 = vmul.f32 %v3528_v19, %v4308_v45  ;;  %v4513_v19 = vld [vmem:[%s4921_s3 + $0x48] sm:$0xff] }
 0xa5b   :  { %v3530_v15 = vpop.eup %3529 }
 0xa5c   :  { %2205 = vperm.xlu1 %3467, %v2193_v42   ;;  %v2192_v17 = vmul.f32 %v3530_v15, %v4303_v51  ;;  %v2214_v51 = vpop.permute.xlu1 %2213 }
 0xa5e   :  { %2200 = vperm.xlu0 %3465, %v2192_v17  }
 0xa60   :  { %3468 = vset.pattern.permute.xlu1 %v3601_v3 }
 0xa61   :  { %2217 = vperm.xlu1 %3468, %v4308_v45   ;;  %v2194_v45 = vsub.f32 %v4409_v44, %v2170_v1  ;;  %v2479_v1 = vld [vmem:[#allocation2 + $0xc] sm:$0xf] }
 0xa62   :  { %3469 = vset.pattern.permute.xlu0 %v3600_v25 }
 0xa65   :  { %2432 = vrot.lane.b32.xlu1 %v2423_v27, %s3591_s13 }
 0xa66   :  { %3470 = vset.pattern.permute.xlu1 %v3600_v25 }
 0xa69   :  { %2436 = vrot.lane.b32.xlu1 %v2425_v10, %s3591_s13 }
 0xa6d   :  { %2404 = vrot.lane.b32.xlu1 %v2395_v5, %s3592_s0 }
 0xa71   :  { %2408 = vrot.lane.b32.xlu1 %v2397_v48, %s3592_s0 }
 0xad7   :  { %v2206_v16 = vpop.permute.xlu1 %2205 }
 0xad8   :  { %v2210_v53 = vmul.f32 %v2206_v16, %v2196_v28  ;;  %v2211_v56 = vmul.f32 %v2206_v16, %v2197_v40 }
 0xad9   :  { %v2201_v37 = vpop.permute.xlu0 %2200 }
 0xada   :  { %v2208_v22 = vmul.f32 %v2201_v37, %v2194_v45  ;;  %v2209_v23 = vmul.f32 %v2201_v37, %v2195_v20 }
 0xadc   :  { %v2220_v52 = vadd.f32 %v2214_v51, %v2208_v22  ;;  %v2221_v31 = vadd.f32 %v2214_v51, %v2209_v23  ;;  %v2218_v36 = vpop.permute.xlu1 %2217 }
 0xadd   :  { %v2222_v8 = vadd.f32 %v2218_v36, %v2210_v53  ;;  %v2223_v49 = vadd.f32 %v2218_v36, %v2211_v56 }
 0xade   :  { %v2224_v41 = vmul.f32 0.01, %v2220_v52  ;;  %v2225_v57 = vmul.f32 0.01, %v2221_v31 }
 0xadf   :  { %v2226_v58 = vmul.f32 0.01, %v2222_v8  ;;  %v2227_v33 = vmul.f32 0.01, %v2223_v49 }
 0xae0   :  { %v4449_v44 = vmax.f32 %v2220_v52, %v2224_v41  ;;  %v4451_v29 = vmax.f32 %v2221_v31, %v2225_v57  ;;  %v2433_v42 = vpop.permute.xlu1 %2432 }
 0xae1   :  { %v4453_v26 = vmax.f32 %v2222_v8, %v2226_v58  ;;  %v4455_v54 = vmax.f32 %v2223_v49, %v2227_v33  ;;  %v2439_v56 = vrot.slane %v2433_v42, 4 }
 0xae2   :  { %v2232_v24 = vsel %vm4411_vm12, %v4449_v44, 0.0  ;;  %v2233_v59 = vsel %vm4415_vm13, %v4451_v29, 0.0 }
 0xae3   :  { %v3429_v60 = vpack.c.bf16 %v2233_v59, %v2232_v24  ;;  %v2234_v32 = vsel %vm4411_vm12, %v4453_v26, 0.0  ;;  %v2235_v2 = vsel %vm4415_vm13, %v4455_v54, 0.0  ;;  %v3567_v12 = vpack.c.bf16 %v4453_v26, %v4449_v44 }
 0xae4   :  { %v3430_v63 = vpack.c.bf16 %v2235_v2, %v2234_v32  ;;  %v2437_v15 = vpop.permute.xlu1 %2436 }
 0xae5   :  { %2248 = vst [vmem:[#allocation2 + $0x4] sm:$0xff] %v3429_v60  ;;  %2430 = vrot.lane.b32.xlu1 %v3429_v60, %s3591_s13  ;;  %2402 = vrot.lane.b32.xlu0 %v3429_v60, %s3592_s0  ;;  %v2441_v36 = vrot.slane %v2437_v15, 4  ;;  %v3564_v15 = vpack.c.bf16 %v4455_v54, %v4451_v29 }
 0xae6   :  { %2249 = vst [vmem:[#allocation2 + $0x14] sm:$0xff] %v3430_v63 }
 0xae8   :  { %v2405_v17 = vpop.permute.xlu1 %2404 }
 0xae9   :  { %v2411_v57 = vrot.slane %v2405_v17, 4 }
 0xaec   :  { %v2363_v47 = vld [vmem:[#allocation2 + $0x8] sm:$0xf]  ;;  %v2362_v61 = vld [vmem:[#allocation2] sm:$0xff]  ;;  %v2409_v27 = vpop.permute.xlu1 %2408 }
 0xaed   :  { %2372 = vrot.lane.b32.xlu1 %v2363_v47, %s3593_s14  ;;  %2370 = vrot.lane.b32.xlu0 %v2362_v61, %s3593_s14  ;;  %v2335_v4 = vld [vmem:[#allocation2 + $0x8] sm:$0xf]  ;;  %v2365_v7 = vld [vmem:[#allocation2 + $0x18] sm:$0xf]  ;;  %v2364_v50 = vld [vmem:[#allocation2 + $0x10] sm:$0xff]  ;;  %v2413_v33 = vrot.slane %v2409_v27, 4 }
 0xaee   :  { %v2307_v18 = vld [vmem:[#allocation2 + $0x8] sm:$0xf]  ;;  %v2337_v13 = vld [vmem:[#allocation2 + $0x18] sm:$0xf] }
 0xaef   :  { %v2279_v62 = vld [vmem:[#allocation2 + $0x8] sm:$0xf]  ;;  %v2309_v9 = vld [vmem:[#allocation2 + $0x18] sm:$0xf] }
 0xaf0   :  { %v2251_v55 = vld [vmem:[#allocation2 + $0x8] sm:$0xf]  ;;  %v2281_v11 = vld [vmem:[#allocation2 + $0x18] sm:$0xf] }
 0xaf1   :  { %2344 = vrot.lane.b32.xlu1 %v2335_v4, %s3594_s15  ;;  %2342 = vrot.lane.b32.xlu0 %v2362_v61, %s3594_s15  ;;  %v2253_v34 = vld [vmem:[#allocation2 + $0x18] sm:$0xf] }
 0xaf5   :  { %2316 = vrot.lane.b32.xlu1 %v2307_v18, %s3595_s16  ;;  %2314 = vrot.lane.b32.xlu0 %v2362_v61, %s3595_s16 }
 0xaf9   :  { %2288 = vrot.lane.b32.xlu1 %v2279_v62, %s3596_s17  ;;  %2286 = vrot.lane.b32.xlu0 %v2362_v61, %s3596_s17 }
 0xafd   :  { %2260 = vrot.lane.b32.xlu1 %v2251_v55, %s3597_s18  ;;  %2258 = vrot.lane.b32.xlu0 %v2362_v61, %s3597_s18 }
 0xb01   :  { %2434 = vrot.lane.b32.xlu1 %v3430_v63, %s3591_s13  ;;  %2486 = vrot.lane.b32.xlu0 %v3429_v60, %s3598_s19 }
 0xb05   :  { %2488 = vrot.lane.b32.xlu1 %v2479_v1, %s3598_s19  ;;  %2406 = vrot.lane.b32.xlu0 %v3430_v63, %s3592_s0 }
 0xb09   :  { %2492 = vrot.lane.b32.xlu1 %v2481_v43, %s3598_s19  ;;  %2458 = vrot.lane.b32.xlu0 %v3429_v60, %s3599_s22 }
 0xb0d   :  { %2376 = vrot.lane.b32.xlu1 %v2365_v7, %s3593_s14  ;;  %2374 = vrot.lane.b32.xlu0 %v2364_v50, %s3593_s14 }
 0xb11   :  { %2348 = vrot.lane.b32.xlu1 %v2337_v13, %s3594_s15  ;;  %2346 = vrot.lane.b32.xlu0 %v2364_v50, %s3594_s15 }
 0xb15   :  { %2320 = vrot.lane.b32.xlu1 %v2309_v9, %s3595_s16  ;;  %2318 = vrot.lane.b32.xlu0 %v2364_v50, %s3595_s16 }
 0xb19   :  { %2292 = vrot.lane.b32.xlu1 %v2281_v11, %s3596_s17  ;;  %2290 = vrot.lane.b32.xlu0 %v2364_v50, %s3596_s17 }
 0xb1d   :  { %2264 = vrot.lane.b32.xlu1 %v2253_v34, %s3597_s18  ;;  %2262 = vrot.lane.b32.xlu0 %v2364_v50, %s3597_s18 }
 0xb21   :  { %2460 = vrot.lane.b32.xlu1 %v2451_v14, %s3599_s22  ;;  %2490 = vrot.lane.b32.xlu0 %v3430_v63, %s3598_s19 }
 0xb25   :  { %2464 = vrot.lane.b32.xlu1 %v2453_v30, %s3599_s22  ;;  %2462 = vrot.lane.b32.xlu0 %v3430_v63, %s3599_s22 }
 0xb29   :  { %2534 = vperm.xlu0 %3469, %v4508_v0   ;;  %2539 = vperm.xlu1 %3470, %v4513_v19  }
 0xb2d   :  { %3472 = vset.pattern.permute.xlu1 %v3601_v3  ;;  %3471 = vset.pattern.permute.xlu0 %v3602_v6 }
 0xb57   :  { %v2431_v10 = vpop.permute.xlu1 %2430  ;;  %v2403_v5 = vpop.permute.xlu0 %2402 }
 0xb58   :  { %v2438_v53 = vrot.slane %v2431_v10, 4  ;;  %v2410_v49 = vrot.slane %v2403_v5, 4 }
 0xb5a   :  { %v2442_v8 = vsel %vm60_vm1, %v2438_v53, %v2439_v56  ;;  %v2414_v2 = vsel %vm60_vm1, %v2410_v49, %v2411_v57 }
 0xb5b   :  { %v2443_v24 = vsel %vm240_vm2, %v2431_v10, %v2442_v8  ;;  %v2415_v18 = vsel %vm211_vm3, %v2403_v5, %v2414_v2 }
 0xb5f   :  { %v2373_v48 = vpop.permute.xlu1 %2372  ;;  %v2371_v51 = vpop.permute.xlu0 %2370 }
 0xb60   :  { %v2379_v62 = vrot.slane %v2373_v48, 4  ;;  %v2378_v55 = vrot.slane %v2371_v51, 4 }
 0xb62   :  { %v2382_v9 = vsel %vm60_vm1, %v2378_v55, %v2379_v62 }
 0xb63   :  { %v2345_v16 = vpop.permute.xlu1 %2344  ;;  %v4519_v45 = vpop.permute.xlu0 %2342  ;;  %v2383_v17 = vsel %vm178_vm4, %v2371_v51, %v2382_v9 }
 0xb64   :  { %v2351_v11 = vrot.slane %v2345_v16, 4  ;;  %v2350_v34 = vrot.slane %v4519_v45, 4 }
 0xb66   :  { %v2354_v10 = vsel %vm60_vm1, %v2350_v34, %v2351_v11 }
 0xb67   :  { %v4521_v20 = vpop.permute.xlu1 %2316  ;;  %v4523_v28 = vpop.permute.xlu0 %2314 }
 0xb68   :  { %v2323_v5 = vrot.slane %v4521_v20, 4  ;;  %v2322_v48 = vrot.slane %v4523_v28, 4  ;;  %v2355_v20 = vsel %vm149_vm5, %v4519_v45, %v2354_v10 }
 0xb6a   :  { %v2326_v8 = vsel %vm60_vm1, %v2322_v48, %v2323_v5 }
 0xb6b   :  { %v4525_v40 = vpop.permute.xlu1 %2288  ;;  %v4527_v37 = vpop.permute.xlu0 %2286  ;;  %v2327_v45 = vsel %vm120_vm6, %v4523_v28, %v2326_v8 }
 0xb6c   :  { %v2295_v46 = vrot.slane %v4525_v40, 4  ;;  %v2294_v49 = vrot.slane %v4527_v37, 4 }
 0xb6f   :  { %v4529_v22 = vpop.permute.xlu1 %2260  ;;  %v4531_v23 = vpop.permute.xlu0 %2258 }
 0xb70   :  { %v2267_v40 = vrot.slane %v4529_v22, 4  ;;  %v2266_v2 = vrot.slane %v4531_v23, 4 }
 0xb73   :  { %v2435_v52 = vpop.permute.xlu1 %2434  ;;  %v4533_v31 = vpop.permute.xlu0 %2486 }
 0xb74   :  { %v2440_v41 = vrot.slane %v2435_v52, 4 }
 0xb76   :  { %v2444_v58 = vsel %vm60_vm1, %v2440_v41, %v2441_v36 }
 0xb77   :  { %v2445_v59 = vsel %vm240_vm2, %v2435_v52, %v2444_v58  ;;  %v4539_v60 = vpop.permute.xlu1 %2488  ;;  %v2407_v32 = vpop.permute.xlu0 %2406  ;;  %vm3563_vm2 = vmpackc.low %vm4415_vm13, %vm4415_vm13 }
 0xb78   :  { %v3393_v63 = vcombine.low %v2443_v24, %v2445_v59  ;;  %v3394_v47 = vcombine.high %v2443_v24, %v2445_v59  ;;  %v2412_v61 = vrot.slane %v2407_v32, 4  ;;  %v2495_v22 = vrot.slane %v4539_v60, 4 }
 0xb7a   :  { %v2416_v4 = vsel %vm60_vm1, %v2412_v61, %v2413_v33  ;;  %2654 = vmatprep.subr.bf16.mxu0 %v3394_v47 }
 0xb7b   :  { %v2417_v1 = vsel %vm211_vm3, %v2407_v32, %v2416_v4  ;;  %2655 = vmatpush1.bf16.msra.mxu0 %v3393_v63  ;;  %v4545_v43 = vpop.permute.xlu1 %2492  ;;  %v4547_v7 = vpop.permute.xlu0 %2458  ;;  %v2298_v32 = vsel %vm60_vm1, %v2294_v49, %v2295_v46 }
 0xb7c   :  { %v3391_v50 = vcombine.low %v2415_v18, %v2417_v1  ;;  %v3392_v13 = vcombine.high %v2415_v18, %v2417_v1  ;;  %v2299_v1 = vsel %vm91_vm7, %v4527_v37, %v2298_v32  ;;  %v2497_v60 = vrot.slane %v4545_v43, 4 }
 0xb7e   :  { %2656 = vmatprep.subr.bf16.mxu0 %v3392_v13 }
 0xb7f   :  { %v2377_v14 = vpop.permute.xlu1 %2376  ;;  %2657 = vmatpush1.bf16.msra.mxu0 %v3391_v50  ;;  %v2375_v21 = vpop.permute.xlu0 %2374  ;;  %v2270_v50 = vsel %vm60_vm1, %v2266_v2, %v2267_v40  ;;  %v3603_v40 = vmov 0.0  }
 0xb80   :  { %v2381_v30 = vrot.slane %v2377_v14, 4  ;;  %v2380_v42 = vrot.slane %v2375_v21, 4  ;;  %3565 = vmatprep.subr.msk.bf16.mxu0 %vm3563_vm2, %v3564_v15  ;;  %v2271_v37 = vsel %vm62_vm8, %v4531_v23, %v2270_v50 }
 0xb82   :  { %v2384_v27 = vsel %vm60_vm1, %v2380_v42, %v2381_v30  ;;  %v2494_v42 = vrot.slane %v4533_v31, 4 }
 0xb83   :  { %v2385_v16 = vsel %vm178_vm4, %v2375_v21, %v2384_v27  ;;  %v2349_v53 = vpop.permute.xlu1 %2348  ;;  %3568 = vmatpush1.bf16.msk.msra.mxu0 %vm3566_vm14, %v3567_v12  ;;  %v2347_v29 = vpop.permute.xlu0 %2346 }
 0xb84   :  { %v3387_v54 = vcombine.low %v2383_v17, %v2385_v16  ;;  %v3388_v51 = vcombine.high %v2383_v17, %v2385_v16  ;;  %v2353_v56 = vrot.slane %v2349_v53, 4  ;;  %v2352_v52 = vrot.slane %v2347_v29, 4 }
 0xb85   :  { %v2498_v17 = vsel %vm60_vm1, %v2494_v42, %v2495_v22 }
 0xb86   :  { %v2356_v36 = vsel %vm60_vm1, %v2352_v52, %v2353_v56  ;;  %2660 = vmatprep.subr.bf16.mxu0 %v3388_v51  ;;  %v2499_v51 = vsel %vm298_vm9, %v4533_v31, %v2498_v17 }
 0xb87   :  { %v2357_v44 = vsel %vm149_vm5, %v2347_v29, %v2356_v36  ;;  %v2321_v26 = vpop.permute.xlu1 %2320  ;;  %2661 = vmatpush1.bf16.msra.mxu0 %v3387_v54  ;;  %v2319_v41 = vpop.permute.xlu0 %2318  ;;  %v2466_v29 = vrot.slane %v4547_v7, 4 }
 0xb88   :  { %v3385_v57 = vcombine.low %v2355_v20, %v2357_v44  ;;  %v3386_v58 = vcombine.high %v2355_v20, %v2357_v44  ;;  %v2325_v33 = vrot.slane %v2321_v26, 4  ;;  %v2324_v24 = vrot.slane %v2319_v41, 4 }
 0xb8a   :  { %v2328_v59 = vsel %vm60_vm1, %v2324_v24, %v2325_v33  ;;  %2662 = vmatprep.subr.bf16.mxu0 %v3386_v58  ;;  %v3536_v58 = vld [vmem:[%s4919_s1] sm:$0x3] }
 0xb8b   :  { %v2329_v63 = vsel %vm120_vm6, %v2319_v41, %v2328_v59  ;;  %v2293_v47 = vpop.permute.xlu1 %2292  ;;  %2663 = vmatpush1.bf16.msra.mxu0 %v3385_v57  ;;  %v2291_v61 = vpop.permute.xlu0 %2290  ;;  %v3490_v57 = vld [vmem:[%s4920_s2 + $0x40] ss:$8 sps:$4 sm:$0xff]   ;;  %vm2697_vm4 = vcmp.lt.f32.partialorder %v3536_v58, 50.0  ;;  %v4711_v58 = vld [vmem:[%s4922_s4 + $0x30] ss:$8 sps:$4 sm:$0xff]   ;;  %s3604_s2 = smov [#allocation4]  }
 0xb8c   :  { %v3383_v4 = vcombine.low %v2327_v45, %v2329_v63  ;;  %v3384_v18 = vcombine.high %v2327_v45, %v2329_v63  ;;  %v2297_v62 = vrot.slane %v2293_v47, 4  ;;  %v2296_v55 = vrot.slane %v2291_v61, 4  ;;  %vm2698_vm5 = vmand %vm496_vm11, %vm2697_vm4  ;;  %v2805_v63 = vld [vmem:[#allocation2 + $0x1c] sm:$0xf]  ;;  %s3253_s30 = sshll.u32 %s3604_s2, 4  ;;  %s3254_s30 = int_to_ptr.vmem [resolvable:$true] %s3253_s30 }
 0xb8d   :  { %s3569_s9 = scalar_lea.vmem %s3254_s30, 32  ;;  %p3574_p1 = scmp.lt.s32.totalorder %s3254_s30, %s3254_s30 }
 0xb8e   :  { %v2300_v28 = vsel %vm60_vm1, %v2296_v55, %v2297_v62  ;;  %2664 = vmatprep.subr.bf16.mxu0 %v3384_v18  ;;  %p3570_p0 = scmp.ne.s32.totalorder %s3254_s30, %s3569_s9  ;;  %p3575_p2 = scmp.lt.s32.totalorder %s3569_s9, %s3569_s9 }
 0xb8f   :  { %v2301_v13 = vsel %vm91_vm7, %v2291_v61, %v2300_v28  ;;  %v2265_v9 = vpop.permute.xlu1 %2264  ;;  %2665 = vmatpush1.bf16.msra.mxu0 %v3383_v4  ;;  %v2263_v11 = vpop.permute.xlu0 %2262 }
 0xb90   :  { %v3381_v34 = vcombine.low %v2299_v1, %v2301_v13  ;;  %v3382_v14 = vcombine.high %v2299_v1, %v2301_v13  ;;  %v2269_v21 = vrot.slane %v2265_v9, 4  ;;  %v2268_v30 = vrot.slane %v2263_v11, 4  ;;  %p3576_p3 = por %p3575_p2, %p3574_p1 }
 0xb92   :  { %v2272_v15 = vsel %vm60_vm1, %v2268_v30, %v2269_v21  ;;  %2666 = vmatprep.subr.bf16.mxu0 %v3382_v14  ;;  %p3577_p4 = pnand %p3576_p3, %p3570_p0 }
 0xb93   :  { %v2273_v27 = vsel %vm62_vm8, %v2263_v11, %v2272_v15  ;;  %v2461_v10 = vpop.permute.xlu1 %2460  ;;  %2667 = vmatpush1.bf16.msra.mxu0 %v3381_v34  ;;  %v2491_v5 = vpop.permute.xlu0 %2490 }
 0xb94   :  { %v3379_v48 = vcombine.low %v2271_v37, %v2273_v27  ;;  %v3380_v16 = vcombine.high %v2271_v37, %v2273_v27  ;;  %v2467_v53 = vrot.slane %v2461_v10, 4  ;;  %v2496_v12 = vrot.slane %v2491_v5, 4 }
 0xb96   :  { %v2500_v54 = vsel %vm60_vm1, %v2496_v12, %v2497_v60  ;;  %2668 = vmatprep.subr.bf16.mxu0 %v3380_v16  ;;  %v2470_v23 = vsel %vm60_vm1, %v2466_v29, %v2467_v53 }
 0xb97   :  { %v2501_v43 = vsel %vm298_vm9, %v2491_v5, %v2500_v54  ;;  %v2465_v56 = vpop.permute.xlu1 %2464  ;;  %2669 = vmatpush1.bf16.msra.mxu0 %v3379_v48  ;;  %v2463_v52 = vpop.permute.xlu0 %2462  ;;  %v2471_v44 = vsel %vm269_vm10, %v4547_v7, %v2470_v23  ;;  %v2699_v7 = vsel %vm2698_vm5, 1, %v3600_v25 }
 0xb98   :  { %v3397_v20 = vcombine.low %v2499_v51, %v2501_v43  ;;  %v3398_v36 = vcombine.high %v2499_v51, %v2501_v43  ;;  %v2469_v8 = vrot.slane %v2465_v56, 4  ;;  %v2468_v46 = vrot.slane %v2463_v52, 4  ;;  %v2803_v51 = vld [vmem:[#allocation2 + $0xc] sm:$0xf]  ;;  %v4654_v43 = vld [vmem:[%s4922_s4 + $0x70] ss:$8 sps:$4 sm:$0xff]  }
 0xb99   :  { %v2703_v33 = vrot.slane %v2699_v7, %v3780_v38  ;;  %v2707_v45 = vrot.slane %v2699_v7, %v3782_v39  ;;  %v4659_v56 = vld [vmem:[%s4922_s4 + $0x74] ss:$8 sps:$4 sm:$0xff]  }
 0xb9a   :  { %v2472_v49 = vsel %vm60_vm1, %v2468_v46, %v2469_v8  ;;  %2682 = vmatprep.subr.bf16.mxu0 %v3398_v36  ;;  %2956 = vmatprep.subr.bf16.mxu1 %v4659_v56  ;;  %v4695_v36 = vld [vmem:[%s4922_s4 + $0x40] ss:$8 sps:$4 sm:$0xff]  }
 0xb9b   :  { %v2473_v26 = vsel %vm269_vm10, %v2463_v52, %v2472_v49  ;;  %2683 = vmatpush2.bf16.msra.mxu0 %v3397_v20  ;;  %vm4617_vm6 = vcmp.eq.s32.totalorder %v2703_v33, 1  ;;  %vm4621_vm7 = vcmp.eq.s32.totalorder %v2707_v45, 1  ;;  %2957 = vmatpush1.bf16.msra.mxu1 %v4654_v43  ;;  %v4683_v52 = vld [vmem:[%s4922_s4 + $0x50] ss:$8 sps:$4 sm:$0xff]   ;;  %v4689_v20 = vld [vmem:[%s4922_s4 + $0x44] ss:$8 sps:$4 sm:$0xff]  }
 0xb9c   :  { %v3395_v41 = vcombine.low %v2471_v44, %v2473_v26  ;;  %v3396_v31 = vcombine.high %v2471_v44, %v2473_v26  ;;  %v4704_v26 = vld [vmem:[%s4922_s4 + $0x34] ss:$8 sps:$4 sm:$0xff]  }
 0xb9e   :  { %2684 = vmatprep.subr.bf16.mxu0 %v3396_v31 }
 0xb9f   :  { %2685 = vmatpush2.bf16.msra.mxu0 %v3395_v41 }
 0xba0   :  { %3162 = vmatprep.subr.mxu0 %v3603_v40 }
 0xba2   :  { %2687 = vmatmul.mubr.bf16.vlgmr.msra.gmra.mxu0 %v3490_v57 }
 0xba4   :  { %v2535_v24 = vpop.permute.xlu0 %2534  ;;  %v2540_v35 = vpop.permute.xlu1 %2539 }
 0xc62   :  { %v2688_v59 = vpop.f32.mrf.mxu0 }
 0xc63   :  { %v4615_v32 = vadd.f32 %v2688_v59, %v2535_v24 }
 0xc64   :  { %v2690_v2 = vpop.f32.mrf.mxu0 }
 0xc65   :  { %v4625_v47 = vadd.f32 %v2690_v2, %v2535_v24  ;;  %v2710_v38 = vsel %vm4617_vm6, %v4615_v32, 0.0 }
 0xc66   :  { %v2692_v61 = vpop.f32.mrf.mxu0  ;;  %v2722_v11 = vmul.f32 %v2710_v38, %v2710_v38 }
 0xc67   :  { %v2711_v39 = vsel %vm4621_vm7, %v4625_v47, 0.0  ;;  %v4633_v4 = vadd.f32 %v2692_v61, %v2540_v35 }
 0xc68   :  { %v2714_v18 = vadd.f32 %v2711_v39, %v2710_v38  ;;  %v2694_v62 = vpop.f32.mrf.mxu0  ;;  %v2723_v50 = vmul.f32 %v2711_v39, %v2711_v39 }
 0xc69   :  { %v2712_v55 = vsel %vm4617_vm6, %v4633_v4, 0.0  ;;  %v4638_v28 = vadd.f32 %v2694_v62, %v2540_v35  ;;  %v4718_v35 = vld [vmem:[%s4922_s4 + $0x20] ss:$8 sps:$4 sm:$0xff]  }
 0xc6a   :  { %2715 = vadd.xlane.f32.xlu1 %v2714_v18  ;;  %v2724_v22 = vmul.f32 %v2712_v55, %v2712_v55  ;;  %v2726_v14 = vadd.f32 %v2723_v50, %v2722_v11 }
 0xc6b   :  { %v2713_v1 = vsel %vm4621_vm7, %v4638_v28, 0.0 }
 0xc6c   :  { %v2717_v13 = vadd.f32 %v2713_v1, %v2712_v55  ;;  %v2725_v9 = vmul.f32 %v2713_v1, %v2713_v1  ;;  %v4730_v1 = vld [vmem:[%s4922_s4 + $0x14] ss:$8 sps:$4 sm:$0xff]  }
 0xc6e   :  { %2718 = vadd.xlane.f32.xlu0 %v2717_v13  ;;  %v2729_v34 = vadd.f32 %v2725_v9, %v2724_v22  ;;  %v4735_v13 = vld [vmem:[%s4922_s4 + $0x10] ss:$8 sps:$4 sm:$0xff]  }
 0xc70   :  { %2730 = vadd.xlane.f32.xlu1 %v2729_v34 }
 0xc72   :  { %2727 = vadd.xlane.f32.xlu0 %v2726_v14 }
 0xc81   :  { %2763 = vperm.xlu1 %3472, %v4508_v0  }
 0xc85   :  { %3473 = vset.pattern.permute.xlu1 %v3602_v6 }
 0xcf3   :  { %v2716_v21 = vpop.xlane.xlu1 %2715 }
 0xcf4   :  { %v2720_v42 = vmul.f32 0.011111111, %v2716_v21 }
 0xcf6   :  { %v2734_v5 = vmul.f32 %v2720_v42, %v2720_v42  ;;  %v2744_v49 = vsub.f32 %v4615_v32, %v2720_v42  ;;  %v2745_v44 = vsub.f32 %v4625_v47, %v2720_v42  ;;  %v4723_v47 = vld [vmem:[%s4922_s4 + $0x24] ss:$8 sps:$4 sm:$0xff]   ;;  %v4750_v42 = vld [vmem:[%s4922_s4] ss:$8 sps:$4 sm:$0xff]  }
 0xcf7   :  { %v2719_v30 = vpop.xlane.xlu0 %2718 }
 0xcf8   :  { %v2721_v15 = vmul.f32 0.011111111, %v2719_v30 }
 0xcf9   :  { %v2731_v37 = vpop.xlane.xlu1 %2730 }
 0xcfa   :  { %v2733_v17 = vmul.f32 0.011111111, %v2731_v37  ;;  %v2735_v60 = vmul.f32 %v2721_v15, %v2721_v15  ;;  %v2746_v41 = vsub.f32 %v4633_v4, %v2721_v15  ;;  %v2747_v31 = vsub.f32 %v4638_v28, %v2721_v15  ;;  %v4755_v15 = vld [vmem:[%s4922_s4 + $0x4] ss:$8 sps:$4 sm:$0xff]   ;;  %v2865_v37 = vld [vmem:[%s4924_s6 + $0x78] sm:$0xff] }
 0xcfb   :  { %v2728_v27 = vpop.xlane.xlu0 %2727  ;;  %3163 = vmatpush1.msra.mxu0 %v2865_v37 }
 0xcfc   :  { %v2737_v10 = vsub.f32 %v2733_v17, %v2735_v60  ;;  %v2732_v48 = vmul.f32 0.011111111, %v2728_v27  ;;  %v2864_v17 = vld [vmem:[%s4924_s6 + $0x70] sm:$0xff]  ;;  %3164 = vmatprep.subr.mxu0 %v3603_v40  ;;  %v2863_v60 = vld [vmem:[%s4924_s6 + $0x68] sm:$0xff]  ;;  %v2862_v27 = vld [vmem:[%s4924_s6 + $0x60] sm:$0xff] }
 0xcfd   :  { %v2764_v8 = vpop.permute.xlu1 %2763  ;;  %3165 = vmatpush1.msra.mxu0 %v2864_v17 }
 0xcfe   :  { %v2739_v16 = vadd.f32 1e-05, %v2737_v10  ;;  %v2736_v53 = vsub.f32 %v2732_v48, %v2734_v5  ;;  %3166 = vmatprep.subr.mxu0 %v3603_v40  ;;  %v2861_v10 = vld [vmem:[%s4924_s6 + $0x58] sm:$0xff]  ;;  %v2860_v5 = vld [vmem:[%s4924_s6 + $0x50] sm:$0xff]  ;;  %v2859_v48 = vld [vmem:[%s4924_s6 + $0x48] sm:$0xff] }
 0xcff   :  { %3167 = vmatpush1.msra.mxu0 %v2863_v60 }
 0xd00   :  { %3531 = vrsqrt.f32 %v2739_v16  ;;  %v2738_v12 = vadd.f32 1e-05, %v2736_v53  ;;  %3168 = vmatprep.subr.mxu0 %v3603_v40  ;;  %v2858_v16 = vld [vmem:[%s4924_s6 + $0x40] sm:$0xff] }
 0xd01   :  { %3169 = vmatpush1.msra.mxu0 %v2862_v27 }
 0xd02   :  { %3533 = vrsqrt.f32 %v2738_v12  ;;  %3170 = vmatprep.subr.mxu0 %v3603_v40 }
 0xd03   :  { %3171 = vmatpush1.msra.mxu0 %v2861_v10 }
 0xd04   :  { %3172 = vmatprep.subr.mxu0 %v3603_v40 }
 0xd05   :  { %3173 = vmatpush1.msra.mxu0 %v2860_v5 }
 0xd06   :  { %3174 = vmatprep.subr.mxu0 %v3603_v40 }
 0xd07   :  { %3175 = vmatpush1.msra.mxu0 %v2859_v48 }
 0xd08   :  { %3176 = vmatprep.subr.mxu0 %v3603_v40 }
 0xd09   :  { %3177 = vmatpush1.msra.mxu0 %v2858_v16 }
 0xd0a   :  { %3178 = vmatprep.subr.mxu0 %v3603_v40 }
 0xd0d   :  { %v3532_v29 = vpop.eup %3531 }
 0xd0e   :  { %v2743_v54 = vmul.f32 %v3532_v29, %v4513_v19 }
 0xd0f   :  { %v3534_v6 = vpop.eup %3533 }
 0xd10   :  { %2755 = vperm.xlu1 %3473, %v2743_v54   ;;  %v2742_v23 = vmul.f32 %v3534_v6, %v4508_v0  ;;  %v4664_v0 = vld [vmem:[%s4922_s4 + $0x64] ss:$8 sps:$4 sm:$0xff]  }
 0xd11   :  { %2958 = vmatprep.subr.bf16.mxu1 %v4664_v0 }
 0xd12   :  { %2750 = vperm.xlu0 %3471, %v2742_v23  }
 0xd14   :  { %3474 = vset.pattern.permute.xlu1 %v3601_v3 }
 0xd15   :  { %2767 = vperm.xlu1 %3474, %v4513_v19   ;;  %v4677_v19 = vld [vmem:[%s4922_s4 + $0x54] ss:$8 sps:$4 sm:$0xff]  }
 0xd16   :  { %3475 = vset.pattern.permute.xlu0 %v3601_v3  ;;  %v4671_v3 = vld [vmem:[%s4922_s4 + $0x60] ss:$8 sps:$4 sm:$0xff]  }
 0xd17   :  { %2959 = vmatpush1.bf16.msra.mxu1 %v4671_v3 }
 0xd18   :  { %2960 = vmatprep.subr.bf16.mxu1 %v4677_v19 }
 0xd19   :  { %2812 = vrot.lane.b32.xlu1 %v2803_v51, %s3592_s0 }
 0xd1b   :  { %2961 = vmatpush1.bf16.msra.mxu1 %v4683_v52 }
 0xd1c   :  { %2962 = vmatprep.subr.bf16.mxu1 %v4689_v20 }
 0xd1f   :  { %2963 = vmatpush1.bf16.msra.mxu1 %v4695_v36 }
 0xd20   :  { %2964 = vmatprep.subr.bf16.mxu1 %v4704_v26 }
 0xd23   :  { %2965 = vmatpush1.bf16.msra.mxu1 %v4711_v58 }
 0xd24   :  { %2966 = vmatprep.subr.bf16.mxu1 %v4723_v47 }
 0xd27   :  { %2967 = vmatpush1.bf16.msra.mxu1 %v4718_v35 }
 0xd28   :  { %2968 = vmatprep.subr.bf16.mxu1 %v4730_v1 }
 0xd2b   :  { %2969 = vmatpush1.bf16.msra.mxu1 %v4735_v13 }
 0xd2c   :  { %2970 = vmatprep.subr.bf16.mxu1 %v4755_v15 }
 0xd2f   :  { %2971 = vmatpush1.bf16.msra.mxu1 %v4750_v42 }
 0xd30   :  { %3022 = vmatprep.subr.mxu1 %v3603_v40 }
 0xd8b   :  { %v2756_v46 = vpop.permute.xlu1 %2755 }
 0xd8c   :  { %v2760_v24 = vmul.f32 %v2756_v46, %v2746_v41  ;;  %v2761_v45 = vmul.f32 %v2756_v46, %v2747_v31 }
 0xd8d   :  { %v2751_v57 = vpop.permute.xlu0 %2750 }
 0xd8e   :  { %v2758_v7 = vmul.f32 %v2751_v57, %v2744_v49  ;;  %v2759_v33 = vmul.f32 %v2751_v57, %v2745_v44 }
 0xd90   :  { %v2770_v59 = vadd.f32 %v2764_v8, %v2758_v7  ;;  %v2771_v32 = vadd.f32 %v2764_v8, %v2759_v33  ;;  %v2768_v2 = vpop.permute.xlu1 %2767 }
 0xd91   :  { %v2772_v61 = vadd.f32 %v2768_v2, %v2760_v24  ;;  %v2773_v38 = vadd.f32 %v2768_v2, %v2761_v45  ;;  %v2857_v24 = vld [vmem:[%s4924_s6 + $0x38] sm:$0xff]  ;;  %v2856_v45 = vld [vmem:[%s4924_s6 + $0x30] sm:$0xff] }
 0xd92   :  { %v2774_v39 = vmul.f32 0.01, %v2770_v59  ;;  %v2775_v4 = vmul.f32 0.01, %v2771_v32  ;;  %3179 = vmatpush1.msra.mxu0 %v2857_v24  ;;  %v2853_v2 = vld [vmem:[%s4924_s6 + $0x18] sm:$0xff] }
 0xd93   :  { %v2776_v18 = vmul.f32 0.01, %v2772_v61  ;;  %v2777_v62 = vmul.f32 0.01, %v2773_v38  ;;  %3180 = vmatprep.subr.mxu0 %v3603_v40 }
 0xd94   :  { %v2778_v55 = vmax.f32 %v2770_v59, %v2774_v39  ;;  %v2779_v28 = vmax.f32 %v2771_v32, %v2775_v4  ;;  %v2813_v53 = vpop.permute.xlu1 %2812  ;;  %3181 = vmatpush1.msra.mxu0 %v2856_v45  ;;  %v2855_v59 = vld [vmem:[%s4924_s6 + $0x28] sm:$0xff]  ;;  %v2854_v32 = vld [vmem:[%s4924_s6 + $0x20] sm:$0xff]  ;;  %v2869_v4 = vld [vmem:[%s4924_s6 + $0x98] sm:$0xff] }
 0xd95   :  { %v2780_v50 = vmax.f32 %v2772_v61, %v2776_v18  ;;  %v2781_v22 = vmax.f32 %v2773_v38, %v2777_v62  ;;  %v2819_v6 = vrot.slane %v2813_v53, 4  ;;  %3182 = vmatprep.subr.mxu0 %v3603_v40  ;;  %v2852_v61 = vld [vmem:[%s4924_s6 + $0x10] sm:$0xff]  ;;  %v2851_v38 = vld [vmem:[%s4924_s6 + $0x8] sm:$0xff]  ;;  %v2850_v39 = vld [vmem:[%s4924_s6] sm:$0xff] }
 0xd96   :  { %v2782_v9 = vsel %vm4617_vm6, %v2778_v55, 0.0  ;;  %v2783_v11 = vsel %vm4621_vm7, %v2779_v28, 0.0  ;;  %3183 = vmatpush1.msra.mxu0 %v2855_v59  ;;  %v2868_v18 = vld [vmem:[%s4924_s6 + $0x90] sm:$0xff]  ;;  %v2867_v62 = vld [vmem:[%s4924_s6 + $0x88] sm:$0xff]  ;;  %v2866_v55 = vld [vmem:[%s4924_s6 + $0x80] sm:$0xff] }
 0xd97   :  { %v3431_v34 = vpack.c.bf16 %v2783_v11, %v2782_v9  ;;  %v2784_v14 = vsel %vm4617_vm6, %v2780_v50, 0.0  ;;  %v2785_v21 = vsel %vm4621_vm7, %v2781_v22, 0.0  ;;  %3184 = vmatprep.subr.mxu0 %v3603_v40  ;;  %v2846_v50 = vld [vmem:[%s4923_s5] sm:$0xff]  ;;  %v2847_v22 = vld [vmem:[%s4923_s5 + $0x8] sm:$0xff]  ;;  %v2848_v11 = vld [vmem:[%s4923_s5 + $0x10] sm:$0xff] }
 0xd98   :  { %v3432_v30 = vpack.c.bf16 %v2785_v21, %v2784_v14  ;;  %3185 = vmatpush1.msra.mxu0 %v2854_v32  ;;  %v2849_v14 = vld [vmem:[%s4923_s5 + $0x18] sm:$0xff] }
 0xd99   :  { %2798 = vst [vmem:[#allocation2 + $0x4] sm:$0xff] %v3431_v34  ;;  %2810 = vrot.lane.b32.xlu1 %v3431_v34, %s3592_s0  ;;  %3186 = vmatprep.subr.mxu0 %v3603_v40 }
 0xd9a   :  { %2799 = vst [vmem:[#allocation2 + $0x14] sm:$0xff] %v3432_v30  ;;  %3187 = vmatpush1.msra.mxu0 %v2853_v2 }
 0xd9b   :  { %3188 = vmatprep.subr.mxu0 %v3603_v40 }
 0xd9c   :  { %3189 = vmatpush1.msra.mxu0 %v2852_v61 }
 0xd9d   :  { %2814 = vrot.lane.b32.xlu1 %v3432_v30, %s3592_s0  ;;  %3190 = vmatprep.subr.mxu0 %v3603_v40 }
 0xd9e   :  { %3191 = vmatpush1.msra.mxu0 %v2851_v38 }
 0xd9f   :  { %3192 = vmatprep.subr.mxu0 %v3603_v40 }
 0xda0   :  { %3193 = vmatpush1.msra.mxu0 %v2850_v39 }
 0xda1   :  { %2816 = vrot.lane.b32.xlu1 %v2805_v63, %s3592_s0  ;;  %3218 = vmatprep.subr.mxu0 %v3603_v40 }
 0xda2   :  { %3219 = vmatpush2.msra.mxu0 %v2869_v4 }
 0xda3   :  { %3220 = vmatprep.subr.mxu0 %v3603_v40 }
 0xda4   :  { %3221 = vmatpush2.msra.mxu0 %v2868_v18 }
 0xda5   :  { %3222 = vmatprep.subr.mxu0 %v3603_v40 }
 0xda6   :  { %3223 = vmatpush2.msra.mxu0 %v2867_v62 }
 0xda7   :  { %3224 = vmatprep.subr.mxu0 %v3603_v40 }
 0xda8   :  { %3225 = vmatpush2.msra.mxu0 %v2866_v55 }
 0xe0b   :  { %v2811_v12 = vpop.permute.xlu1 %2810 }
 0xe0c   :  { %v2818_v29 = vrot.slane %v2811_v12, 4 }
 0xe0e   :  { %v2822_v23 = vsel %vm60_vm1, %v2818_v29, %v2819_v6 }
 0xe0f   :  { %v2815_v54 = vpop.permute.xlu1 %2814  ;;  %v2823_v49 = vsel %vm211_vm3, %v2811_v12, %v2822_v23 }
 0xe10   :  { %v2820_v8 = vrot.slane %v2815_v54, 4  ;;  %v4800_v31 = vmax.bf16 %v3431_v34, %v2823_v49 }
 0xe13   :  { %v2817_v51 = vpop.permute.xlu1 %2816 }
 0xe14   :  { %v2821_v46 = vrot.slane %v2817_v51, 4 }
 0xe16   :  { %v2824_v44 = vsel %vm60_vm1, %v2820_v8, %v2821_v46  ;;  %vm3235_vm1 = vcmask 1040384  }
 0xe17   :  { %v2825_v41 = vsel %vm211_vm3, %v2815_v54, %v2824_v44  ;;  %vm3245_vm3 = vcmask 74752  }
 0xe18   :  { %v4802_v57 = vmax.bf16 %v3432_v30, %v2825_v41 }
 0xe1a   :  { %v3402_v7 = vcombine.low %v4800_v31, %v4802_v57  ;;  %v3420_v33 = vcombine.high %v4800_v31, %v4802_v57 }
 0xe1c   :  { %2989 = vmatmul.mubr.bf16.vlgmr.msra.gmra.mxu1 %v3402_v7 }
 0xe1d   :  { %3023 = vmatpush1.msra.mxu1 %v2865_v37 }
 0xe1e   :  { %3024 = vmatprep.subr.mxu1 %v3603_v40 }
 0xe1f   :  { %3025 = vmatpush1.msra.mxu1 %v2864_v17 }
 0xe20   :  { %3026 = vmatprep.subr.mxu1 %v3603_v40 }
 0xe21   :  { %3027 = vmatpush1.msra.mxu1 %v2863_v60 }
 0xe22   :  { %3028 = vmatprep.subr.mxu1 %v3603_v40 }
 0xe23   :  { %3029 = vmatpush1.msra.mxu1 %v2862_v27 }
 0xe24   :  { %3030 = vmatprep.subr.mxu1 %v3603_v40 }
 0xe25   :  { %3031 = vmatpush1.msra.mxu1 %v2861_v10 }
 0xe26   :  { %3032 = vmatprep.subr.mxu1 %v3603_v40 }
 0xe27   :  { %3033 = vmatpush1.msra.mxu1 %v2860_v5 }
 0xe28   :  { %3034 = vmatprep.subr.mxu1 %v3603_v40 }
 0xe29   :  { %3035 = vmatpush1.msra.mxu1 %v2859_v48 }
 0xe2a   :  { %3036 = vmatprep.subr.mxu1 %v3603_v40 }
 0xe2b   :  { %3037 = vmatpush1.msra.mxu1 %v2858_v16 }
 0xe2c   :  { %3038 = vmatprep.subr.mxu1 %v3603_v40 }
 0xe2d   :  { %3039 = vmatpush1.msra.mxu1 %v2857_v24 }
 0xe2e   :  { %3040 = vmatprep.subr.mxu1 %v3603_v40 }
 0xe2f   :  { %3041 = vmatpush1.msra.mxu1 %v2856_v45 }
 0xe30   :  { %3042 = vmatprep.subr.mxu1 %v3603_v40 }
 0xe31   :  { %3043 = vmatpush1.msra.mxu1 %v2855_v59 }
 0xe32   :  { %3044 = vmatprep.subr.mxu1 %v3603_v40 }
 0xe33   :  { %3045 = vmatpush1.msra.mxu1 %v2854_v32 }
 0xe34   :  { %3046 = vmatprep.subr.mxu1 %v3603_v40 }
 0xe35   :  { %3047 = vmatpush1.msra.mxu1 %v2853_v2  ;;  %v3422_v2 = vld [vmem:[%s4925_s7] ss:$0 sm:$0xff] }
 0xe36   :  { %3048 = vmatprep.subr.mxu1 %v3603_v40 }
 0xe37   :  { %3049 = vmatpush1.msra.mxu1 %v2852_v61 }
 0xe38   :  { %3050 = vmatprep.subr.mxu1 %v3603_v40 }
 0xe39   :  { %3051 = vmatpush1.msra.mxu1 %v2851_v38 }
 0xe3a   :  { %3052 = vmatprep.subr.mxu1 %v3603_v40 }
 0xe3b   :  { %3053 = vmatpush1.msra.mxu1 %v2850_v39 }
 0xe3c   :  { %3078 = vmatprep.subr.mxu1 %v3603_v40 }
 0xe3d   :  { %3079 = vmatpush2.msra.mxu1 %v2869_v4 }
 0xe3e   :  { %3080 = vmatprep.subr.mxu1 %v3603_v40 }
 0xe3f   :  { %3081 = vmatpush2.msra.mxu1 %v2868_v18 }
 0xe40   :  { %3082 = vmatprep.subr.mxu1 %v3603_v40 }
 0xe41   :  { %3083 = vmatpush2.msra.mxu1 %v2867_v62 }
 0xe42   :  { %3084 = vmatprep.subr.mxu1 %v3603_v40 }
 0xe43   :  { %3085 = vmatpush2.msra.mxu1 %v2866_v55 }
 0xe44   :  { %3096 = vmatprep.subr.bf16.mxu1 %v4659_v56 }
 0xedc   :  { %v2990_v28 = vpop.f32.mrf.mxu1 }
 0xedd   :  { %v2999_v56 = vmul.f32 %v2990_v28, %v2846_v50 }
 0xede   :  { %v2992_v9 = vpop.f32.mrf.mxu1 }
 0xedf   :  { %v3000_v21 = vmul.f32 %v2992_v9, %v2847_v22 }
 0xee0   :  { %v2994_v34 = vpop.f32.mrf.mxu1 }
 0xee1   :  { %v3001_v30 = vmul.f32 %v2994_v34, %v2848_v11  ;;  %v3010_v17 = vsel %vm449_vm0, %v3000_v21, 0.0 }
 0xee2   :  { %v2996_v40 = vpop.f32.mrf.mxu1 }
 0xee3   :  { %v3003_v63 = vadd.f32 %v3001_v30, %v2999_v56  ;;  %v3002_v37 = vmul.f32 %v2996_v40, %v2849_v14 }
 0xee5   :  { %v3004_v60 = vrot.slane %v3003_v63, 4  ;;  %v3011_v27 = vsel %vm449_vm0, %v3002_v37, 0.0 }
 0xee6   :  { %v3012_v10 = vadd.f32 %v3011_v27, %v3010_v17 }
 0xee7   :  { %v3005_v5 = vadd.f32 %v3004_v60, %v3003_v63 }
 0xee8   :  { %v3013_v48 = vrot.slane %v3012_v10, 4 }
 0xee9   :  { %v3006_v16 = vrot.slane %v3005_v5, 2 }
 0xeea   :  { %v3014_v53 = vadd.f32 %v3013_v48, %v3012_v10 }
 0xeeb   :  { %v3007_v12 = vadd.f32 %v3006_v16, %v3005_v5 }
 0xeec   :  { %v3015_v29 = vrot.slane %v3014_v53, 2 }
 0xeed   :  { %v3008_v6 = vrot.slane %v3007_v12, 1 }
 0xeee   :  { %v3016_v54 = vadd.f32 %v3015_v29, %v3014_v53 }
 0xeef   :  { %v3009_v8 = vadd.f32 %v3008_v6, %v3007_v12 }
 0xef0   :  { %v3017_v23 = vrot.slane %v3016_v54, 1 }
 0xef2   :  { %v3018_v51 = vadd.f32 %v3017_v23, %v3016_v54 }
 0xef4   :  { %3419 = vmatprep.mubr.msk.f32.mxu1 %vm449_vm0, %v3018_v51 }
 0xef5   :  { %3087 = vmatmul.mubr.f32.vlgmr.msra.gmra.mxu1 %v3009_v8 }
 0xef6   :  { %3097 = vmatpush1.bf16.msra.mxu1 %v4654_v43  ;;  %3128 = vmatprep.mubr.bf16.mxu1 %v3600_v25 }
 0xef7   :  { %3098 = vmatprep.subr.bf16.mxu1 %v4664_v0 }
 0xefa   :  { %3099 = vmatpush1.bf16.msra.mxu1 %v4671_v3 }
 0xefb   :  { %3100 = vmatprep.subr.bf16.mxu1 %v4677_v19 }
 0xefe   :  { %3101 = vmatpush1.bf16.msra.mxu1 %v4683_v52 }
 0xeff   :  { %3102 = vmatprep.subr.bf16.mxu1 %v4689_v20 }
 0xf02   :  { %3103 = vmatpush1.bf16.msra.mxu1 %v4695_v36 }
 0xf03   :  { %3104 = vmatprep.subr.bf16.mxu1 %v4704_v26 }
 0xf06   :  { %3105 = vmatpush1.bf16.msra.mxu1 %v4711_v58 }
 0xf07   :  { %3106 = vmatprep.subr.bf16.mxu1 %v4723_v47 }
 0xf0a   :  { %3107 = vmatpush1.bf16.msra.mxu1 %v4718_v35 }
 0xf0b   :  { %3108 = vmatprep.subr.bf16.mxu1 %v4730_v1 }
 0xf0e   :  { %3109 = vmatpush1.bf16.msra.mxu1 %v4735_v13 }
 0xf0f   :  { %3110 = vmatprep.subr.bf16.mxu1 %v4755_v15 }
 0xf12   :  { %3111 = vmatpush1.bf16.msra.mxu1 %v4750_v42 }
 0xf15   :  { %3129 = vmatmul.mubr.bf16.vlgmr.msra.gmra.mxu1 %v3420_v33 }
 0xfb5   :  { %v3088_v25 = vpop.f32.mrf.mxu1 }
 0xfb7   :  { %v3090_v43 = vpop.f32.mrf.mxu1 }
 0xfd5   :  { %v3130_v0 = vpop.f32.mrf.mxu1 }
 0xfd6   :  { %v3139_v52 = vmul.f32 %v3130_v0, %v2846_v50 }
 0xfd7   :  { %v3132_v3 = vpop.f32.mrf.mxu1 }
 0xfd8   :  { %v3140_v20 = vmul.f32 %v3132_v3, %v2847_v22 }
 0xfd9   :  { %v3134_v19 = vpop.f32.mrf.mxu1 }
 0xfda   :  { %v3141_v36 = vmul.f32 %v3134_v19, %v2848_v11  ;;  %v3150_v47 = vsel %vm449_vm0, %v3140_v20, 0.0 }
 0xfdb   :  { %v3136_v26 = vpop.f32.mrf.mxu1 }
 0xfdc   :  { %v3143_v58 = vadd.f32 %v3141_v36, %v3139_v52  ;;  %v3142_v35 = vmul.f32 %v3136_v26, %v2849_v14 }
 0xfde   :  { %v3144_v1 = vrot.slane %v3143_v58, 4  ;;  %v3151_v13 = vsel %vm449_vm0, %v3142_v35, 0.0 }
 0xfdf   :  { %v3152_v42 = vadd.f32 %v3151_v13, %v3150_v47 }
 0xfe0   :  { %v3145_v15 = vadd.f32 %v3144_v1, %v3143_v58 }
 0xfe1   :  { %v3153_v46 = vrot.slane %v3152_v42, 4 }
 0xfe2   :  { %v3146_v49 = vrot.slane %v3145_v15, 2 }
 0xfe3   :  { %v3154_v44 = vadd.f32 %v3153_v46, %v3152_v42 }
 0xfe4   :  { %v3147_v41 = vadd.f32 %v3146_v49, %v3145_v15 }
 0xfe5   :  { %v3155_v31 = vrot.slane %v3154_v44, 2 }
 0xfe6   :  { %v3148_v7 = vrot.slane %v3147_v41, 1 }
 0xfe7   :  { %v3156_v57 = vadd.f32 %v3155_v31, %v3154_v44 }
 0xfe8   :  { %v3149_v45 = vadd.f32 %v3148_v7, %v3147_v41 }
 0xfe9   :  { %v3157_v33 = vrot.slane %v3156_v57, 1 }
 0xfeb   :  { %v3158_v24 = vadd.f32 %v3157_v33, %v3156_v57 }
 0xfed   :  { %3421 = vmatprep.mubr.msk.f32.mxu0 %vm449_vm0, %v3158_v24 }
 0xfee   :  { %3227 = vmatmul.mubr.f32.vlgmr.msra.gmra.mxu0 %v3149_v45 }
0x10ae   :  { %v3228_v59 = vpop.f32.mrf.mxu0 }
0x10af   :  { %v3233_v32 = vrot.slane %v3228_v59, 7 }
0x10b0   :  { %v3230_v61 = vpop.f32.mrf.mxu0 }
0x10b1   :  { %v3236_v38 = vsel %vm3235_vm1, %v3088_v25, %v3233_v32 }
0x10b2   :  { %v3244_v39 = vadd.f32 %v3422_v2, %v3236_v38 }
0x10b4   :  { %3246 = vst.msk [vmem:[#allocation4] sm:$0x3] %vm3245_vm3, %v3244_v39 }
0x10b5   :  { %3580 = shalt.err (!%p3577_p4)
}
0x10b6   :  { %3256 = dma.vmem_to_hbm [thread:$0]  %s3254_s30, 32, %s4926_s8, [#allocation5]  }
0x10b7   :  { %3589 = dma.done.wait [#allocation5], 32  }
0x10b8   :  { %3590 = vsyncadd [#allocation5], 4294967264 }
0x10b9   :  { %3260 = vsyncpa [#allocation5], 1 }

</bundles_post_ra>
